<compile_context>
chip_gen: v6e
topology: v6e:2x2x1
jax: 0.10.0
libtpu: 0.0.40
codegen_flags: <defaults>
</compile_context>

<pallas_src>
import math
import numpy as np

import jax
import jax.numpy as jnp
from jax.experimental import pallas as pl
from jax.experimental.pallas import tpu as pltpu

# ---- hyperparameters (small shapes consistent with the module) --------------
NUM_CONTROL = 3
NUM_PRED = 2
NUM_ALL_FEATURES = 6
OUT_LEN = 4
DIM = 32
DEPTH = 2
HEADS = 4
FC_DIM = 64
HEAD_DIM = DIM // HEADS

B = 2
L_PAST = 8
L_CTRL = 8
SEQ = L_PAST + L_CTRL
EPS = 1e-5  # PyTorch LayerNorm default


# ---- packed-parameter layout (static, shared by host packer and kernel) -----
def _aligned8(r):
    return ((r + 7) // 8) * 8


def _make_layout(spec):
    offs, off = {}, 0
    for name, rows in spec:
        offs[name] = off
        off += _aligned8(rows)
    return offs, off


def _build_spec32():
    spec = [("pe", SEQ),
            ("w_past", NUM_ALL_FEATURES), ("b_past", 1),
            ("w_ctrl", NUM_CONTROL), ("b_ctrl", 1)]
    for l in range(DEPTH):
        spec += [(f"out_w{l}", DIM), (f"out_b{l}", 1),
                 (f"n1_w{l}", 1), (f"n1_b{l}", 1),
                 (f"ff2_w{l}", FC_DIM), (f"ff2_b{l}", 1),
                 (f"n2_w{l}", 1), (f"n2_b{l}", 1)]
    spec += [("enc_nw", 1), ("enc_nb", 1),
             ("gen_nw", 1), ("gen_nb", 1),
             ("gen_w", DIM), ("gen_b", 1)]
    return spec


def _build_spec64():
    spec = []
    for l in range(DEPTH):
        spec += [(f"ff1_w{l}", DIM), (f"ff1_b{l}", 1)]
    return spec


P32_OFF, P32_ROWS = _make_layout(_build_spec32())
P64_OFF, P64_ROWS = _make_layout(_build_spec64())
QKV_ROWS = DIM + 8        # weight rows [0:DIM], bias at row DIM (8-row aligned)


# ---- kernel ------------------------------------------------------------------
def _layernorm(x, w, b):
    mu = jnp.mean(x, axis=-1, keepdims=True)
    var = jnp.mean((x - mu) ** 2, axis=-1, keepdims=True)
    return (x - mu) * jax.lax.rsqrt(var + EPS) * w + b


def base_transformer_kernel(x_past_ref, x_ctrl_ref, p32_ref, p64_ref, qkv_ref,
                            y_ref):
    f32 = jnp.float32

    def row(name):                       # (DIM,) single packed row
        return p32_ref[P32_OFF[name]]

    def rows32(name, n):                 # (n, DIM) packed block
        o = P32_OFF[name]
        return p32_ref[o:o + n]

    # ---- embeddings + positional encoding (emb_dropout = identity in eval) ---
    pe = rows32("pe", SEQ)                                            # (SEQ, DIM)
    e_p = jnp.dot(x_past_ref[...], rows32("w_past", NUM_ALL_FEATURES),
                  preferred_element_type=f32) + row("b_past")         # (B*L_PAST, DIM)
    e_c = jnp.dot(x_ctrl_ref[...], rows32("w_ctrl", NUM_CONTROL),
                  preferred_element_type=f32) + row("b_ctrl")         # (B*L_CTRL, DIM)
    e_p = e_p.reshape(B, L_PAST, DIM) + pe[:L_PAST]
    e_c = e_c.reshape(B, L_CTRL, DIM) + pe[L_PAST:]
    # concat(past, control) along the sequence axis, then flatten to 2-D
    x = jnp.concatenate([e_p, e_c], axis=1).reshape(B * SEQ, DIM)     # (B*SEQ, DIM)

    for l in range(DEPTH):  # static unroll over encoder layers (post-LN, ReLU)
        # --- fused q|k|v projection: one (B*SEQ, DIM) @ (DIM, 3*DIM) matmul ---
        wqkv = qkv_ref[l]                                             # (DIM+8, 3*DIM)
        qkv = jnp.dot(x, wqkv[:DIM], preferred_element_type=f32) + wqkv[DIM]

        # move heads from the lane axis to the batch axis: (B*HEADS, SEQ, HD)
        def split_heads(t):
            parts = [
                qkv[:, t * DIM + h * HEAD_DIM: t * DIM + (h + 1) * HEAD_DIM]
                .reshape(B, 1, SEQ, HEAD_DIM)
                for h in range(HEADS)
            ]
            return jnp.concatenate(parts, axis=1).reshape(B * HEADS, SEQ, HEAD_DIM)

        q, k, v = split_heads(0), split_heads(1), split_heads(2)

        # --- single batched attention over all (batch, head) pairs ---
        s = jnp.einsum('bqd,bkd->bqk', q, k,
                       preferred_element_type=f32)                    # (B*H, SEQ, SEQ)
        s = s - jnp.max(s, axis=-1, keepdims=True)
        p = jnp.exp(s)
        p = p / jnp.sum(p, axis=-1, keepdims=True)                    # exact softmax
        o = jnp.einsum('bqk,bkd->bqd', p, v,
                       preferred_element_type=f32)                    # (B*H, SEQ, HD)

        # concat heads back along lanes, then one output-projection matmul
        o4 = o.reshape(B, HEADS, SEQ, HEAD_DIM)
        o_cat = jnp.concatenate([o4[:, h] for h in range(HEADS)], axis=-1)
        attn = jnp.dot(o_cat.reshape(B * SEQ, DIM), rows32(f"out_w{l}", DIM),
                       preferred_element_type=f32) + row(f"out_b{l}")
        x = _layernorm(x + attn, row(f"n1_w{l}"), row(f"n1_b{l}"))

        # --- feed-forward (ReLU, post-LN) ---
        o64 = P64_OFF[f"ff1_w{l}"]
        h1 = jnp.dot(x, p64_ref[o64:o64 + DIM],
                     preferred_element_type=f32) + p64_ref[P64_OFF[f"ff1_b{l}"]]
        h1 = jnp.maximum(h1, 0.0)
        h2 = jnp.dot(h1, rows32(f"ff2_w{l}", FC_DIM),
                     preferred_element_type=f32) + row(f"ff2_b{l}")
        x = _layernorm(x + h2, row(f"n2_w{l}"), row(f"n2_b{l}"))

    # ---- encoder final norm + generator, fused across batches ----
    # module returns y[:, -(2*out_len):-out_len, :] -> rows r0 : r0+OUT_LEN
    r0 = SEQ - 2 * OUT_LEN
    xt = jnp.concatenate(
        [x[b * SEQ + r0: b * SEQ + r0 + OUT_LEN] for b in range(B)], axis=0)
    xt = _layernorm(xt, row("enc_nw"), row("enc_nb"))                 # encoder norm
    g = _layernorm(xt, row("gen_nw"), row("gen_nb"))                  # generator norm
    yt = jnp.dot(g, rows32("gen_w", DIM),
                 preferred_element_type=f32) + row("gen_b")           # (B*OUT_LEN, DIM)
    y_ref[...] = yt[:, :NUM_PRED].astype(y_ref.dtype)                 # single store


# ---- host-side helpers -------------------------------------------------------
def positional_encoding(seq, d):
    pe = np.zeros((seq, d), dtype=np.float32)
    position = np.arange(seq, dtype=np.float32)[:, None]
    div_term = np.exp(np.arange(0, d, 2, dtype=np.float32) * -(math.log(10000.0) / d))
    pe[:, 0::2] = np.sin(position * div_term)
    pe[:, 1::2] = np.cos(position * div_term)
    return pe


def init_params(key):
    keys = iter(jax.random.split(key, 32))

    def uni(shape, fan_in):
        bound = 1.0 / math.sqrt(fan_in)
        return jax.random.uniform(next(keys), shape, jnp.float32, -bound, bound)

    p = {}
    p["w_past"] = uni((NUM_ALL_FEATURES, DIM), NUM_ALL_FEATURES)
    p["b_past"] = uni((1, DIM), NUM_ALL_FEATURES)
    p["w_ctrl"] = uni((NUM_CONTROL, DIM), NUM_CONTROL)
    p["b_ctrl"] = uni((1, DIM), NUM_CONTROL)
    p["in_w"] = uni((DEPTH, DIM, 3 * DIM), DIM)
    p["in_b"] = uni((DEPTH, 1, 3 * DIM), DIM)
    p["out_w"] = uni((DEPTH, DIM, DIM), DIM)
    p["out_b"] = uni((DEPTH, 1, DIM), DIM)
    p["n1_w"] = jnp.ones((DEPTH, 1, DIM), jnp.float32)
    p["n1_b"] = jnp.zeros((DEPTH, 1, DIM), jnp.float32)
    p["ff1_w"] = uni((DEPTH, DIM, FC_DIM), DIM)
    p["ff1_b"] = uni((DEPTH, 1, FC_DIM), DIM)
    p["ff2_w"] = uni((DEPTH, FC_DIM, DIM), FC_DIM)
    p["ff2_b"] = uni((DEPTH, 1, DIM), FC_DIM)
    p["n2_w"] = jnp.ones((DEPTH, 1, DIM), jnp.float32)
    p["n2_b"] = jnp.zeros((DEPTH, 1, DIM), jnp.float32)
    p["enc_nw"] = jnp.ones((1, DIM), jnp.float32)
    p["enc_nb"] = jnp.zeros((1, DIM), jnp.float32)
    p["gen_nw"] = jnp.ones((1, DIM), jnp.float32)
    p["gen_nb"] = jnp.zeros((1, DIM), jnp.float32)
    p["gen_w"] = uni((DIM, NUM_PRED), DIM)
    p["gen_b"] = uni((1, NUM_PRED), DIM)
    return p


def pack_params(params):
    """Pack the 22 parameter tensors + PE into 3 flat f32 kernel operands."""
    p32 = np.zeros((P32_ROWS, DIM), np.float32)
    p64 = np.zeros((P64_ROWS, FC_DIM), np.float32)

    def put(buf, offs, name, arr):
        a = np.asarray(arr, np.float32)
        a = a.reshape(-1, a.shape[-1])
        buf[offs[name]:offs[name] + a.shape[0], :a.shape[1]] = a

    put(p32, P32_OFF, "pe", positional_encoding(SEQ, DIM))
    put(p32, P32_OFF, "w_past", params["w_past"])
    put(p32, P32_OFF, "b_past", params["b_past"])
    put(p32, P32_OFF, "w_ctrl", params["w_ctrl"])
    put(p32, P32_OFF, "b_ctrl", params["b_ctrl"])
    for l in range(DEPTH):
        put(p32, P32_OFF, f"out_w{l}", params["out_w"][l])
        put(p32, P32_OFF, f"out_b{l}", params["out_b"][l])
        put(p32, P32_OFF, f"n1_w{l}", params["n1_w"][l])
        put(p32, P32_OFF, f"n1_b{l}", params["n1_b"][l])
        put(p32, P32_OFF, f"ff2_w{l}", params["ff2_w"][l])
        put(p32, P32_OFF, f"ff2_b{l}", params["ff2_b"][l])
        put(p32, P32_OFF, f"n2_w{l}", params["n2_w"][l])
        put(p32, P32_OFF, f"n2_b{l}", params["n2_b"][l])
        put(p64, P64_OFF, f"ff1_w{l}", params["ff1_w"][l])
        put(p64, P64_OFF, f"ff1_b{l}", params["ff1_b"][l])
    put(p32, P32_OFF, "enc_nw", params["enc_nw"])
    put(p32, P32_OFF, "enc_nb", params["enc_nb"])
    put(p32, P32_OFF, "gen_nw", params["gen_nw"])
    put(p32, P32_OFF, "gen_nb", params["gen_nb"])
    put(p32, P32_OFF, "gen_w", params["gen_w"])   # zero-padded to DIM columns
    put(p32, P32_OFF, "gen_b", params["gen_b"])

    # lane-dense fused q|k|v weights per layer: (DEPTH, DIM+8, 3*DIM),
    # bias in row DIM, softmax 1/sqrt(head_dim) folded into the q columns.
    scale = 1.0 / math.sqrt(HEAD_DIM)
    qkv = np.zeros((DEPTH, QKV_ROWS, 3 * DIM), np.float32)
    in_w = np.asarray(params["in_w"], np.float32)                 # (DEPTH, DIM, 3*DIM)
    in_b = np.asarray(params["in_b"], np.float32).reshape(DEPTH, 3 * DIM)
    for l in range(DEPTH):
        w = in_w[l].copy()
        b = in_b[l].copy()
        w[:, :DIM] *= scale
        b[:DIM] *= scale
        qkv[l, :DIM, :] = w
        qkv[l, DIM, :] = b
    return jnp.asarray(p32), jnp.asarray(p64), jnp.asarray(qkv)


# ---- glue --------------------------------------------------------------------
@jax.jit
def base_transformer_forward(x_past, x_control, p32, p64, qkv):
    x_past2d = x_past.reshape(B * L_PAST, NUM_ALL_FEATURES)
    x_ctrl2d = x_control.reshape(B * L_CTRL, NUM_CONTROL)
    vmem = pl.BlockSpec(memory_space=pltpu.MemorySpace.VMEM)
    y2d = pl.pallas_call(
        base_transformer_kernel,
        out_shape=jax.ShapeDtypeStruct((B * OUT_LEN, NUM_PRED), jnp.float32),
        in_specs=[vmem] * 5,
        out_specs=vmem,
    )(x_past2d, x_ctrl2d, p32, p64, qkv)
    return y2d.reshape(B, OUT_LEN, NUM_PRED)


if __name__ == "__main__":
    key = jax.random.PRNGKey(0)
    k1, k2, kp = jax.random.split(key, 3)
    x_past = jax.random.normal(k1, (B, L_PAST, NUM_ALL_FEATURES), jnp.float32)
    x_control = jax.random.normal(k2, (B, L_CTRL, NUM_CONTROL), jnp.float32)
    params = init_params(kp)
    p32, p64, qkv = pack_params(params)

    y = base_transformer_forward(x_past, x_control, p32, p64, qkv)
    y = jax.block_until_ready(y)

    assert y.shape == (B, OUT_LEN, NUM_PRED), y.shape
    assert bool(jnp.all(jnp.isfinite(y)))
    print("KERNEL_OK")
</pallas_src>

<mosaic_0001>
module attributes {stable_mosaic.version = 11 : i64} {
  func.func @base_transformer_kernel(%arg0: memref<16x6xf32, #tpu.memory_space<vmem>>, %arg1: memref<16x3xf32, #tpu.memory_space<vmem>>, %arg2: memref<408x32xf32, #tpu.memory_space<vmem>>, %arg3: memref<80x64xf32, #tpu.memory_space<vmem>>, %arg4: memref<2x40x96xf32, #tpu.memory_space<vmem>>, %arg5: memref<8x2xf32, #tpu.memory_space<vmem>>) attributes {dimension_semantics = [], scalar_prefetch = 0 : i64, scratch_operands = 0 : i64, tpu.core_type = #tpu.core_type<tc>} {
    %c0 = arith.constant 0 : index
    %c0_0 = arith.constant 0 : index
    %0 = vector.load %arg2[%c0, %c0_0] : memref<408x32xf32, #tpu.memory_space<vmem>>, vector<16x32xf32>
    %c0_1 = arith.constant 0 : index
    %c0_2 = arith.constant 0 : index
    %1 = vector.load %arg0[%c0_1, %c0_2] : memref<16x6xf32, #tpu.memory_space<vmem>>, vector<16x6xf32>
    %c16 = arith.constant 16 : index
    %c0_3 = arith.constant 0 : index
    %2 = vector.load %arg2[%c16, %c0_3] : memref<408x32xf32, #tpu.memory_space<vmem>>, vector<6x32xf32>
    %cst = arith.constant dense<0.000000e+00> : vector<16x32xf32>
    %3 = tpu.matmul %1, %2, %cst {dimension_numbers = #tpu.dot_dimension_numbers<[1], [0], [0], [1], [0, 0, 1, 1], [], []>} : vector<16x6xf32>, vector<6x32xf32>, vector<16x32xf32> -> vector<16x32xf32>
    %c24 = arith.constant 24 : index
    %c0_4 = arith.constant 0 : index
    %4 = vector.load %arg2[%c24, %c0_4] : memref<408x32xf32, #tpu.memory_space<vmem>>, vector<1x32xf32>
    %5 = vector.shape_cast %4 : vector<1x32xf32> to vector<32xf32>
    %6 = vector.shape_cast %5 : vector<32xf32> to vector<1x32xf32>
    %7 = vector.broadcast %6 : vector<1x32xf32> to vector<16x32xf32>
    %8 = arith.addf %3, %7 : vector<16x32xf32>
    %c0_5 = arith.constant 0 : index
    %c0_6 = arith.constant 0 : index
    %9 = vector.load %arg1[%c0_5, %c0_6] : memref<16x3xf32, #tpu.memory_space<vmem>>, vector<16x3xf32>
    %c32 = arith.constant 32 : index
    %c0_7 = arith.constant 0 : index
    %10 = vector.load %arg2[%c32, %c0_7] : memref<408x32xf32, #tpu.memory_space<vmem>>, vector<3x32xf32>
    %cst_8 = arith.constant dense<0.000000e+00> : vector<16x32xf32>
    %11 = tpu.matmul %9, %10, %cst_8 {dimension_numbers = #tpu.dot_dimension_numbers<[1], [0], [0], [1], [0, 0, 1, 1], [], []>} : vector<16x3xf32>, vector<3x32xf32>, vector<16x32xf32> -> vector<16x32xf32>
    %c40 = arith.constant 40 : index
    %c0_9 = arith.constant 0 : index
    %12 = vector.load %arg2[%c40, %c0_9] : memref<408x32xf32, #tpu.memory_space<vmem>>, vector<1x32xf32>
    %13 = vector.shape_cast %12 : vector<1x32xf32> to vector<32xf32>
    %14 = vector.shape_cast %13 : vector<32xf32> to vector<1x32xf32>
    %15 = vector.broadcast %14 : vector<1x32xf32> to vector<16x32xf32>
    %16 = arith.addf %11, %15 : vector<16x32xf32>
    %17 = vector.shape_cast %8 : vector<16x32xf32> to vector<2x8x32xf32>
    %18 = vector.extract_strided_slice %0 {offsets = [0, 0], sizes = [8, 32], strides = [1, 1]} : vector<16x32xf32> to vector<8x32xf32>
    %19 = vector.shape_cast %18 : vector<8x32xf32> to vector<1x8x32xf32>
    %20 = vector.broadcast %19 : vector<1x8x32xf32> to vector<2x8x32xf32>
    %21 = arith.addf %17, %20 : vector<2x8x32xf32>
    %22 = vector.shape_cast %16 : vector<16x32xf32> to vector<2x8x32xf32>
    %23 = vector.extract_strided_slice %0 {offsets = [8, 0], sizes = [8, 32], strides = [1, 1]} : vector<16x32xf32> to vector<8x32xf32>
    %24 = vector.shape_cast %23 : vector<8x32xf32> to vector<1x8x32xf32>
    %25 = vector.broadcast %24 : vector<1x8x32xf32> to vector<2x8x32xf32>
    %26 = arith.addf %22, %25 : vector<2x8x32xf32>
    %27 = tpu.concatenate %21, %26 in 1 : vector<2x8x32xf32>, vector<2x8x32xf32> -> vector<2x16x32xf32>
    %28 = vector.shape_cast %27 : vector<2x16x32xf32> to vector<32x32xf32>
    %c0_10 = arith.constant 0 : index
    %c0_11 = arith.constant 0 : index
    %c0_12 = arith.constant 0 : index
    %29 = vector.load %arg4[%c0_10, %c0_11, %c0_12] : memref<2x40x96xf32, #tpu.memory_space<vmem>>, vector<1x40x96xf32>
    %30 = vector.shape_cast %29 : vector<1x40x96xf32> to vector<40x96xf32>
    %31 = vector.extract_strided_slice %30 {offsets = [0, 0], sizes = [32, 96], strides = [1, 1]} : vector<40x96xf32> to vector<32x96xf32>
    %cst_13 = arith.constant dense<0.000000e+00> : vector<32x96xf32>
    %32 = tpu.matmul %28, %31, %cst_13 {dimension_numbers = #tpu.dot_dimension_numbers<[1], [0], [0], [1], [0, 0, 1, 1], [], []>} : vector<32x32xf32>, vector<32x96xf32>, vector<32x96xf32> -> vector<32x96xf32>
    %33 = vector.extract_strided_slice %30 {offsets = [32, 0], sizes = [1, 96], strides = [1, 1]} : vector<40x96xf32> to vector<1x96xf32>
    %34 = vector.shape_cast %33 : vector<1x96xf32> to vector<96xf32>
    %35 = vector.shape_cast %34 : vector<96xf32> to vector<1x96xf32>
    %36 = vector.broadcast %35 : vector<1x96xf32> to vector<32x96xf32>
    %37 = arith.addf %32, %36 : vector<32x96xf32>
    %38 = vector.extract_strided_slice %37 {offsets = [0, 0], sizes = [32, 8], strides = [1, 1]} : vector<32x96xf32> to vector<32x8xf32>
    %39 = vector.shape_cast %38 : vector<32x8xf32> to vector<2x1x16x8xf32>
    %40 = vector.extract_strided_slice %37 {offsets = [0, 8], sizes = [32, 8], strides = [1, 1]} : vector<32x96xf32> to vector<32x8xf32>
    %41 = vector.shape_cast %40 : vector<32x8xf32> to vector<2x1x16x8xf32>
    %42 = vector.extract_strided_slice %37 {offsets = [0, 16], sizes = [32, 8], strides = [1, 1]} : vector<32x96xf32> to vector<32x8xf32>
    %43 = vector.shape_cast %42 : vector<32x8xf32> to vector<2x1x16x8xf32>
    %44 = vector.extract_strided_slice %37 {offsets = [0, 24], sizes = [32, 8], strides = [1, 1]} : vector<32x96xf32> to vector<32x8xf32>
    %45 = vector.shape_cast %44 : vector<32x8xf32> to vector<2x1x16x8xf32>
    %46 = tpu.concatenate %39, %41, %43, %45 in 1 : vector<2x1x16x8xf32>, vector<2x1x16x8xf32>, vector<2x1x16x8xf32>, vector<2x1x16x8xf32> -> vector<2x4x16x8xf32>
    %47 = vector.shape_cast %46 : vector<2x4x16x8xf32> to vector<8x16x8xf32>
    %48 = vector.extract_strided_slice %37 {offsets = [0, 32], sizes = [32, 8], strides = [1, 1]} : vector<32x96xf32> to vector<32x8xf32>
    %49 = vector.shape_cast %48 : vector<32x8xf32> to vector<2x1x16x8xf32>
    %50 = vector.extract_strided_slice %37 {offsets = [0, 40], sizes = [32, 8], strides = [1, 1]} : vector<32x96xf32> to vector<32x8xf32>
    %51 = vector.shape_cast %50 : vector<32x8xf32> to vector<2x1x16x8xf32>
    %52 = vector.extract_strided_slice %37 {offsets = [0, 48], sizes = [32, 8], strides = [1, 1]} : vector<32x96xf32> to vector<32x8xf32>
    %53 = vector.shape_cast %52 : vector<32x8xf32> to vector<2x1x16x8xf32>
    %54 = vector.extract_strided_slice %37 {offsets = [0, 56], sizes = [32, 8], strides = [1, 1]} : vector<32x96xf32> to vector<32x8xf32>
    %55 = vector.shape_cast %54 : vector<32x8xf32> to vector<2x1x16x8xf32>
    %56 = tpu.concatenate %49, %51, %53, %55 in 1 : vector<2x1x16x8xf32>, vector<2x1x16x8xf32>, vector<2x1x16x8xf32>, vector<2x1x16x8xf32> -> vector<2x4x16x8xf32>
    %57 = vector.shape_cast %56 : vector<2x4x16x8xf32> to vector<8x16x8xf32>
    %58 = vector.extract_strided_slice %37 {offsets = [0, 64], sizes = [32, 8], strides = [1, 1]} : vector<32x96xf32> to vector<32x8xf32>
    %59 = vector.shape_cast %58 : vector<32x8xf32> to vector<2x1x16x8xf32>
    %60 = vector.extract_strided_slice %37 {offsets = [0, 72], sizes = [32, 8], strides = [1, 1]} : vector<32x96xf32> to vector<32x8xf32>
    %61 = vector.shape_cast %60 : vector<32x8xf32> to vector<2x1x16x8xf32>
    %62 = vector.extract_strided_slice %37 {offsets = [0, 80], sizes = [32, 8], strides = [1, 1]} : vector<32x96xf32> to vector<32x8xf32>
    %63 = vector.shape_cast %62 : vector<32x8xf32> to vector<2x1x16x8xf32>
    %64 = vector.extract_strided_slice %37 {offsets = [0, 88], sizes = [32, 8], strides = [1, 1]} : vector<32x96xf32> to vector<32x8xf32>
    %65 = vector.shape_cast %64 : vector<32x8xf32> to vector<2x1x16x8xf32>
    %66 = tpu.concatenate %59, %61, %63, %65 in 1 : vector<2x1x16x8xf32>, vector<2x1x16x8xf32>, vector<2x1x16x8xf32>, vector<2x1x16x8xf32> -> vector<2x4x16x8xf32>
    %67 = vector.shape_cast %66 : vector<2x4x16x8xf32> to vector<8x16x8xf32>
    "tpu.trace_start"() <{level = 10 : i32, message = "bqd,bkd->bqk"}> : () -> ()
    %cst_14 = arith.constant dense<0.000000e+00> : vector<8x16x16xf32>
    %68 = tpu.matmul %47, %57, %cst_14 {dimension_numbers = #tpu.dot_dimension_numbers<[2], [2], [1], [1], [0, 0, 0, 1, 1, 1], [0], [0]>} : vector<8x16x8xf32>, vector<8x16x8xf32>, vector<8x16x16xf32> -> vector<8x16x16xf32>
    "tpu.trace_stop"() : () -> ()
    %cst_15 = arith.constant dense<0xFF800000> : vector<8x16xf32>
    %69 = vector.multi_reduction <maximumf>, %68, %cst_15 [2] : vector<8x16x16xf32> to vector<8x16xf32>
    %70 = vector.shape_cast %69 : vector<8x16xf32> to vector<8x16x1xf32>
    %71 = vector.broadcast %70 : vector<8x16x1xf32> to vector<8x16x16xf32>
    %72 = arith.subf %68, %71 : vector<8x16x16xf32>
    %73 = math.exp %72 : vector<8x16x16xf32>
    %cst_16 = arith.constant dense<0.000000e+00> : vector<8x16xf32>
    %74 = vector.multi_reduction <add>, %73, %cst_16 [2] : vector<8x16x16xf32> to vector<8x16xf32>
    %75 = vector.shape_cast %74 : vector<8x16xf32> to vector<8x16x1xf32>
    %76 = vector.broadcast %75 : vector<8x16x1xf32> to vector<8x16x16xf32>
    %77 = arith.divf %73, %76 : vector<8x16x16xf32>
    "tpu.trace_start"() <{level = 10 : i32, message = "bqk,bkd->bqd"}> : () -> ()
    %cst_17 = arith.constant dense<0.000000e+00> : vector<8x16x8xf32>
    %78 = tpu.matmul %77, %67, %cst_17 {dimension_numbers = #tpu.dot_dimension_numbers<[2], [1], [1], [2], [0, 0, 0, 1, 1, 2], [0], [0]>} : vector<8x16x16xf32>, vector<8x16x8xf32>, vector<8x16x8xf32> -> vector<8x16x8xf32>
    "tpu.trace_stop"() : () -> ()
    %79 = vector.shape_cast %78 : vector<8x16x8xf32> to vector<2x4x16x8xf32>
    %80 = vector.extract_strided_slice %79 {offsets = [0, 0, 0, 0], sizes = [2, 1, 16, 8], strides = [1, 1, 1, 1]} : vector<2x4x16x8xf32> to vector<2x1x16x8xf32>
    %81 = vector.shape_cast %80 : vector<2x1x16x8xf32> to vector<2x16x8xf32>
    %82 = vector.extract_strided_slice %79 {offsets = [0, 1, 0, 0], sizes = [2, 1, 16, 8], strides = [1, 1, 1, 1]} : vector<2x4x16x8xf32> to vector<2x1x16x8xf32>
    %83 = vector.shape_cast %82 : vector<2x1x16x8xf32> to vector<2x16x8xf32>
    %84 = vector.extract_strided_slice %79 {offsets = [0, 2, 0, 0], sizes = [2, 1, 16, 8], strides = [1, 1, 1, 1]} : vector<2x4x16x8xf32> to vector<2x1x16x8xf32>
    %85 = vector.shape_cast %84 : vector<2x1x16x8xf32> to vector<2x16x8xf32>
    %86 = vector.extract_strided_slice %79 {offsets = [0, 3, 0, 0], sizes = [2, 1, 16, 8], strides = [1, 1, 1, 1]} : vector<2x4x16x8xf32> to vector<2x1x16x8xf32>
    %87 = vector.shape_cast %86 : vector<2x1x16x8xf32> to vector<2x16x8xf32>
    %88 = tpu.concatenate %81, %83, %85, %87 in 2 : vector<2x16x8xf32>, vector<2x16x8xf32>, vector<2x16x8xf32>, vector<2x16x8xf32> -> vector<2x16x32xf32>
    %89 = vector.shape_cast %88 : vector<2x16x32xf32> to vector<32x32xf32>
    %c48 = arith.constant 48 : index
    %c0_18 = arith.constant 0 : index
    %90 = vector.load %arg2[%c48, %c0_18] : memref<408x32xf32, #tpu.memory_space<vmem>>, vector<32x32xf32>
    %cst_19 = arith.constant dense<0.000000e+00> : vector<32x32xf32>
    %91 = tpu.matmul %89, %90, %cst_19 {dimension_numbers = #tpu.dot_dimension_numbers<[1], [0], [0], [1], [0, 0, 1, 1], [], []>} : vector<32x32xf32>, vector<32x32xf32>, vector<32x32xf32> -> vector<32x32xf32>
    %c80 = arith.constant 80 : index
    %c0_20 = arith.constant 0 : index
    %92 = vector.load %arg2[%c80, %c0_20] : memref<408x32xf32, #tpu.memory_space<vmem>>, vector<1x32xf32>
    %93 = vector.shape_cast %92 : vector<1x32xf32> to vector<32xf32>
    %94 = vector.shape_cast %93 : vector<32xf32> to vector<1x32xf32>
    %95 = vector.broadcast %94 : vector<1x32xf32> to vector<32x32xf32>
    %96 = arith.addf %91, %95 : vector<32x32xf32>
    %97 = arith.addf %28, %96 : vector<32x32xf32>
    %c88 = arith.constant 88 : index
    %c0_21 = arith.constant 0 : index
    %98 = vector.load %arg2[%c88, %c0_21] : memref<408x32xf32, #tpu.memory_space<vmem>>, vector<1x32xf32>
    %99 = vector.shape_cast %98 : vector<1x32xf32> to vector<32xf32>
    %c96 = arith.constant 96 : index
    %c0_22 = arith.constant 0 : index
    %100 = vector.load %arg2[%c96, %c0_22] : memref<408x32xf32, #tpu.memory_space<vmem>>, vector<1x32xf32>
    %101 = vector.shape_cast %100 : vector<1x32xf32> to vector<32xf32>
    %cst_23 = arith.constant dense<0.000000e+00> : vector<32xf32>
    %102 = vector.multi_reduction <add>, %97, %cst_23 [1] : vector<32x32xf32> to vector<32xf32>
    %103 = vector.shape_cast %102 : vector<32xf32> to vector<32x1xf32>
    %cst_24 = arith.constant 3.200000e+01 : f32
    %104 = vector.broadcast %cst_24 : f32 to vector<32x1xf32>
    %105 = arith.divf %103, %104 : vector<32x1xf32>
    %106 = vector.broadcast %105 : vector<32x1xf32> to vector<32x32xf32>
    %107 = arith.subf %97, %106 : vector<32x32xf32>
    %108 = arith.mulf %107, %107 : vector<32x32xf32>
    %cst_25 = arith.constant dense<0.000000e+00> : vector<32xf32>
    %109 = vector.multi_reduction <add>, %108, %cst_25 [1] : vector<32x32xf32> to vector<32xf32>
    %110 = vector.shape_cast %109 : vector<32xf32> to vector<32x1xf32>
    %cst_26 = arith.constant 3.200000e+01 : f32
    %111 = vector.broadcast %cst_26 : f32 to vector<32x1xf32>
    %112 = arith.divf %110, %111 : vector<32x1xf32>
    %113 = vector.broadcast %105 : vector<32x1xf32> to vector<32x32xf32>
    %114 = arith.subf %97, %113 : vector<32x32xf32>
    %cst_27 = arith.constant 9.99999974E-6 : f32
    %115 = vector.broadcast %cst_27 : f32 to vector<32x1xf32>
    %116 = arith.addf %112, %115 : vector<32x1xf32>
    %117 = math.rsqrt %116 : vector<32x1xf32>
    %118 = vector.broadcast %117 : vector<32x1xf32> to vector<32x32xf32>
    %119 = arith.mulf %114, %118 : vector<32x32xf32>
    %120 = vector.shape_cast %99 : vector<32xf32> to vector<1x32xf32>
    %121 = vector.broadcast %120 : vector<1x32xf32> to vector<32x32xf32>
    %122 = arith.mulf %119, %121 : vector<32x32xf32>
    %123 = vector.shape_cast %101 : vector<32xf32> to vector<1x32xf32>
    %124 = vector.broadcast %123 : vector<1x32xf32> to vector<32x32xf32>
    %125 = arith.addf %122, %124 : vector<32x32xf32>
    %c0_28 = arith.constant 0 : index
    %c0_29 = arith.constant 0 : index
    %126 = vector.load %arg3[%c0_28, %c0_29] : memref<80x64xf32, #tpu.memory_space<vmem>>, vector<32x64xf32>
    %cst_30 = arith.constant dense<0.000000e+00> : vector<32x64xf32>
    %127 = tpu.matmul %125, %126, %cst_30 {dimension_numbers = #tpu.dot_dimension_numbers<[1], [0], [0], [1], [0, 0, 1, 1], [], []>} : vector<32x32xf32>, vector<32x64xf32>, vector<32x64xf32> -> vector<32x64xf32>
    %c32_31 = arith.constant 32 : index
    %c0_32 = arith.constant 0 : index
    %128 = vector.load %arg3[%c32_31, %c0_32] : memref<80x64xf32, #tpu.memory_space<vmem>>, vector<1x64xf32>
    %129 = vector.shape_cast %128 : vector<1x64xf32> to vector<64xf32>
    %130 = vector.shape_cast %129 : vector<64xf32> to vector<1x64xf32>
    %131 = vector.broadcast %130 : vector<1x64xf32> to vector<32x64xf32>
    %132 = arith.addf %127, %131 : vector<32x64xf32>
    %cst_33 = arith.constant 0.000000e+00 : f32
    %133 = vector.broadcast %cst_33 : f32 to vector<32x64xf32>
    %134 = arith.maximumf %132, %133 : vector<32x64xf32>
    %c104 = arith.constant 104 : index
    %c0_34 = arith.constant 0 : index
    %135 = vector.load %arg2[%c104, %c0_34] : memref<408x32xf32, #tpu.memory_space<vmem>>, vector<64x32xf32>
    %cst_35 = arith.constant dense<0.000000e+00> : vector<32x32xf32>
    %136 = tpu.matmul %134, %135, %cst_35 {dimension_numbers = #tpu.dot_dimension_numbers<[1], [0], [0], [1], [0, 0, 1, 1], [], []>} : vector<32x64xf32>, vector<64x32xf32>, vector<32x32xf32> -> vector<32x32xf32>
    %c168 = arith.constant 168 : index
    %c0_36 = arith.constant 0 : index
    %137 = vector.load %arg2[%c168, %c0_36] : memref<408x32xf32, #tpu.memory_space<vmem>>, vector<1x32xf32>
    %138 = vector.shape_cast %137 : vector<1x32xf32> to vector<32xf32>
    %139 = vector.shape_cast %138 : vector<32xf32> to vector<1x32xf32>
    %140 = vector.broadcast %139 : vector<1x32xf32> to vector<32x32xf32>
    %141 = arith.addf %136, %140 : vector<32x32xf32>
    %142 = arith.addf %125, %141 : vector<32x32xf32>
    %c176 = arith.constant 176 : index
    %c0_37 = arith.constant 0 : index
    %143 = vector.load %arg2[%c176, %c0_37] : memref<408x32xf32, #tpu.memory_space<vmem>>, vector<1x32xf32>
    %144 = vector.shape_cast %143 : vector<1x32xf32> to vector<32xf32>
    %c184 = arith.constant 184 : index
    %c0_38 = arith.constant 0 : index
    %145 = vector.load %arg2[%c184, %c0_38] : memref<408x32xf32, #tpu.memory_space<vmem>>, vector<1x32xf32>
    %146 = vector.shape_cast %145 : vector<1x32xf32> to vector<32xf32>
    %cst_39 = arith.constant dense<0.000000e+00> : vector<32xf32>
    %147 = vector.multi_reduction <add>, %142, %cst_39 [1] : vector<32x32xf32> to vector<32xf32>
    %148 = vector.shape_cast %147 : vector<32xf32> to vector<32x1xf32>
    %cst_40 = arith.constant 3.200000e+01 : f32
    %149 = vector.broadcast %cst_40 : f32 to vector<32x1xf32>
    %150 = arith.divf %148, %149 : vector<32x1xf32>
    %151 = vector.broadcast %150 : vector<32x1xf32> to vector<32x32xf32>
    %152 = arith.subf %142, %151 : vector<32x32xf32>
    %153 = arith.mulf %152, %152 : vector<32x32xf32>
    %cst_41 = arith.constant dense<0.000000e+00> : vector<32xf32>
    %154 = vector.multi_reduction <add>, %153, %cst_41 [1] : vector<32x32xf32> to vector<32xf32>
    %155 = vector.shape_cast %154 : vector<32xf32> to vector<32x1xf32>
    %cst_42 = arith.constant 3.200000e+01 : f32
    %156 = vector.broadcast %cst_42 : f32 to vector<32x1xf32>
    %157 = arith.divf %155, %156 : vector<32x1xf32>
    %158 = vector.broadcast %150 : vector<32x1xf32> to vector<32x32xf32>
    %159 = arith.subf %142, %158 : vector<32x32xf32>
    %cst_43 = arith.constant 9.99999974E-6 : f32
    %160 = vector.broadcast %cst_43 : f32 to vector<32x1xf32>
    %161 = arith.addf %157, %160 : vector<32x1xf32>
    %162 = math.rsqrt %161 : vector<32x1xf32>
    %163 = vector.broadcast %162 : vector<32x1xf32> to vector<32x32xf32>
    %164 = arith.mulf %159, %163 : vector<32x32xf32>
    %165 = vector.shape_cast %144 : vector<32xf32> to vector<1x32xf32>
    %166 = vector.broadcast %165 : vector<1x32xf32> to vector<32x32xf32>
    %167 = arith.mulf %164, %166 : vector<32x32xf32>
    %168 = vector.shape_cast %146 : vector<32xf32> to vector<1x32xf32>
    %169 = vector.broadcast %168 : vector<1x32xf32> to vector<32x32xf32>
    %170 = arith.addf %167, %169 : vector<32x32xf32>
    %c1 = arith.constant 1 : index
    %c0_44 = arith.constant 0 : index
    %c0_45 = arith.constant 0 : index
    %171 = vector.load %arg4[%c1, %c0_44, %c0_45] : memref<2x40x96xf32, #tpu.memory_space<vmem>>, vector<1x40x96xf32>
    %172 = vector.shape_cast %171 : vector<1x40x96xf32> to vector<40x96xf32>
    %173 = vector.extract_strided_slice %172 {offsets = [0, 0], sizes = [32, 96], strides = [1, 1]} : vector<40x96xf32> to vector<32x96xf32>
    %cst_46 = arith.constant dense<0.000000e+00> : vector<32x96xf32>
    %174 = tpu.matmul %170, %173, %cst_46 {dimension_numbers = #tpu.dot_dimension_numbers<[1], [0], [0], [1], [0, 0, 1, 1], [], []>} : vector<32x32xf32>, vector<32x96xf32>, vector<32x96xf32> -> vector<32x96xf32>
    %175 = vector.extract_strided_slice %172 {offsets = [32, 0], sizes = [1, 96], strides = [1, 1]} : vector<40x96xf32> to vector<1x96xf32>
    %176 = vector.shape_cast %175 : vector<1x96xf32> to vector<96xf32>
    %177 = vector.shape_cast %176 : vector<96xf32> to vector<1x96xf32>
    %178 = vector.broadcast %177 : vector<1x96xf32> to vector<32x96xf32>
    %179 = arith.addf %174, %178 : vector<32x96xf32>
    %180 = vector.extract_strided_slice %179 {offsets = [0, 0], sizes = [32, 8], strides = [1, 1]} : vector<32x96xf32> to vector<32x8xf32>
    %181 = vector.shape_cast %180 : vector<32x8xf32> to vector<2x1x16x8xf32>
    %182 = vector.extract_strided_slice %179 {offsets = [0, 8], sizes = [32, 8], strides = [1, 1]} : vector<32x96xf32> to vector<32x8xf32>
    %183 = vector.shape_cast %182 : vector<32x8xf32> to vector<2x1x16x8xf32>
    %184 = vector.extract_strided_slice %179 {offsets = [0, 16], sizes = [32, 8], strides = [1, 1]} : vector<32x96xf32> to vector<32x8xf32>
    %185 = vector.shape_cast %184 : vector<32x8xf32> to vector<2x1x16x8xf32>
    %186 = vector.extract_strided_slice %179 {offsets = [0, 24], sizes = [32, 8], strides = [1, 1]} : vector<32x96xf32> to vector<32x8xf32>
    %187 = vector.shape_cast %186 : vector<32x8xf32> to vector<2x1x16x8xf32>
    %188 = tpu.concatenate %181, %183, %185, %187 in 1 : vector<2x1x16x8xf32>, vector<2x1x16x8xf32>, vector<2x1x16x8xf32>, vector<2x1x16x8xf32> -> vector<2x4x16x8xf32>
    %189 = vector.shape_cast %188 : vector<2x4x16x8xf32> to vector<8x16x8xf32>
    %190 = vector.extract_strided_slice %179 {offsets = [0, 32], sizes = [32, 8], strides = [1, 1]} : vector<32x96xf32> to vector<32x8xf32>
    %191 = vector.shape_cast %190 : vector<32x8xf32> to vector<2x1x16x8xf32>
    %192 = vector.extract_strided_slice %179 {offsets = [0, 40], sizes = [32, 8], strides = [1, 1]} : vector<32x96xf32> to vector<32x8xf32>
    %193 = vector.shape_cast %192 : vector<32x8xf32> to vector<2x1x16x8xf32>
    %194 = vector.extract_strided_slice %179 {offsets = [0, 48], sizes = [32, 8], strides = [1, 1]} : vector<32x96xf32> to vector<32x8xf32>
    %195 = vector.shape_cast %194 : vector<32x8xf32> to vector<2x1x16x8xf32>
    %196 = vector.extract_strided_slice %179 {offsets = [0, 56], sizes = [32, 8], strides = [1, 1]} : vector<32x96xf32> to vector<32x8xf32>
    %197 = vector.shape_cast %196 : vector<32x8xf32> to vector<2x1x16x8xf32>
    %198 = tpu.concatenate %191, %193, %195, %197 in 1 : vector<2x1x16x8xf32>, vector<2x1x16x8xf32>, vector<2x1x16x8xf32>, vector<2x1x16x8xf32> -> vector<2x4x16x8xf32>
    %199 = vector.shape_cast %198 : vector<2x4x16x8xf32> to vector<8x16x8xf32>
    %200 = vector.extract_strided_slice %179 {offsets = [0, 64], sizes = [32, 8], strides = [1, 1]} : vector<32x96xf32> to vector<32x8xf32>
    %201 = vector.shape_cast %200 : vector<32x8xf32> to vector<2x1x16x8xf32>
    %202 = vector.extract_strided_slice %179 {offsets = [0, 72], sizes = [32, 8], strides = [1, 1]} : vector<32x96xf32> to vector<32x8xf32>
    %203 = vector.shape_cast %202 : vector<32x8xf32> to vector<2x1x16x8xf32>
    %204 = vector.extract_strided_slice %179 {offsets = [0, 80], sizes = [32, 8], strides = [1, 1]} : vector<32x96xf32> to vector<32x8xf32>
    %205 = vector.shape_cast %204 : vector<32x8xf32> to vector<2x1x16x8xf32>
    %206 = vector.extract_strided_slice %179 {offsets = [0, 88], sizes = [32, 8], strides = [1, 1]} : vector<32x96xf32> to vector<32x8xf32>
    %207 = vector.shape_cast %206 : vector<32x8xf32> to vector<2x1x16x8xf32>
    %208 = tpu.concatenate %201, %203, %205, %207 in 1 : vector<2x1x16x8xf32>, vector<2x1x16x8xf32>, vector<2x1x16x8xf32>, vector<2x1x16x8xf32> -> vector<2x4x16x8xf32>
    %209 = vector.shape_cast %208 : vector<2x4x16x8xf32> to vector<8x16x8xf32>
    "tpu.trace_start"() <{level = 10 : i32, message = "bqd,bkd->bqk"}> : () -> ()
    %cst_47 = arith.constant dense<0.000000e+00> : vector<8x16x16xf32>
    %210 = tpu.matmul %189, %199, %cst_47 {dimension_numbers = #tpu.dot_dimension_numbers<[2], [2], [1], [1], [0, 0, 0, 1, 1, 1], [0], [0]>} : vector<8x16x8xf32>, vector<8x16x8xf32>, vector<8x16x16xf32> -> vector<8x16x16xf32>
    "tpu.trace_stop"() : () -> ()
    %cst_48 = arith.constant dense<0xFF800000> : vector<8x16xf32>
    %211 = vector.multi_reduction <maximumf>, %210, %cst_48 [2] : vector<8x16x16xf32> to vector<8x16xf32>
    %212 = vector.shape_cast %211 : vector<8x16xf32> to vector<8x16x1xf32>
    %213 = vector.broadcast %212 : vector<8x16x1xf32> to vector<8x16x16xf32>
    %214 = arith.subf %210, %213 : vector<8x16x16xf32>
    %215 = math.exp %214 : vector<8x16x16xf32>
    %cst_49 = arith.constant dense<0.000000e+00> : vector<8x16xf32>
    %216 = vector.multi_reduction <add>, %215, %cst_49 [2] : vector<8x16x16xf32> to vector<8x16xf32>
    %217 = vector.shape_cast %216 : vector<8x16xf32> to vector<8x16x1xf32>
    %218 = vector.broadcast %217 : vector<8x16x1xf32> to vector<8x16x16xf32>
    %219 = arith.divf %215, %218 : vector<8x16x16xf32>
    "tpu.trace_start"() <{level = 10 : i32, message = "bqk,bkd->bqd"}> : () -> ()
    %cst_50 = arith.constant dense<0.000000e+00> : vector<8x16x8xf32>
    %220 = tpu.matmul %219, %209, %cst_50 {dimension_numbers = #tpu.dot_dimension_numbers<[2], [1], [1], [2], [0, 0, 0, 1, 1, 2], [0], [0]>} : vector<8x16x16xf32>, vector<8x16x8xf32>, vector<8x16x8xf32> -> vector<8x16x8xf32>
    "tpu.trace_stop"() : () -> ()
    %221 = vector.shape_cast %220 : vector<8x16x8xf32> to vector<2x4x16x8xf32>
    %222 = vector.extract_strided_slice %221 {offsets = [0, 0, 0, 0], sizes = [2, 1, 16, 8], strides = [1, 1, 1, 1]} : vector<2x4x16x8xf32> to vector<2x1x16x8xf32>
    %223 = vector.shape_cast %222 : vector<2x1x16x8xf32> to vector<2x16x8xf32>
    %224 = vector.extract_strided_slice %221 {offsets = [0, 1, 0, 0], sizes = [2, 1, 16, 8], strides = [1, 1, 1, 1]} : vector<2x4x16x8xf32> to vector<2x1x16x8xf32>
    %225 = vector.shape_cast %224 : vector<2x1x16x8xf32> to vector<2x16x8xf32>
    %226 = vector.extract_strided_slice %221 {offsets = [0, 2, 0, 0], sizes = [2, 1, 16, 8], strides = [1, 1, 1, 1]} : vector<2x4x16x8xf32> to vector<2x1x16x8xf32>
    %227 = vector.shape_cast %226 : vector<2x1x16x8xf32> to vector<2x16x8xf32>
    %228 = vector.extract_strided_slice %221 {offsets = [0, 3, 0, 0], sizes = [2, 1, 16, 8], strides = [1, 1, 1, 1]} : vector<2x4x16x8xf32> to vector<2x1x16x8xf32>
    %229 = vector.shape_cast %228 : vector<2x1x16x8xf32> to vector<2x16x8xf32>
    %230 = tpu.concatenate %223, %225, %227, %229 in 2 : vector<2x16x8xf32>, vector<2x16x8xf32>, vector<2x16x8xf32>, vector<2x16x8xf32> -> vector<2x16x32xf32>
    %231 = vector.shape_cast %230 : vector<2x16x32xf32> to vector<32x32xf32>
    %c192 = arith.constant 192 : index
    %c0_51 = arith.constant 0 : index
    %232 = vector.load %arg2[%c192, %c0_51] : memref<408x32xf32, #tpu.memory_space<vmem>>, vector<32x32xf32>
    %cst_52 = arith.constant dense<0.000000e+00> : vector<32x32xf32>
    %233 = tpu.matmul %231, %232, %cst_52 {dimension_numbers = #tpu.dot_dimension_numbers<[1], [0], [0], [1], [0, 0, 1, 1], [], []>} : vector<32x32xf32>, vector<32x32xf32>, vector<32x32xf32> -> vector<32x32xf32>
    %c224 = arith.constant 224 : index
    %c0_53 = arith.constant 0 : index
    %234 = vector.load %arg2[%c224, %c0_53] : memref<408x32xf32, #tpu.memory_space<vmem>>, vector<1x32xf32>
    %235 = vector.shape_cast %234 : vector<1x32xf32> to vector<32xf32>
    %236 = vector.shape_cast %235 : vector<32xf32> to vector<1x32xf32>
    %237 = vector.broadcast %236 : vector<1x32xf32> to vector<32x32xf32>
    %238 = arith.addf %233, %237 : vector<32x32xf32>
    %239 = arith.addf %170, %238 : vector<32x32xf32>
    %c232 = arith.constant 232 : index
    %c0_54 = arith.constant 0 : index
    %240 = vector.load %arg2[%c232, %c0_54] : memref<408x32xf32, #tpu.memory_space<vmem>>, vector<1x32xf32>
    %241 = vector.shape_cast %240 : vector<1x32xf32> to vector<32xf32>
    %c240 = arith.constant 240 : index
    %c0_55 = arith.constant 0 : index
    %242 = vector.load %arg2[%c240, %c0_55] : memref<408x32xf32, #tpu.memory_space<vmem>>, vector<1x32xf32>
    %243 = vector.shape_cast %242 : vector<1x32xf32> to vector<32xf32>
    %cst_56 = arith.constant dense<0.000000e+00> : vector<32xf32>
    %244 = vector.multi_reduction <add>, %239, %cst_56 [1] : vector<32x32xf32> to vector<32xf32>
    %245 = vector.shape_cast %244 : vector<32xf32> to vector<32x1xf32>
    %cst_57 = arith.constant 3.200000e+01 : f32
    %246 = vector.broadcast %cst_57 : f32 to vector<32x1xf32>
    %247 = arith.divf %245, %246 : vector<32x1xf32>
    %248 = vector.broadcast %247 : vector<32x1xf32> to vector<32x32xf32>
    %249 = arith.subf %239, %248 : vector<32x32xf32>
    %250 = arith.mulf %249, %249 : vector<32x32xf32>
    %cst_58 = arith.constant dense<0.000000e+00> : vector<32xf32>
    %251 = vector.multi_reduction <add>, %250, %cst_58 [1] : vector<32x32xf32> to vector<32xf32>
    %252 = vector.shape_cast %251 : vector<32xf32> to vector<32x1xf32>
    %cst_59 = arith.constant 3.200000e+01 : f32
    %253 = vector.broadcast %cst_59 : f32 to vector<32x1xf32>
    %254 = arith.divf %252, %253 : vector<32x1xf32>
    %255 = vector.broadcast %247 : vector<32x1xf32> to vector<32x32xf32>
    %256 = arith.subf %239, %255 : vector<32x32xf32>
    %cst_60 = arith.constant 9.99999974E-6 : f32
    %257 = vector.broadcast %cst_60 : f32 to vector<32x1xf32>
    %258 = arith.addf %254, %257 : vector<32x1xf32>
    %259 = math.rsqrt %258 : vector<32x1xf32>
    %260 = vector.broadcast %259 : vector<32x1xf32> to vector<32x32xf32>
    %261 = arith.mulf %256, %260 : vector<32x32xf32>
    %262 = vector.shape_cast %241 : vector<32xf32> to vector<1x32xf32>
    %263 = vector.broadcast %262 : vector<1x32xf32> to vector<32x32xf32>
    %264 = arith.mulf %261, %263 : vector<32x32xf32>
    %265 = vector.shape_cast %243 : vector<32xf32> to vector<1x32xf32>
    %266 = vector.broadcast %265 : vector<1x32xf32> to vector<32x32xf32>
    %267 = arith.addf %264, %266 : vector<32x32xf32>
    %c40_61 = arith.constant 40 : index
    %c0_62 = arith.constant 0 : index
    %268 = vector.load %arg3[%c40_61, %c0_62] : memref<80x64xf32, #tpu.memory_space<vmem>>, vector<32x64xf32>
    %cst_63 = arith.constant dense<0.000000e+00> : vector<32x64xf32>
    %269 = tpu.matmul %267, %268, %cst_63 {dimension_numbers = #tpu.dot_dimension_numbers<[1], [0], [0], [1], [0, 0, 1, 1], [], []>} : vector<32x32xf32>, vector<32x64xf32>, vector<32x64xf32> -> vector<32x64xf32>
    %c72 = arith.constant 72 : index
    %c0_64 = arith.constant 0 : index
    %270 = vector.load %arg3[%c72, %c0_64] : memref<80x64xf32, #tpu.memory_space<vmem>>, vector<1x64xf32>
    %271 = vector.shape_cast %270 : vector<1x64xf32> to vector<64xf32>
    %272 = vector.shape_cast %271 : vector<64xf32> to vector<1x64xf32>
    %273 = vector.broadcast %272 : vector<1x64xf32> to vector<32x64xf32>
    %274 = arith.addf %269, %273 : vector<32x64xf32>
    %cst_65 = arith.constant 0.000000e+00 : f32
    %275 = vector.broadcast %cst_65 : f32 to vector<32x64xf32>
    %276 = arith.maximumf %274, %275 : vector<32x64xf32>
    %c248 = arith.constant 248 : index
    %c0_66 = arith.constant 0 : index
    %277 = vector.load %arg2[%c248, %c0_66] : memref<408x32xf32, #tpu.memory_space<vmem>>, vector<64x32xf32>
    %cst_67 = arith.constant dense<0.000000e+00> : vector<32x32xf32>
    %278 = tpu.matmul %276, %277, %cst_67 {dimension_numbers = #tpu.dot_dimension_numbers<[1], [0], [0], [1], [0, 0, 1, 1], [], []>} : vector<32x64xf32>, vector<64x32xf32>, vector<32x32xf32> -> vector<32x32xf32>
    %c312 = arith.constant 312 : index
    %c0_68 = arith.constant 0 : index
    %279 = vector.load %arg2[%c312, %c0_68] : memref<408x32xf32, #tpu.memory_space<vmem>>, vector<1x32xf32>
    %280 = vector.shape_cast %279 : vector<1x32xf32> to vector<32xf32>
    %281 = vector.shape_cast %280 : vector<32xf32> to vector<1x32xf32>
    %282 = vector.broadcast %281 : vector<1x32xf32> to vector<32x32xf32>
    %283 = arith.addf %278, %282 : vector<32x32xf32>
    %284 = arith.addf %267, %283 : vector<32x32xf32>
    %c320 = arith.constant 320 : index
    %c0_69 = arith.constant 0 : index
    %285 = vector.load %arg2[%c320, %c0_69] : memref<408x32xf32, #tpu.memory_space<vmem>>, vector<1x32xf32>
    %286 = vector.shape_cast %285 : vector<1x32xf32> to vector<32xf32>
    %c328 = arith.constant 328 : index
    %c0_70 = arith.constant 0 : index
    %287 = vector.load %arg2[%c328, %c0_70] : memref<408x32xf32, #tpu.memory_space<vmem>>, vector<1x32xf32>
    %288 = vector.shape_cast %287 : vector<1x32xf32> to vector<32xf32>
    %cst_71 = arith.constant dense<0.000000e+00> : vector<32xf32>
    %289 = vector.multi_reduction <add>, %284, %cst_71 [1] : vector<32x32xf32> to vector<32xf32>
    %290 = vector.shape_cast %289 : vector<32xf32> to vector<32x1xf32>
    %cst_72 = arith.constant 3.200000e+01 : f32
    %291 = vector.broadcast %cst_72 : f32 to vector<32x1xf32>
    %292 = arith.divf %290, %291 : vector<32x1xf32>
    %293 = vector.broadcast %292 : vector<32x1xf32> to vector<32x32xf32>
    %294 = arith.subf %284, %293 : vector<32x32xf32>
    %295 = arith.mulf %294, %294 : vector<32x32xf32>
    %cst_73 = arith.constant dense<0.000000e+00> : vector<32xf32>
    %296 = vector.multi_reduction <add>, %295, %cst_73 [1] : vector<32x32xf32> to vector<32xf32>
    %297 = vector.shape_cast %296 : vector<32xf32> to vector<32x1xf32>
    %cst_74 = arith.constant 3.200000e+01 : f32
    %298 = vector.broadcast %cst_74 : f32 to vector<32x1xf32>
    %299 = arith.divf %297, %298 : vector<32x1xf32>
    %300 = vector.broadcast %292 : vector<32x1xf32> to vector<32x32xf32>
    %301 = arith.subf %284, %300 : vector<32x32xf32>
    %cst_75 = arith.constant 9.99999974E-6 : f32
    %302 = vector.broadcast %cst_75 : f32 to vector<32x1xf32>
    %303 = arith.addf %299, %302 : vector<32x1xf32>
    %304 = math.rsqrt %303 : vector<32x1xf32>
    %305 = vector.broadcast %304 : vector<32x1xf32> to vector<32x32xf32>
    %306 = arith.mulf %301, %305 : vector<32x32xf32>
    %307 = vector.shape_cast %286 : vector<32xf32> to vector<1x32xf32>
    %308 = vector.broadcast %307 : vector<1x32xf32> to vector<32x32xf32>
    %309 = arith.mulf %306, %308 : vector<32x32xf32>
    %310 = vector.shape_cast %288 : vector<32xf32> to vector<1x32xf32>
    %311 = vector.broadcast %310 : vector<1x32xf32> to vector<32x32xf32>
    %312 = arith.addf %309, %311 : vector<32x32xf32>
    %313 = vector.extract_strided_slice %312 {offsets = [8, 0], sizes = [4, 32], strides = [1, 1]} : vector<32x32xf32> to vector<4x32xf32>
    %314 = vector.extract_strided_slice %312 {offsets = [24, 0], sizes = [4, 32], strides = [1, 1]} : vector<32x32xf32> to vector<4x32xf32>
    %315 = tpu.concatenate %313, %314 in 0 : vector<4x32xf32>, vector<4x32xf32> -> vector<8x32xf32>
    %c336 = arith.constant 336 : index
    %c0_76 = arith.constant 0 : index
    %316 = vector.load %arg2[%c336, %c0_76] : memref<408x32xf32, #tpu.memory_space<vmem>>, vector<1x32xf32>
    %317 = vector.shape_cast %316 : vector<1x32xf32> to vector<32xf32>
    %c344 = arith.constant 344 : index
    %c0_77 = arith.constant 0 : index
    %318 = vector.load %arg2[%c344, %c0_77] : memref<408x32xf32, #tpu.memory_space<vmem>>, vector<1x32xf32>
    %319 = vector.shape_cast %318 : vector<1x32xf32> to vector<32xf32>
    %cst_78 = arith.constant dense<0.000000e+00> : vector<8xf32>
    %320 = vector.multi_reduction <add>, %315, %cst_78 [1] : vector<8x32xf32> to vector<8xf32>
    %321 = vector.shape_cast %320 : vector<8xf32> to vector<8x1xf32>
    %cst_79 = arith.constant 3.200000e+01 : f32
    %322 = vector.broadcast %cst_79 : f32 to vector<8x1xf32>
    %323 = arith.divf %321, %322 : vector<8x1xf32>
    %324 = vector.broadcast %323 : vector<8x1xf32> to vector<8x32xf32>
    %325 = arith.subf %315, %324 : vector<8x32xf32>
    %326 = arith.mulf %325, %325 : vector<8x32xf32>
    %cst_80 = arith.constant dense<0.000000e+00> : vector<8xf32>
    %327 = vector.multi_reduction <add>, %326, %cst_80 [1] : vector<8x32xf32> to vector<8xf32>
    %328 = vector.shape_cast %327 : vector<8xf32> to vector<8x1xf32>
    %cst_81 = arith.constant 3.200000e+01 : f32
    %329 = vector.broadcast %cst_81 : f32 to vector<8x1xf32>
    %330 = arith.divf %328, %329 : vector<8x1xf32>
    %331 = vector.broadcast %323 : vector<8x1xf32> to vector<8x32xf32>
    %332 = arith.subf %315, %331 : vector<8x32xf32>
    %cst_82 = arith.constant 9.99999974E-6 : f32
    %333 = vector.broadcast %cst_82 : f32 to vector<8x1xf32>
    %334 = arith.addf %330, %333 : vector<8x1xf32>
    %335 = math.rsqrt %334 : vector<8x1xf32>
    %336 = vector.broadcast %335 : vector<8x1xf32> to vector<8x32xf32>
    %337 = arith.mulf %332, %336 : vector<8x32xf32>
    %338 = vector.shape_cast %317 : vector<32xf32> to vector<1x32xf32>
    %339 = vector.broadcast %338 : vector<1x32xf32> to vector<8x32xf32>
    %340 = arith.mulf %337, %339 : vector<8x32xf32>
    %341 = vector.shape_cast %319 : vector<32xf32> to vector<1x32xf32>
    %342 = vector.broadcast %341 : vector<1x32xf32> to vector<8x32xf32>
    %343 = arith.addf %340, %342 : vector<8x32xf32>
    %c352 = arith.constant 352 : index
    %c0_83 = arith.constant 0 : index
    %344 = vector.load %arg2[%c352, %c0_83] : memref<408x32xf32, #tpu.memory_space<vmem>>, vector<1x32xf32>
    %345 = vector.shape_cast %344 : vector<1x32xf32> to vector<32xf32>
    %c360 = arith.constant 360 : index
    %c0_84 = arith.constant 0 : index
    %346 = vector.load %arg2[%c360, %c0_84] : memref<408x32xf32, #tpu.memory_space<vmem>>, vector<1x32xf32>
    %347 = vector.shape_cast %346 : vector<1x32xf32> to vector<32xf32>
    %cst_85 = arith.constant dense<0.000000e+00> : vector<8xf32>
    %348 = vector.multi_reduction <add>, %343, %cst_85 [1] : vector<8x32xf32> to vector<8xf32>
    %349 = vector.shape_cast %348 : vector<8xf32> to vector<8x1xf32>
    %cst_86 = arith.constant 3.200000e+01 : f32
    %350 = vector.broadcast %cst_86 : f32 to vector<8x1xf32>
    %351 = arith.divf %349, %350 : vector<8x1xf32>
    %352 = vector.broadcast %351 : vector<8x1xf32> to vector<8x32xf32>
    %353 = arith.subf %343, %352 : vector<8x32xf32>
    %354 = arith.mulf %353, %353 : vector<8x32xf32>
    %cst_87 = arith.constant dense<0.000000e+00> : vector<8xf32>
    %355 = vector.multi_reduction <add>, %354, %cst_87 [1] : vector<8x32xf32> to vector<8xf32>
    %356 = vector.shape_cast %355 : vector<8xf32> to vector<8x1xf32>
    %cst_88 = arith.constant 3.200000e+01 : f32
    %357 = vector.broadcast %cst_88 : f32 to vector<8x1xf32>
    %358 = arith.divf %356, %357 : vector<8x1xf32>
    %359 = vector.broadcast %351 : vector<8x1xf32> to vector<8x32xf32>
    %360 = arith.subf %343, %359 : vector<8x32xf32>
    %cst_89 = arith.constant 9.99999974E-6 : f32
    %361 = vector.broadcast %cst_89 : f32 to vector<8x1xf32>
    %362 = arith.addf %358, %361 : vector<8x1xf32>
    %363 = math.rsqrt %362 : vector<8x1xf32>
    %364 = vector.broadcast %363 : vector<8x1xf32> to vector<8x32xf32>
    %365 = arith.mulf %360, %364 : vector<8x32xf32>
    %366 = vector.shape_cast %345 : vector<32xf32> to vector<1x32xf32>
    %367 = vector.broadcast %366 : vector<1x32xf32> to vector<8x32xf32>
    %368 = arith.mulf %365, %367 : vector<8x32xf32>
    %369 = vector.shape_cast %347 : vector<32xf32> to vector<1x32xf32>
    %370 = vector.broadcast %369 : vector<1x32xf32> to vector<8x32xf32>
    %371 = arith.addf %368, %370 : vector<8x32xf32>
    %c368 = arith.constant 368 : index
    %c0_90 = arith.constant 0 : index
    %372 = vector.load %arg2[%c368, %c0_90] : memref<408x32xf32, #tpu.memory_space<vmem>>, vector<32x32xf32>
    %cst_91 = arith.constant dense<0.000000e+00> : vector<8x32xf32>
    %373 = tpu.matmul %371, %372, %cst_91 {dimension_numbers = #tpu.dot_dimension_numbers<[1], [0], [0], [1], [0, 0, 1, 1], [], []>} : vector<8x32xf32>, vector<32x32xf32>, vector<8x32xf32> -> vector<8x32xf32>
    %c400 = arith.constant 400 : index
    %c0_92 = arith.constant 0 : index
    %374 = vector.load %arg2[%c400, %c0_92] : memref<408x32xf32, #tpu.memory_space<vmem>>, vector<1x32xf32>
    %375 = vector.shape_cast %374 : vector<1x32xf32> to vector<32xf32>
    %376 = vector.shape_cast %375 : vector<32xf32> to vector<1x32xf32>
    %377 = vector.broadcast %376 : vector<1x32xf32> to vector<8x32xf32>
    %378 = arith.addf %373, %377 : vector<8x32xf32>
    %379 = vector.extract_strided_slice %378 {offsets = [0, 0], sizes = [8, 2], strides = [1, 1]} : vector<8x32xf32> to vector<8x2xf32>
    %c0_93 = arith.constant 0 : index
    %c0_94 = arith.constant 0 : index
    %380 = vector.load %arg5[%c0_93, %c0_94] : memref<8x2xf32, #tpu.memory_space<vmem>>, vector<8x2xf32>
    tpu.vector_store %arg5[%c0_93, %c0_94], %379 {strides = array<i32>} : memref<8x2xf32, #tpu.memory_space<vmem>>, vector<8x2xf32>,
    return
  }
}

</mosaic_0001>

<bundles_post_ra>
// kernel: base_transformer_forward.1
= control target key start
LH: loop header
LB: loop body
LE: loop exit
PB: predicated region body
PF: predicated region fallthrough
CT: control target
= control target key end

     0   :  { %vm37_vm0 = vcmask 1045504   ;;  %vm131_vm1 = vcmask 1042432   ;;  %vm30_vm2 = vcmask 48128   ;;  %vm124_vm3 = vcmask 23552   ;;  %s5717_s21 = smov 112   ;;  %s5718_s22 = smov 120   ;;  %s6850_s2 = inlined_call_operand.vmem [shape: f32[408,32], index: 2, kind: input, shape index: {}]   ;;  %s6851_s0 = inlined_call_operand.vmem [shape: f32[16,6], index: 0, kind: input, shape index: {}]   ;;  %s6852_s1 = inlined_call_operand.vmem [shape: f32[16,3], index: 1, kind: input, shape index: {}]   ;;  %s6853_s4 = inlined_call_operand.vmem [shape: f32[2,40,96], index: 4, kind: input, shape index: {}]   ;;  %s6854_s3 = inlined_call_operand.vmem [shape: f32[80,64], index: 3, kind: input, shape index: {}]   ;;  %s6855_s5 = inlined_call_operand.vmem [shape: f32[8,2], index: 5, kind: output, shape index: {}]  }
   0x1   :  { %v24_v0 = vld [vmem:[%s6850_s2 + $0x10] sm:$0x3f]  ;;  %v118_v1 = vld [vmem:[%s6850_s2 + $0x20] sm:$0x7]  ;;  %v23_v3 = vld [vmem:[%s6851_s0 + $0x8] sm:$0xff]  ;;  %vm223_vm4 = vcmask 261120   ;;  %v219_v26 = vlaneseq }
   0x2   :  { %v22_v2 = vld [vmem:[%s6851_s0] sm:$0xff]  ;;  %5174 = vmatprep.subr.msk.mxu0 %vm37_vm0, %v24_v0  ;;  %5179 = vmatprep.subr.msk.mxu1 %vm131_vm1, %v118_v1  ;;  %v117_v5 = vld [vmem:[%s6852_s1 + $0x8] sm:$0xff]  ;;  %v217_v6 = vld [vmem:[%s6853_s4 + $0x18] sm:$0xff]  ;;  %vm353_vm5 = vcmask 64512   ;;  %s5719_s23 = smov 104   ;;  %s5720_s24 = smov 96  }
   0x3   :  { %v116_v4 = vld [vmem:[%s6852_s1] sm:$0xff]  ;;  %5175 = vmatpush3.msk.msra.mxu0 %vm37_vm0, %v24_v0  ;;  %5176 = vmatprep.mubr.msk.f32.mxu0 %vm30_vm2, %v22_v2  ;;  %v216_v7 = vld [vmem:[%s6853_s4 + $0x10] sm:$0xff]  ;;  %v215_v8 = vld [vmem:[%s6853_s4 + $0x8] sm:$0xff]  ;;  %v5815_v27 = vshrl.u32 %v219_v26, 7  ;;  %s5721_s25 = smov 64   ;;  %vm1046_vm6 = vcmask 130048  }
   0x4   :  { %5180 = vmatpush3.msk.msra.mxu1 %vm131_vm1, %v118_v1  ;;  %5181 = vmatprep.mubr.msk.f32.mxu1 %vm124_vm3, %v116_v4  ;;  %v214_v9 = vld [vmem:[%s6853_s4] sm:$0xff]  ;;  %v4802_v11 = vld [vmem:[%s6850_s2 + $0x18] ss:$0 sm:$0xff]  ;;  %v4806_v13 = vld [vmem:[%s6850_s2 + $0x28] ss:$0 sm:$0xff]  ;;  %s5722_s8 = smov 8  }
   0x5   :  { %5177 = vmatmul.mubr.msk.f32.vlgmr.msra.gmra.mxu0 %vm30_vm2, %v23_v3  ;;  %5182 = vmatmul.mubr.msk.f32.vlgmr.msra.gmra.mxu1 %vm124_vm3, %v117_v5  ;;  %v21_v14 = vld [vmem:[%s6850_s2 + $0x8] sm:$0xff]  ;;  %v20_v20 = vld [vmem:[%s6850_s2] sm:$0xff]  ;;  %v221_v28 = vsub.s32 0, %v5815_v27  ;;  %s5723_s1 = smov 16   ;;  %s5724_s9 = smov 24   ;;  %vm1975_vm7 = vcmask 195584  }
   0x6   :  { %5184 = vmatprep.subr.mxu1 %v217_v6  ;;  %v218_v29 = vld [vmem:[%s6853_s4 + $0x20] sm:$0xff]  ;;  %vm2284_vm8 = vcmask 523264   ;;  %vm4662_vm9 = vcmask 1043456   ;;  %vm5726_vm10 = vmmov 0   ;;  %vm4796_vm11 = vcmask 15360  }
   0x7   :  { %5185 = vmatpush3.msra.mxu1 %v217_v6  ;;  %v222_v30 = vrot.slane %v218_v29, %v221_v28 }
   0x8   :  { %5186 = vmatprep.subr.mxu1 %v216_v7 }
   0x9   :  { %5187 = vmatpush3.msra.mxu1 %v216_v7 }
   0xa   :  { %5188 = vmatprep.subr.mxu1 %v215_v8 }
   0xb   :  { %5189 = vmatpush3.msra.mxu1 %v215_v8 }
   0xc   :  { %5190 = vmatprep.subr.mxu1 %v214_v9 }
   0xd   :  { %5191 = vmatpush3.msra.mxu1 %v214_v9 }
  0xc5   :  { %v5178_v10 = vpop.f32.mrf.mxu0  ;;  %v5183_v12 = vpop.f32.mrf.mxu1 }
  0xc6   :  { %v113_v17 = vadd.f32 %v5178_v10, %v4802_v11  ;;  %v207_v23 = vadd.f32 %v5183_v12, %v4806_v13 }
  0xc7   :  { %v107_v15 = vpop.f32.mrf.mxu0  ;;  %v201_v16 = vpop.f32.mrf.mxu1 }
  0xc8   :  { %v108_v18 = vadd.f32 %v4802_v11, %v107_v15  ;;  %v202_v19 = vadd.f32 %v4806_v13, %v201_v16  ;;  %v5803_v24 = vadd.f32 %v113_v17, %v20_v20  ;;  %v5811_v25 = vadd.f32 %v207_v23, %v21_v14 }
  0xca   :  { %v5799_v21 = vadd.f32 %v108_v18, %v20_v20  ;;  %v5801_v22 = vadd.f32 %v202_v19, %v21_v14 }
  0xcc   :  { %5192 = vmatprep.mubr.msk.f32.mxu1 %vm223_vm4, %v5799_v21 }
  0xcd   :  { %5193 = vmatmul.mubr.msk.f32.vlgmr.msra.gmra.mxu1 %vm223_vm4, %v5801_v22 }
  0xce   :  { %5195 = vmatprep.mubr.msk.f32.mxu1 %vm223_vm4, %v5803_v24 }
  0xd1   :  { %5196 = vmatmul.mubr.msk.f32.gmra.mxu1 %vm223_vm4, %v5811_v25 }
 0x18d   :  { %v5194_v31 = vpop.f32.mrf.mxu1 }
 0x18e   :  { %v5823_v32 = vadd.f32 %v5194_v31, %v222_v30 }
 0x18f   :  { %v302_v33 = vpop.f32.mrf.mxu1 }
 0x190   :  { %v303_v34 = vadd.f32 %v302_v33, %v222_v30  ;;  %335 = vrot.lane.b32.xlu1 %v5823_v32, %s5717_s21  ;;  %327 = vrot.lane.b32.xlu0 %v5823_v32, %s5718_s22 }
 0x191   :  { %v5197_v35 = vpop.f32.mrf.mxu1 }
 0x192   :  { %5202 = vmatprep.mubr.msk.f32.mxu1 %vm353_vm5, %v303_v34  ;;  %v5835_v37 = vadd.f32 %v5197_v35, %v222_v30 }
 0x193   :  { %v312_v36 = vpop.f32.mrf.mxu1 }
 0x194   :  { %343 = vrot.lane.b32.xlu1 %v5823_v32, %s5719_s23  ;;  %325 = vrot.lane.b32.xlu0 %v303_v34, %s5718_s22  ;;  %v5837_v38 = vadd.f32 %v312_v36, %v222_v30 }
 0x198   :  { %341 = vrot.lane.b32.xlu1 %v303_v34, %s5719_s23  ;;  %333 = vrot.lane.b32.xlu0 %v303_v34, %s5717_s21 }
 0x19c   :  { %329 = vrot.lane.b32.xlu1 %v5837_v38, %s5718_s22  ;;  %331 = vrot.lane.b32.xlu0 %v5835_v37, %s5718_s22 }
 0x1a0   :  { %347 = vrot.lane.b32.xlu1 %v5835_v37, %s5719_s23  ;;  %339 = vrot.lane.b32.xlu0 %v5835_v37, %s5717_s21 }
 0x1a4   :  { %345 = vrot.lane.b32.xlu1 %v5837_v38, %s5719_s23  ;;  %337 = vrot.lane.b32.xlu0 %v5837_v38, %s5717_s21 }
 0x1a8   :  { %351 = vrot.lane.b32.xlu0 %v5823_v32, %s5720_s24 }
 0x1ac   :  { %349 = vrot.lane.b32.xlu0 %v303_v34, %s5720_s24 }
 0x202   :  { %v5854_v39 = vpop.permute.xlu1 %335  ;;  %v328_v40 = vpop.permute.xlu0 %327 }
 0x203   :  { %439 = vrot.lane.b32.xlu1 %v328_v40, %s5720_s24  ;;  %526 = vrot.lane.b32.xlu0 %v5854_v39, %s5720_s24 }
 0x206   :  { %v5859_v41 = vpop.permute.xlu1 %343  ;;  %v326_v42 = vpop.permute.xlu0 %325 }
 0x207   :  { %5209 = vmatprep.mubr.msk.f32.mxu0 %vm353_vm5, %v326_v42  ;;  %437 = vrot.lane.b32.xlu1 %v326_v42, %s5720_s24 }
 0x20a   :  { %v334_v43 = vpop.permute.xlu0 %333  ;;  %v342_v44 = vpop.permute.xlu1 %341 }
 0x20b   :  { %613 = vrot.lane.b32.xlu1 %v5859_v41, %s5720_s24  ;;  %524 = vrot.lane.b32.xlu0 %v334_v43, %s5720_s24 }
 0x20e   :  { %v5866_v45 = vpop.permute.xlu0 %331  ;;  %v5871_v46 = vpop.permute.xlu1 %329 }
 0x20f   :  { %611 = vrot.lane.b32.xlu1 %v342_v44, %s5720_s24  ;;  %700 = vrot.lane.b32.xlu0 %v5835_v37, %s5720_s24 }
 0x212   :  { %v5873_v47 = vpop.permute.xlu0 %339  ;;  %v5885_v49 = vpop.permute.xlu1 %347 }
 0x213   :  { %698 = vrot.lane.b32.xlu0 %v5837_v38, %s5720_s24  ;;  %787 = vrot.lane.b32.xlu1 %v5866_v45, %s5720_s24 }
 0x216   :  { %v5879_v48 = vpop.permute.xlu0 %337  ;;  %v5893_v51 = vpop.permute.xlu1 %345 }
 0x217   :  { %785 = vrot.lane.b32.xlu1 %v5871_v46, %s5720_s24  ;;  %874 = vrot.lane.b32.xlu0 %v5873_v47, %s5720_s24 }
 0x21a   :  { %v352_v50 = vpop.permute.xlu0 %351 }
 0x21b   :  { %961 = vrot.lane.b32.xlu1 %v5885_v49, %s5720_s24  ;;  %872 = vrot.lane.b32.xlu0 %v5879_v48, %s5720_s24 }
 0x21c   :  { %5198 = vmatprep.subr.msk.mxu1 %vm353_vm5, %v352_v50 }
 0x21d   :  { %5199 = vmatpush3.xpose.msk.msra.mxu1 %vm353_vm5, %v352_v50 }
 0x21e   :  { %v350_v52 = vpop.permute.xlu0 %349 }
 0x21f   :  { %959 = vrot.lane.b32.xlu1 %v5893_v51, %s5720_s24  ;;  %1223 = vrot.lane.b32.xlu0 %v303_v34, %s5721_s25 }
 0x220   :  { %5200 = vmatprep.subr.msk.mxu1 %vm353_vm5, %v350_v52 }
 0x221   :  { %5201 = vmatpush3.xpose.msk.msra.mxu1 %vm353_vm5, %v350_v52 }
 0x223   :  { %1225 = vrot.lane.b32.xlu1 %v5823_v32, %s5721_s25  ;;  %1399 = vrot.lane.b32.xlu0 %v5854_v39, %s5721_s25 }
 0x224   :  { %5203 = vmatmul.mubr.msk.f32.vlgmr.msra.gmra.mxu1 %vm353_vm5, %v5823_v32 }
 0x225   :  { %5216 = vmatprep.mubr.msk.f32.mxu1 %vm353_vm5, %v334_v43 }
 0x227   :  { %1312 = vrot.lane.b32.xlu1 %v328_v40, %s5721_s25  ;;  %1397 = vrot.lane.b32.xlu0 %v334_v43, %s5721_s25 }
 0x22b   :  { %1310 = vrot.lane.b32.xlu1 %v326_v42, %s5721_s25  ;;  %1573 = vrot.lane.b32.xlu0 %v5835_v37, %s5721_s25 }
 0x22f   :  { %1486 = vrot.lane.b32.xlu1 %v5859_v41, %s5721_s25 }
 0x233   :  { %1484 = vrot.lane.b32.xlu1 %v342_v44, %s5721_s25 }
 0x237   :  { %1660 = vrot.lane.b32.xlu1 %v5866_v45, %s5721_s25 }
 0x275   :  { %v440_v53 = vpop.permute.xlu1 %439  ;;  %v527_v54 = vpop.permute.xlu0 %526 }
 0x276   :  { %5205 = vmatprep.subr.msk.mxu0 %vm353_vm5, %v440_v53  ;;  %5212 = vmatprep.subr.msk.mxu1 %vm353_vm5, %v527_v54 }
 0x277   :  { %5206 = vmatpush3.xpose.msk.msra.mxu0 %vm353_vm5, %v440_v53  ;;  %5213 = vmatpush3.xpose.msk.msra.mxu1 %vm353_vm5, %v527_v54 }
 0x279   :  { %v438_v55 = vpop.permute.xlu1 %437 }
 0x27a   :  { %5207 = vmatprep.subr.msk.mxu0 %vm353_vm5, %v438_v55 }
 0x27b   :  { %5208 = vmatpush3.xpose.msk.msra.mxu0 %vm353_vm5, %v438_v55 }
 0x27d   :  { %v614_v56 = vpop.permute.xlu1 %613  ;;  %v525_v57 = vpop.permute.xlu0 %524 }
 0x27e   :  { %5210 = vmatmul.mubr.msk.f32.vlgmr.msra.gmra.mxu0 %vm353_vm5, %v328_v40  ;;  %5214 = vmatprep.subr.msk.mxu1 %vm353_vm5, %v525_v57 }
 0x27f   :  { %5219 = vmatprep.subr.msk.mxu0 %vm353_vm5, %v614_v56  ;;  %5215 = vmatpush3.xpose.msk.msra.mxu1 %vm353_vm5, %v525_v57 }
 0x280   :  { %5220 = vmatpush3.xpose.msk.msra.mxu0 %vm353_vm5, %v614_v56  ;;  %5223 = vmatprep.mubr.msk.f32.mxu0 %vm353_vm5, %v342_v44 }
 0x281   :  { %v612_v58 = vpop.permute.xlu1 %611  ;;  %v701_v59 = vpop.permute.xlu0 %700 }
 0x282   :  { %5217 = vmatmul.mubr.msk.f32.vlgmr.msra.gmra.mxu1 %vm353_vm5, %v5854_v39  ;;  %5221 = vmatprep.subr.msk.mxu0 %vm353_vm5, %v612_v58 }
 0x283   :  { %5226 = vmatprep.subr.msk.mxu1 %vm353_vm5, %v701_v59  ;;  %5230 = vmatprep.mubr.msk.f32.mxu1 %vm353_vm5, %v5837_v38 }
 0x284   :  { %5222 = vmatpush3.xpose.msk.msra.mxu0 %vm353_vm5, %v612_v58  ;;  %5227 = vmatpush3.xpose.msk.msra.mxu1 %vm353_vm5, %v701_v59 }
 0x285   :  { %v788_v60 = vpop.permute.xlu1 %787  ;;  %v699_v61 = vpop.permute.xlu0 %698 }
 0x286   :  { %5228 = vmatprep.subr.msk.mxu1 %vm353_vm5, %v699_v61  ;;  %5233 = vmatprep.subr.msk.mxu0 %vm353_vm5, %v788_v60 }
 0x287   :  { %5224 = vmatmul.mubr.msk.f32.vlgmr.msra.gmra.mxu0 %vm353_vm5, %v5859_v41 }
 0x288   :  { %5229 = vmatpush3.xpose.msk.msra.mxu1 %vm353_vm5, %v699_v61  ;;  %5234 = vmatpush3.xpose.msk.msra.mxu0 %vm353_vm5, %v788_v60 }
 0x289   :  { %5237 = vmatprep.mubr.msk.f32.mxu0 %vm353_vm5, %v5871_v46  ;;  %v786_v62 = vpop.permute.xlu1 %785  ;;  %v875_v63 = vpop.permute.xlu0 %874 }
 0x28a   :  { %5235 = vmatprep.subr.msk.mxu0 %vm353_vm5, %v786_v62  ;;  %5240 = vmatprep.subr.msk.mxu1 %vm353_vm5, %v875_v63 }
 0x28b   :  { %5231 = vmatmul.mubr.msk.f32.vlgmr.msra.gmra.mxu1 %vm353_vm5, %v5835_v37 }
 0x28c   :  { %5236 = vmatpush3.xpose.msk.msra.mxu0 %vm353_vm5, %v786_v62  ;;  %5241 = vmatpush3.xpose.msk.msra.mxu1 %vm353_vm5, %v875_v63 }
 0x28d   :  { %5244 = vmatprep.mubr.msk.f32.mxu1 %vm353_vm5, %v5879_v48  ;;  %v962_v0 = vpop.permute.xlu1 %961  ;;  %v873_v1 = vpop.permute.xlu0 %872 }
 0x28e   :  { %5242 = vmatprep.subr.msk.mxu1 %vm353_vm5, %v873_v1  ;;  %5247 = vmatprep.subr.msk.mxu0 %vm353_vm5, %v962_v0 }
 0x28f   :  { %5238 = vmatmul.mubr.msk.f32.vlgmr.msra.gmra.mxu0 %vm353_vm5, %v5866_v45 }
 0x290   :  { %5243 = vmatpush3.xpose.msk.msra.mxu1 %vm353_vm5, %v873_v1  ;;  %5248 = vmatpush3.xpose.msk.msra.mxu0 %vm353_vm5, %v962_v0 }
 0x291   :  { %5251 = vmatprep.mubr.msk.f32.mxu0 %vm353_vm5, %v5893_v51  ;;  %v960_v2 = vpop.permute.xlu1 %959  ;;  %v1224_v3 = vpop.permute.xlu0 %1223 }
 0x292   :  { %5249 = vmatprep.subr.msk.mxu0 %vm353_vm5, %v960_v2 }
 0x293   :  { %5245 = vmatmul.mubr.msk.f32.vlgmr.msra.gmra.mxu1 %vm353_vm5, %v5873_v47 }
 0x294   :  { %5250 = vmatpush3.xpose.msk.msra.mxu0 %vm353_vm5, %v960_v2 }
 0x295   :  { %v1226_v4 = vpop.permute.xlu1 %1225  ;;  %v1400_v5 = vpop.permute.xlu0 %1399 }
 0x296   :  { %5254 = vmatprep.subr.mxu1 %v1226_v4  ;;  %5268 = vmatprep.subr.mxu0 %v1400_v5 }
 0x297   :  { %5252 = vmatmul.mubr.msk.f32.vlgmr.msra.gmra.mxu0 %vm353_vm5, %v5885_v49  ;;  %5255 = vmatpush3.msra.mxu1 %v1226_v4 }
 0x298   :  { %5269 = vmatpush3.msra.mxu0 %v1400_v5  ;;  %5256 = vmatprep.subr.mxu1 %v1224_v3 }
 0x299   :  { %v5967_v6 = vpop.permute.xlu1 %1312  ;;  %v1398_v7 = vpop.permute.xlu0 %1397  ;;  %5257 = vmatpush3.msra.mxu1 %v1224_v3 }
 0x29a   :  { %5261 = vmatprep.subr.mxu1 %v5967_v6  ;;  %5270 = vmatprep.subr.mxu0 %v1398_v7 }
 0x29b   :  { %5271 = vmatpush3.msra.mxu0 %v1398_v7 }
 0x29d   :  { %v5970_v8 = vpop.permute.xlu0 %1573  ;;  %v6027_v50 = vpop.permute.xlu1 %1310 }
 0x29e   :  { %5282 = vmatprep.subr.mxu0 %v5970_v8 }
 0x2a1   :  { %v6031_v52 = vpop.permute.xlu1 %1486 }
 0x2a5   :  { %v6033_v53 = vpop.permute.xlu1 %1484 }
 0x2a9   :  { %v6037_v54 = vpop.permute.xlu1 %1660 }
 0x2e4   :  { %v5204_v9 = vpop.f32.mrf.mxu1 }
 0x2e5   :  { %v1050_v10 = vsel %vm1046_vm6, %v5204_v9, -inf }
 0x2e6   :  { %1051 = vmax.xlane.f32.xlu1 %v1050_v10  ;;  %v428_v11 = vpop.f32.mrf.mxu1 }
 0x2e7   :  { %v1047_v12 = vsel %vm1046_vm6, %v428_v11, -inf }
 0x2e8   :  { %1048 = vmax.xlane.f32.xlu0 %v1047_v12 }
 0x33e   :  { %v5975_v13 = vpop.f32.mrf.mxu0 }
 0x33f   :  { %v1056_v14 = vsel %vm1046_vm6, %v5975_v13, -inf }
 0x340   :  { %1057 = vmax.xlane.f32.xlu0 %v1056_v14  ;;  %v5983_v17 = vpop.f32.mrf.mxu0 }
 0x341   :  { %v1053_v23 = vsel %vm1046_vm6, %v5983_v17, -inf }
 0x342   :  { %v5979_v15 = vpop.f32.mrf.mxu1 }
 0x343   :  { %v1062_v16 = vsel %vm1046_vm6, %v5979_v15, -inf }
 0x344   :  { %1063 = vmax.xlane.f32.xlu0 %v1062_v16  ;;  %v5985_v18 = vpop.f32.mrf.mxu1 }
 0x345   :  { %v1059_v19 = vsel %vm1046_vm6, %v5985_v18, -inf }
 0x346   :  { %1060 = vmax.xlane.f32.xlu1 %v1059_v19 }
 0x347   :  { %v5989_v20 = vpop.f32.mrf.mxu0 }
 0x348   :  { %1054 = vmax.xlane.f32.xlu0 %v1053_v23  ;;  %v1068_v31 = vsel %vm1046_vm6, %v5989_v20, -inf }
 0x349   :  { %v5993_v26 = vpop.f32.mrf.mxu0 }
 0x34a   :  { %v1065_v29 = vsel %vm1046_vm6, %v5993_v26, -inf }
 0x34b   :  { %1066 = vmax.xlane.f32.xlu1 %v1065_v29  ;;  %v5997_v30 = vpop.f32.mrf.mxu1 }
 0x34c   :  { %1069 = vmax.xlane.f32.xlu0 %v1068_v31  ;;  %v1074_v35 = vsel %vm1046_vm6, %v5997_v30, -inf }
 0x34d   :  { %v6001_v32 = vpop.f32.mrf.mxu1 }
 0x34e   :  { %v1071_v33 = vsel %vm1046_vm6, %v6001_v32, -inf }
 0x34f   :  { %v6005_v34 = vpop.f32.mrf.mxu0  ;;  %1072 = vmax.xlane.f32.xlu1 %v1071_v33 }
 0x350   :  { %1075 = vmax.xlane.f32.xlu0 %v1074_v35  ;;  %v1080_v40 = vsel %vm1046_vm6, %v6005_v34, -inf }
 0x351   :  { %v6009_v36 = vpop.f32.mrf.mxu0 }
 0x352   :  { %v1077_v37 = vsel %vm1046_vm6, %v6009_v36, -inf }
 0x353   :  { %1078 = vmax.xlane.f32.xlu1 %v1077_v37  ;;  %v6013_v39 = vpop.f32.mrf.mxu1 }
 0x354   :  { %1081 = vmax.xlane.f32.xlu0 %v1080_v40  ;;  %v1086_v43 = vsel %vm1046_vm6, %v6013_v39, -inf }
 0x355   :  { %v6017_v41 = vpop.f32.mrf.mxu1 }
 0x356   :  { %v1083_v42 = vsel %vm1046_vm6, %v6017_v41, -inf }
 0x357   :  { %1084 = vmax.xlane.f32.xlu1 %v1083_v42  ;;  %v6023_v44 = vpop.f32.mrf.mxu0 }
 0x358   :  { %1087 = vmax.xlane.f32.xlu0 %v1086_v43  ;;  %v1092_v45 = vsel %vm1046_vm6, %v6023_v44, -inf }
 0x359   :  { %v6041_v58 = vpop.f32.mrf.mxu0 }
 0x35c   :  { %1093 = vmax.xlane.f32.xlu0 %v1092_v45 }
 0x368   :  { %1658 = vrot.lane.b32.xlu1 %v5871_v46, %s5721_s25  ;;  %v1089_v46 = vsel %vm1046_vm6, %v6041_v58, -inf }
 0x36f   :  { %v1052_v55 = vpop.xlane.xlu1 %1051 }
 0x370   :  { %v1096_v56 = vsub.f32 %v5204_v9, %v1052_v55 }
 0x372   :  { %1571 = vrot.lane.b32.xlu0 %v5837_v38, %s5721_s25  ;;  %v1113_v57 = vmul.f32 1.442695, %v1096_v56 }
 0x374   :  { %5557 = vpow2.f32 %v1113_v57 }
 0x376   :  { %1747 = vrot.lane.b32.xlu0 %v5873_v47, %s5721_s25  ;;  %v1049_v47 = vpop.xlane.xlu0 %1048 }
 0x377   :  { %v1095_v60 = vsub.f32 %v428_v11, %v1049_v47 }
 0x379   :  { %v1111_v61 = vmul.f32 1.442695, %v1095_v60 }
 0x37b   :  { %5559 = vpow2.f32 %v1111_v61 }
 0x381   :  { %v6045_v59 = vpop.eup %5557 }
 0x382   :  { %v1146_v38 = vsel %vm1046_vm6, %v6045_v59, 0.0 }
 0x388   :  { %v6051_v62 = vpop.eup %5559 }
 0x389   :  { %v1143_v63 = vsel %vm1046_vm6, %v6051_v62, 0.0 }
 0x38c   :  { %1090 = vmax.xlane.f32.xlu1 %v1089_v46 }
 0x395   :  { %1147 = vadd.xlane.f32.xlu0 %v1146_v38 }
 0x39d   :  { %1834 = vrot.lane.b32.xlu1 %v5885_v49, %s5721_s25 }
 0x3c1   :  { %1144 = vadd.xlane.f32.xlu1 %v1143_v63 }
 0x3c9   :  { %v1058_v0 = vpop.xlane.xlu0 %1057 }
 0x3ca   :  { %v1098_v1 = vsub.f32 %v5975_v13, %v1058_v0 }
 0x3cc   :  { %v1117_v2 = vmul.f32 1.442695, %v1098_v1 }
 0x3cd   :  { %v1064_v3 = vpop.xlane.xlu0 %1063 }
 0x3ce   :  { %5561 = vpow2.f32 %v1117_v2  ;;  %v1100_v4 = vsub.f32 %v5979_v15, %v1064_v3 }
 0x3cf   :  { %v1061_v5 = vpop.xlane.xlu1 %1060 }
 0x3d0   :  { %v1121_v49 = vmul.f32 1.442695, %v1100_v4  ;;  %v1099_v7 = vsub.f32 %v5985_v18, %v1061_v5 }
 0x3d1   :  { %v1055_v9 = vpop.xlane.xlu0 %1054 }
 0x3d2   :  { %5563 = vpow2.f32 %v1121_v49  ;;  %v1097_v10 = vsub.f32 %v5983_v17, %v1055_v9  ;;  %v1119_v11 = vmul.f32 1.442695, %v1099_v7 }
 0x3d4   :  { %v1115_v12 = vmul.f32 1.442695, %v1097_v10  ;;  %v1067_v14 = vpop.xlane.xlu1 %1066 }
 0x3d5   :  { %v1101_v16 = vsub.f32 %v5993_v26, %v1067_v14  ;;  %v1070_v19 = vpop.xlane.xlu0 %1069 }
 0x3d6   :  { %5565 = vpow2.f32 %v1115_v12  ;;  %v1102_v13 = vsub.f32 %v5989_v20, %v1070_v19 }
 0x3d7   :  { %5567 = vpow2.f32 %v1119_v11  ;;  %v1123_v23 = vmul.f32 1.442695, %v1101_v16 }
 0x3d8   :  { %v1125_v15 = vmul.f32 1.442695, %v1102_v13  ;;  %v1073_v29 = vpop.xlane.xlu1 %1072 }
 0x3d9   :  { %v1103_v31 = vsub.f32 %v6001_v32, %v1073_v29  ;;  %v1076_v18 = vpop.xlane.xlu0 %1075 }
 0x3da   :  { %5569 = vpow2.f32 %v1125_v15  ;;  %v1104_v33 = vsub.f32 %v5997_v30, %v1076_v18 }
 0x3db   :  { %v6063_v17 = vpop.eup %5561  ;;  %5571 = vpow2.f32 %v1123_v23  ;;  %v1127_v35 = vmul.f32 1.442695, %v1103_v31 }
 0x3dc   :  { %v1129_v37 = vmul.f32 1.442695, %v1104_v33  ;;  %v1079_v26 = vpop.xlane.xlu1 %1078  ;;  %v1152_v40 = vsel %vm1046_vm6, %v6063_v17, 0.0 }
 0x3dd   :  { %v1105_v20 = vsub.f32 %v6009_v36, %v1079_v26  ;;  %v1082_v42 = vpop.xlane.xlu0 %1081  ;;  %1153 = vadd.xlane.f32.xlu0 %v1152_v40 }
 0x3de   :  { %5573 = vpow2.f32 %v1129_v37  ;;  %v1106_v32 = vsub.f32 %v6005_v34, %v1082_v42 }
 0x3df   :  { %v6069_v43 = vpop.eup %5563  ;;  %5575 = vpow2.f32 %v1127_v35  ;;  %v1131_v30 = vmul.f32 1.442695, %v1105_v20 }
 0x3e0   :  { %v1133_v45 = vmul.f32 1.442695, %v1106_v32  ;;  %v1085_v55 = vpop.xlane.xlu1 %1084  ;;  %v1158_v56 = vsel %vm1046_vm6, %v6069_v43, 0.0 }
 0x3e1   :  { %v1107_v57 = vsub.f32 %v6017_v41, %v1085_v55  ;;  %1159 = vadd.xlane.f32.xlu0 %v1158_v56  ;;  %v1088_v46 = vpop.xlane.xlu0 %1087 }
 0x3e2   :  { %5577 = vpow2.f32 %v1133_v45  ;;  %v1108_v36 = vsub.f32 %v6013_v39, %v1088_v46 }
 0x3e3   :  { %v6075_v38 = vpop.eup %5565  ;;  %5579 = vpow2.f32 %v1131_v30  ;;  %v1135_v34 = vmul.f32 1.442695, %v1107_v57 }
 0x3e4   :  { %v1137_v47 = vmul.f32 1.442695, %v1108_v36  ;;  %v1149_v60 = vsel %vm1046_vm6, %v6075_v38, 0.0  ;;  %v6079_v61 = vpop.eup %5567  ;;  %v6122_v29 = vpop.permute.xlu1 %1658 }
 0x3e5   :  { %v1094_v63 = vpop.xlane.xlu0 %1093  ;;  %1150 = vadd.xlane.f32.xlu1 %v1149_v60  ;;  %v1155_v2 = vsel %vm1046_vm6, %v6079_v61, 0.0 }
 0x3e6   :  { %5581 = vpow2.f32 %v1137_v47  ;;  %v1110_v41 = vsub.f32 %v6023_v44, %v1094_v63 }
 0x3e7   :  { %v6082_v0 = vpop.eup %5569  ;;  %5583 = vpow2.f32 %v1135_v34 }
 0x3e8   :  { %v1141_v1 = vmul.f32 1.442695, %v1110_v41  ;;  %v1164_v39 = vsel %vm1046_vm6, %v6082_v0, 0.0  ;;  %v6088_v3 = vpop.eup %5571 }
 0x3e9   :  { %1165 = vadd.xlane.f32.xlu0 %v1164_v39  ;;  %1156 = vadd.xlane.f32.xlu1 %v1155_v2  ;;  %v1161_v5 = vsel %vm1046_vm6, %v6088_v3, 0.0  ;;  %v6131_v26 = vpop.permute.xlu0 %1571 }
 0x3ea   :  { %5585 = vpow2.f32 %v1141_v1 }
 0x3eb   :  { %v6090_v4 = vpop.eup %5573 }
 0x3ec   :  { %v1170_v44 = vsel %vm1046_vm6, %v6090_v4, 0.0  ;;  %v6096_v49 = vpop.eup %5575 }
 0x3ed   :  { %1171 = vadd.xlane.f32.xlu0 %v1170_v44  ;;  %1162 = vadd.xlane.f32.xlu1 %v1161_v5  ;;  %v1167_v10 = vsel %vm1046_vm6, %v6096_v49, 0.0  ;;  %v6133_v40 = vpop.permute.xlu0 %1747 }
 0x3ef   :  { %v6098_v7 = vpop.eup %5577 }
 0x3f0   :  { %v1176_v9 = vsel %vm1046_vm6, %v6098_v7, 0.0  ;;  %v6104_v11 = vpop.eup %5579 }
 0x3f1   :  { %1177 = vadd.xlane.f32.xlu0 %v1176_v9  ;;  %1168 = vadd.xlane.f32.xlu1 %v1167_v10  ;;  %v1173_v16 = vsel %vm1046_vm6, %v6104_v11, 0.0 }
 0x3f3   :  { %v6106_v12 = vpop.eup %5581 }
 0x3f4   :  { %v1182_v14 = vsel %vm1046_vm6, %v6106_v12, 0.0  ;;  %v6112_v19 = vpop.eup %5583 }
 0x3f5   :  { %1183 = vadd.xlane.f32.xlu0 %v1182_v14  ;;  %1174 = vadd.xlane.f32.xlu1 %v1173_v16  ;;  %v1179_v15 = vsel %vm1046_vm6, %v6112_v19, 0.0 }
 0x3f7   :  { %v6114_v13 = vpop.eup %5585 }
 0x3f8   :  { %v1188_v23 = vsel %vm1046_vm6, %v6114_v13, 0.0 }
 0x3f9   :  { %1189 = vadd.xlane.f32.xlu0 %v1188_v23  ;;  %1180 = vadd.xlane.f32.xlu1 %v1179_v15 }
 0x40f   :  { %1745 = vrot.lane.b32.xlu0 %v5879_v48, %s5721_s25 }
 0x415   :  { %v1091_v31 = vpop.xlane.xlu1 %1090 }
 0x416   :  { %v1109_v18 = vsub.f32 %v6041_v58, %v1091_v31 }
 0x418   :  { %v1139_v33 = vmul.f32 1.442695, %v1109_v18 }
 0x419   :  { %v6135_v48 = vpop.permute.xlu1 %1834 }
 0x41a   :  { %5587 = vpow2.f32 %v1139_v33 }
 0x41e   :  { %v1148_v20 = vpop.xlane.xlu0 %1147 }
 0x41f   :  { %5589 = vrcp.f32 %v1148_v20 }
 0x427   :  { %v6125_v35 = vpop.eup %5587 }
 0x428   :  { %v1185_v37 = vsel %vm1046_vm6, %v6125_v35, 0.0 }
 0x429   :  { %1186 = vadd.xlane.f32.xlu1 %v1185_v37  ;;  %v1982_v37 = vld [vmem:[%s6850_s2 + $0x40] sm:$0xff] }
 0x42c   :  { %v5590_v42 = vpop.eup %5589 }
 0x42d   :  { %v1194_v45 = vmul.f32 %v5590_v42, %v6045_v59 }
 0x43a   :  { %1832 = vrot.lane.b32.xlu1 %v5893_v51, %s5721_s25 }
 0x44a   :  { %v1145_v58 = vpop.xlane.xlu1 %1144 }
 0x44b   :  { %5591 = vrcp.f32 %v1145_v58 }
 0x458   :  { %v5592_v32 = vpop.eup %5591 }
 0x459   :  { %v1192_v30 = vmul.f32 %v5592_v32, %v6051_v62 }
 0x45b   :  { %5258 = vmatprep.mubr.msk.f32.mxu1 %vm1046_vm6, %v1192_v30 }
 0x45c   :  { %5259 = vmatmul.mubr.msk.f32.vlgmr.msra.gmra.mxu1 %vm1046_vm6, %v1194_v45 }
 0x45d   :  { %5262 = vmatpush3.msra.mxu1 %v5967_v6 }
 0x45e   :  { %5263 = vmatprep.subr.mxu1 %v6027_v50 }
 0x45f   :  { %5264 = vmatpush3.msra.mxu1 %v6027_v50 }
 0x460   :  { %5275 = vmatprep.subr.mxu1 %v6031_v52 }
 0x466   :  { %v1154_v51 = vpop.xlane.xlu0 %1153 }
 0x467   :  { %5593 = vrcp.f32 %v1154_v51 }
 0x46a   :  { %v1160_v55 = vpop.xlane.xlu0 %1159 }
 0x46e   :  { %v1151_v56 = vpop.xlane.xlu1 %1150 }
 0x46f   :  { %5595 = vrcp.f32 %v1151_v56 }
 0x470   :  { %5597 = vrcp.f32 %v1160_v55 }
 0x472   :  { %v1166_v62 = vpop.xlane.xlu0 %1165  ;;  %v1157_v57 = vpop.xlane.xlu1 %1156 }
 0x473   :  { %5599 = vrcp.f32 %v1157_v57 }
 0x474   :  { %5601 = vrcp.f32 %v1166_v62  ;;  %v5594_v34 = vpop.eup %5593 }
 0x475   :  { %v1198_v63 = vmul.f32 %v5594_v34, %v6063_v17 }
 0x476   :  { %v1172_v59 = vpop.xlane.xlu0 %1171  ;;  %v1163_v46 = vpop.xlane.xlu1 %1162 }
 0x477   :  { %5603 = vrcp.f32 %v1163_v46 }
 0x478   :  { %5605 = vrcp.f32 %v1172_v59 }
 0x47a   :  { %v1178_v6 = vpop.xlane.xlu0 %1177  ;;  %v1169_v36 = vpop.xlane.xlu1 %1168 }
 0x47b   :  { %5607 = vrcp.f32 %v1169_v36 }
 0x47c   :  { %v5596_v50 = vpop.eup %5595  ;;  %5609 = vrcp.f32 %v1178_v6 }
 0x47d   :  { %v1196_v47 = vmul.f32 %v5596_v50, %v6075_v38  ;;  %v5598_v41 = vpop.eup %5597 }
 0x47e   :  { %v1175_v60 = vpop.xlane.xlu1 %1174  ;;  %v1184_v1 = vpop.xlane.xlu0 %1183  ;;  %v1202_v17 = vmul.f32 %v5598_v41, %v6069_v43 }
 0x47f   :  { %5265 = vmatprep.mubr.msk.f32.mxu1 %vm1046_vm6, %v1196_v47  ;;  %5611 = vrcp.f32 %v1175_v60 }
 0x480   :  { %5266 = vmatmul.mubr.msk.f32.vlgmr.msra.gmra.mxu1 %vm1046_vm6, %v1198_v63  ;;  %v5600_v39 = vpop.eup %5599  ;;  %5613 = vrcp.f32 %v1184_v1 }
 0x481   :  { %5276 = vmatpush3.msra.mxu1 %v6031_v52  ;;  %v1200_v44 = vmul.f32 %v5600_v39, %v6079_v61  ;;  %v5602_v38 = vpop.eup %5601 }
 0x482   :  { %5277 = vmatprep.subr.mxu1 %v6033_v53  ;;  %v1181_v2 = vpop.xlane.xlu1 %1180  ;;  %v1206_v61 = vmul.f32 %v5602_v38, %v6082_v0  ;;  %v1190_v9 = vpop.xlane.xlu0 %1189 }
 0x483   :  { %5278 = vmatpush3.msra.mxu1 %v6033_v53  ;;  %5615 = vrcp.f32 %v1181_v2  ;;  %5272 = vmatprep.mubr.msk.f32.mxu0 %vm1046_vm6, %v1200_v44 }
 0x484   :  { %5289 = vmatprep.subr.mxu1 %v6037_v54  ;;  %v5604_v5 = vpop.eup %5603  ;;  %5273 = vmatmul.mubr.msk.f32.vlgmr.msra.gmra.mxu0 %vm1046_vm6, %v1202_v17  ;;  %5617 = vrcp.f32 %v1190_v9 }
 0x485   :  { %5283 = vmatpush3.msra.mxu0 %v5970_v8  ;;  %v1204_v52 = vmul.f32 %v5604_v5, %v6088_v3  ;;  %v5606_v53 = vpop.eup %5605 }
 0x486   :  { %5284 = vmatprep.subr.mxu0 %v6131_v26  ;;  %v1210_v3 = vmul.f32 %v5606_v53, %v6090_v4  ;;  %v1746_v14 = vpop.permute.xlu0 %1745 }
 0x487   :  { %5285 = vmatpush3.msra.mxu0 %v6131_v26  ;;  %5279 = vmatprep.mubr.msk.f32.mxu1 %vm1046_vm6, %v1204_v52  ;;  %v1980_v26 = vld [vmem:[%s6850_s2 + $0x30] sm:$0xff] }
 0x488   :  { %v5608_v43 = vpop.eup %5607  ;;  %5296 = vmatprep.subr.mxu0 %v6133_v40  ;;  %5280 = vmatmul.mubr.msk.f32.vlgmr.msra.gmra.mxu1 %vm1046_vm6, %v1206_v61 }
 0x489   :  { %5290 = vmatpush3.msra.mxu1 %v6037_v54  ;;  %v1208_v8 = vmul.f32 %v5608_v43, %v6096_v49  ;;  %v5610_v0 = vpop.eup %5609 }
 0x48a   :  { %5291 = vmatprep.subr.mxu1 %v6122_v29  ;;  %v1214_v49 = vmul.f32 %v5610_v0, %v6098_v7 }
 0x48b   :  { %5292 = vmatpush3.msra.mxu1 %v6122_v29  ;;  %5286 = vmatprep.mubr.msk.f32.mxu0 %vm1046_vm6, %v1208_v8 }
 0x48c   :  { %v5612_v10 = vpop.eup %5611  ;;  %5303 = vmatprep.subr.mxu1 %v6135_v48  ;;  %5287 = vmatmul.mubr.msk.f32.vlgmr.msra.gmra.mxu0 %vm1046_vm6, %v1210_v3 }
 0x48d   :  { %5297 = vmatpush3.msra.mxu0 %v6133_v40  ;;  %v1212_v54 = vmul.f32 %v5612_v10, %v6104_v11  ;;  %v5614_v16 = vpop.eup %5613  ;;  %v4862_v10 = vld [vmem:[%s6850_s2 + $0x50] ss:$0 sm:$0xff] }
 0x48e   :  { %5298 = vmatprep.subr.mxu0 %v1746_v14  ;;  %v1218_v15 = vmul.f32 %v5614_v16, %v6106_v12  ;;  %v1983_v12 = vld [vmem:[%s6850_s2 + $0x48] sm:$0xff] }
 0x48f   :  { %5299 = vmatpush3.msra.mxu0 %v1746_v14  ;;  %5293 = vmatprep.mubr.msk.f32.mxu1 %vm1046_vm6, %v1212_v54 }
 0x490   :  { %v5616_v4 = vpop.eup %5615  ;;  %5294 = vmatmul.mubr.msk.f32.vlgmr.msra.gmra.mxu1 %vm1046_vm6, %v1214_v49  ;;  %5310 = vmatprep.subr.mxu0 %v1983_v12 }
 0x491   :  { %5304 = vmatpush3.msra.mxu1 %v6135_v48  ;;  %v1216_v23 = vmul.f32 %v5616_v4, %v6112_v19  ;;  %v5618_v29 = vpop.eup %5617 }
 0x492   :  { %v1222_v33 = vmul.f32 %v5618_v29, %v6114_v13  ;;  %v1981_v13 = vld [vmem:[%s6850_s2 + $0x38] sm:$0xff] }
 0x493   :  { %5300 = vmatprep.mubr.msk.f32.mxu0 %vm1046_vm6, %v1216_v23 }
 0x494   :  { %5301 = vmatmul.mubr.msk.f32.vlgmr.msra.gmra.mxu0 %vm1046_vm6, %v1218_v15 }
 0x495   :  { %5311 = vmatpush3.msra.mxu0 %v1983_v12 }
 0x496   :  { %5312 = vmatprep.subr.mxu0 %v1982_v37 }
 0x497   :  { %5313 = vmatpush3.msra.mxu0 %v1982_v37 }
 0x498   :  { %5314 = vmatprep.subr.mxu0 %v1981_v13 }
 0x499   :  { %5315 = vmatpush3.msra.mxu0 %v1981_v13 }
 0x49a   :  { %5316 = vmatprep.subr.mxu0 %v1980_v26 }
 0x49b   :  { %5317 = vmatpush3.msra.mxu0 %v1980_v26 }
 0x4b2   :  { %v1187_v11 = vpop.xlane.xlu1 %1186 }
 0x4b3   :  { %5619 = vrcp.f32 %v1187_v11 }
 0x4b6   :  { %v1833_v7 = vpop.permute.xlu1 %1832 }
 0x4b7   :  { %5305 = vmatprep.subr.mxu1 %v1833_v7 }
 0x4b8   :  { %5306 = vmatpush3.msra.mxu1 %v1833_v7 }
 0x4c0   :  { %v5620_v31 = vpop.eup %5619 }
 0x4c1   :  { %v1220_v18 = vmul.f32 %v5620_v31, %v6125_v35 }
 0x4c3   :  { %5307 = vmatprep.mubr.msk.f32.mxu1 %vm1046_vm6, %v1220_v18 }
 0x4c4   :  { %5308 = vmatmul.mubr.msk.f32.vlgmr.msra.gmra.mxu1 %vm1046_vm6, %v1222_v33 }
 0x51c   :  { %v5260_v19 = vpop.f32.mrf.mxu1 }
 0x51e   :  { %v1301_v35 = vpop.f32.mrf.mxu1 }
 0x540   :  { %v5267_v40 = vpop.f32.mrf.mxu1 }
 0x541   :  { %1925 = vrot.lane.b32.xlu1 %v5267_v40, %s5722_s8 }
 0x542   :  { %v1388_v48 = vpop.f32.mrf.mxu1 }
 0x543   :  { %1923 = vrot.lane.b32.xlu0 %v1388_v48, %s5722_s8 }
 0x544   :  { %v5274_v20 = vpop.f32.mrf.mxu0 }
 0x545   :  { %1941 = vrot.lane.b32.xlu1 %v5274_v20, %s5723_s1 }
 0x546   :  { %v1475_v58 = vpop.f32.mrf.mxu0 }
 0x547   :  { %1939 = vrot.lane.b32.xlu0 %v1475_v58, %s5723_s1 }
 0x548   :  { %v5281_v42 = vpop.f32.mrf.mxu1 }
 0x549   :  { %1957 = vrot.lane.b32.xlu1 %v5281_v42, %s5724_s9  ;;  %v2163_v42 = vld [vmem:[%s6854_s3 + $0x10] sm:$0xff] }
 0x54a   :  { %v1562_v32 = vpop.f32.mrf.mxu1 }
 0x54b   :  { %1955 = vrot.lane.b32.xlu0 %v1562_v32, %s5724_s9  ;;  %v2162_v32 = vld [vmem:[%s6854_s3 + $0x8] sm:$0xff] }
 0x54c   :  { %v5288_v30 = vpop.f32.mrf.mxu0 }
 0x54e   :  { %v1649_v51 = vpop.f32.mrf.mxu0 }
 0x550   :  { %v5295_v45 = vpop.f32.mrf.mxu1 }
 0x551   :  { %1929 = vrot.lane.b32.xlu1 %v5295_v45, %s5722_s8 }
 0x552   :  { %v1736_v55 = vpop.f32.mrf.mxu1 }
 0x553   :  { %1927 = vrot.lane.b32.xlu0 %v1736_v55, %s5722_s8 }
 0x554   :  { %v5302_v56 = vpop.f32.mrf.mxu0 }
 0x555   :  { %1945 = vrot.lane.b32.xlu1 %v5302_v56, %s5723_s1 }
 0x556   :  { %v1823_v62 = vpop.f32.mrf.mxu0 }
 0x557   :  { %1943 = vrot.lane.b32.xlu0 %v1823_v62, %s5723_s1 }
 0x584   :  { %v5309_v57 = vpop.f32.mrf.mxu1 }
 0x585   :  { %1961 = vrot.lane.b32.xlu1 %v5309_v57, %s5724_s9 }
 0x586   :  { %v1910_v59 = vpop.f32.mrf.mxu1 }
 0x587   :  { %1959 = vrot.lane.b32.xlu0 %v1910_v59, %s5724_s9 }
 0x5b3   :  { %v1926_v46 = vpop.permute.xlu1 %1925 }
 0x5b4   :  { %v1968_v60 = vsel %vm353_vm5, %v5260_v19, %v1926_v46 }
 0x5b5   :  { %v1924_v6 = vpop.permute.xlu0 %1923 }
 0x5b6   :  { %v1967_v50 = vsel %vm353_vm5, %v1301_v35, %v1924_v6 }
 0x5b7   :  { %v1942_v36 = vpop.permute.xlu1 %1941 }
 0x5b8   :  { %v1972_v1 = vsel %vm1046_vm6, %v1968_v60, %v1942_v36  ;;  %v2275_v60 = vld [vmem:[%s6850_s2 + $0x88] sm:$0xff] }
 0x5b9   :  { %v1940_v34 = vpop.permute.xlu0 %1939 }
 0x5ba   :  { %v1971_v63 = vsel %vm1046_vm6, %v1967_v50, %v1940_v34  ;;  %v2278_v34 = vld [vmem:[%s6850_s2 + $0xa0] sm:$0xff]  ;;  %v2277_v50 = vld [vmem:[%s6850_s2 + $0x98] sm:$0xff] }
 0x5bb   :  { %v1958_v47 = vpop.permute.xlu1 %1957  ;;  %5338 = vmatprep.subr.mxu0 %v2278_v34 }
 0x5bc   :  { %v1977_v2 = vsel %vm1975_vm7, %v1972_v1, %v1958_v47  ;;  %v2276_v47 = vld [vmem:[%s6850_s2 + $0x90] sm:$0xff] }
 0x5bd   :  { %v1956_v41 = vpop.permute.xlu0 %1955 }
 0x5be   :  { %v1976_v39 = vsel %vm1975_vm7, %v1971_v63, %v1956_v41 }
 0x5bf   :  { %5318 = vmatprep.mubr.msk.f32.mxu0 %vm223_vm4, %v1976_v39 }
 0x5c0   :  { %5319 = vmatmul.mubr.msk.f32.vlgmr.msra.gmra.mxu0 %vm223_vm4, %v1977_v2 }
 0x5c1   :  { %5339 = vmatpush3.msra.mxu0 %v2278_v34 }
 0x5c2   :  { %5340 = vmatprep.subr.mxu0 %v2277_v50 }
 0x5c3   :  { %v1930_v44 = vpop.permute.xlu1 %1929  ;;  %5341 = vmatpush3.msra.mxu0 %v2277_v50 }
 0x5c4   :  { %v1970_v53 = vsel %vm353_vm5, %v5288_v30, %v1930_v44  ;;  %v2161_v30 = vld [vmem:[%s6854_s3] sm:$0xff]  ;;  %5342 = vmatprep.subr.mxu0 %v2276_v47 }
 0x5c5   :  { %v1928_v17 = vpop.permute.xlu0 %1927  ;;  %5343 = vmatpush3.msra.mxu0 %v2276_v47 }
 0x5c6   :  { %v1969_v52 = vsel %vm353_vm5, %v1649_v51, %v1928_v17  ;;  %5344 = vmatprep.subr.mxu0 %v2275_v60 }
 0x5c7   :  { %v1946_v38 = vpop.permute.xlu1 %1945  ;;  %5345 = vmatpush3.msra.mxu0 %v2275_v60 }
 0x5c8   :  { %v1974_v8 = vsel %vm1046_vm6, %v1970_v53, %v1946_v38  ;;  %v4867_v38 = vld [vmem:[%s6850_s2 + $0x58] ss:$0 sm:$0xff] }
 0x5c9   :  { %v1944_v5 = vpop.permute.xlu0 %1943 }
 0x5ca   :  { %v1973_v9 = vsel %vm1046_vm6, %v1969_v52, %v1944_v5 }
 0x5f7   :  { %v1962_v61 = vpop.permute.xlu1 %1961 }
 0x5f8   :  { %v1979_v0 = vsel %vm1975_vm7, %v1974_v8, %v1962_v61 }
 0x5f9   :  { %v1960_v43 = vpop.permute.xlu0 %1959 }
 0x5fa   :  { %v1978_v3 = vsel %vm1975_vm7, %v1973_v9, %v1960_v43  ;;  %v4868_v9 = vld [vmem:[%s6850_s2 + $0x60] ss:$0 sm:$0xff] }
 0x5fb   :  { %5321 = vmatprep.mubr.msk.f32.mxu0 %vm223_vm4, %v1978_v3 }
 0x5fc   :  { %5322 = vmatmul.mubr.msk.f32.gmra.mxu0 %vm223_vm4, %v1979_v0 }
 0x680   :  { %v5320_v14 = vpop.f32.mrf.mxu0 }
 0x681   :  { %v2073_v54 = vadd.f32 %v5320_v14, %v4862_v10 }
 0x682   :  { %v2067_v49 = vpop.f32.mrf.mxu0 }
 0x683   :  { %v2068_v16 = vadd.f32 %v4862_v10, %v2067_v49  ;;  %v2087_v4 = vadd.f32 %v2073_v54, %v5801_v22 }
 0x685   :  { %v2095_v23 = vsel %vm223_vm4, %v2087_v4, 0.0  ;;  %v2086_v15 = vadd.f32 %v2068_v16, %v5799_v21 }
 0x686   :  { %2096 = vadd.xlane.f32.xlu1 %v2095_v23 }
 0x687   :  { %v2092_v11 = vsel %vm223_vm4, %v2086_v15, 0.0 }
 0x688   :  { %2093 = vadd.xlane.f32.xlu0 %v2092_v11 }
 0x6bc   :  { %v5323_v7 = vpop.f32.mrf.mxu0 }
 0x6bd   :  { %v2083_v31 = vadd.f32 %v5323_v7, %v4862_v10 }
 0x6be   :  { %v2077_v29 = vpop.f32.mrf.mxu0 }
 0x6bf   :  { %v2078_v18 = vadd.f32 %v4862_v10, %v2077_v29  ;;  %v2089_v19 = vadd.f32 %v2083_v31, %v5811_v25  ;;  %v2164_v25 = vld [vmem:[%s6854_s3 + $0x18] sm:$0xff] }
 0x6c0   :  { %5324 = vmatprep.subr.mxu1 %v2164_v25 }
 0x6c1   :  { %v2088_v33 = vadd.f32 %v2078_v18, %v5803_v24  ;;  %v2101_v22 = vsel %vm223_vm4, %v2089_v19, 0.0  ;;  %5325 = vmatpush3.msra.mxu1 %v2164_v25 }
 0x6c2   :  { %5326 = vmatprep.subr.mxu1 %v2163_v42 }
 0x6c3   :  { %v2098_v12 = vsel %vm223_vm4, %v2088_v33, 0.0  ;;  %5327 = vmatpush3.msra.mxu1 %v2163_v42 }
 0x6c4   :  { %2099 = vadd.xlane.f32.xlu0 %v2098_v12  ;;  %5328 = vmatprep.subr.mxu1 %v2162_v32  ;;  %v2273_v12 = vld [vmem:[%s6850_s2 + $0x78] sm:$0xff] }
 0x6c5   :  { %5329 = vmatpush3.msra.mxu1 %v2162_v32 }
 0x6c6   :  { %5330 = vmatprep.subr.mxu1 %v2161_v30 }
 0x6c7   :  { %5331 = vmatpush3.msra.mxu1 %v2161_v30  ;;  %v4874_v30 = vld [vmem:[%s6850_s2 + $0xa8] ss:$0 sm:$0xff] }
 0x6c8   :  { %2102 = vadd.xlane.f32.xlu0 %v2101_v22  ;;  %v2271_v22 = vld [vmem:[%s6850_s2 + $0x68] sm:$0xff] }
 0x70f   :  { %v2097_v37 = vpop.xlane.xlu1 %2096 }
 0x710   :  { %v2106_v21 = vmul.f32 0.03125, %v2097_v37  ;;  %v4869_v37 = vld [vmem:[%s6854_s3 + $0x20] ss:$0 sm:$0xff] }
 0x711   :  { %v2094_v13 = vpop.xlane.xlu0 %2093 }
 0x712   :  { %v2110_v35 = vsub.f32 %v2087_v4, %v2106_v21  ;;  %v2105_v26 = vmul.f32 0.03125, %v2094_v13 }
 0x714   :  { %v2109_v40 = vsub.f32 %v2086_v15, %v2105_v26  ;;  %v2114_v48 = vmul.f32 %v2110_v35, %v2110_v35 }
 0x716   :  { %v2120_v20 = vsel %vm223_vm4, %v2114_v48, 0.0  ;;  %v2113_v58 = vmul.f32 %v2109_v40, %v2109_v40 }
 0x717   :  { %2121 = vadd.xlane.f32.xlu0 %v2120_v20 }
 0x718   :  { %v2117_v24 = vsel %vm223_vm4, %v2113_v58, 0.0 }
 0x719   :  { %2118 = vadd.xlane.f32.xlu1 %v2117_v24 }
 0x74d   :  { %v2100_v45 = vpop.xlane.xlu0 %2099 }
 0x74e   :  { %v2107_v51 = vmul.f32 0.03125, %v2100_v45 }
 0x750   :  { %v2111_v55 = vsub.f32 %v2088_v33, %v2107_v51  ;;  %v2274_v33 = vld [vmem:[%s6850_s2 + $0x80] sm:$0xff] }
 0x751   :  { %v2103_v56 = vpop.xlane.xlu0 %2102  ;;  %5346 = vmatprep.subr.mxu0 %v2274_v33 }
 0x752   :  { %v2108_v62 = vmul.f32 0.03125, %v2103_v56  ;;  %v2115_v57 = vmul.f32 %v2111_v55, %v2111_v55  ;;  %5347 = vmatpush3.msra.mxu0 %v2274_v33 }
 0x753   :  { %5348 = vmatprep.subr.mxu0 %v2273_v12 }
 0x754   :  { %v2112_v59 = vsub.f32 %v2089_v19, %v2108_v62  ;;  %v2123_v46 = vsel %vm223_vm4, %v2115_v57, 0.0  ;;  %5349 = vmatpush3.msra.mxu0 %v2273_v12  ;;  %v2272_v19 = vld [vmem:[%s6850_s2 + $0x70] sm:$0xff] }
 0x755   :  { %2124 = vadd.xlane.f32.xlu1 %v2123_v46  ;;  %5350 = vmatprep.subr.mxu0 %v2272_v19 }
 0x756   :  { %v2116_v6 = vmul.f32 %v2112_v59, %v2112_v59  ;;  %5351 = vmatpush3.msra.mxu0 %v2272_v19 }
 0x757   :  { %5352 = vmatprep.subr.mxu0 %v2271_v22 }
 0x758   :  { %v2126_v36 = vsel %vm223_vm4, %v2116_v6, 0.0  ;;  %5353 = vmatpush3.msra.mxu0 %v2271_v22 }
 0x759   :  { %2127 = vadd.xlane.f32.xlu0 %v2126_v36 }
 0x7a0   :  { %v2122_v63 = vpop.xlane.xlu0 %2121 }
 0x7a1   :  { %v2130_v41 = vmul.f32 0.03125, %v2122_v63 }
 0x7a2   :  { %v2119_v1 = vpop.xlane.xlu1 %2118 }
 0x7a3   :  { %v2134_v39 = vadd.f32 1e-05, %v2130_v41  ;;  %v2129_v2 = vmul.f32 0.03125, %v2119_v1 }
 0x7a5   :  { %5621 = vrsqrt.f32 %v2134_v39  ;;  %v2133_v44 = vadd.f32 1e-05, %v2129_v2 }
 0x7a7   :  { %5623 = vrsqrt.f32 %v2133_v44 }
 0x7b2   :  { %v5622_v17 = vpop.eup %5621 }
 0x7b3   :  { %v2142_v5 = vmul.f32 %v5622_v17, %v2110_v35 }
 0x7b4   :  { %v5624_v52 = vpop.eup %5623 }
 0x7b5   :  { %v2141_v61 = vmul.f32 %v5624_v52, %v2109_v40  ;;  %v2150_v53 = vmul.f32 %v4867_v38, %v2142_v5 }
 0x7b7   :  { %v2149_v43 = vmul.f32 %v4867_v38, %v2141_v61  ;;  %v2158_v3 = vadd.f32 %v4868_v9, %v2150_v53 }
 0x7b9   :  { %v2157_v8 = vadd.f32 %v4868_v9, %v2149_v43  ;;  %v4883_v43 = vld [vmem:[%s6853_s4 + $0x38] sm:$0xff] }
 0x7bb   :  { %5332 = vmatprep.mubr.msk.f32.mxu1 %vm223_vm4, %v2157_v8 }
 0x7bc   :  { %5333 = vmatmul.mubr.msk.f32.vlgmr.msra.gmra.mxu1 %vm223_vm4, %v2158_v3 }
 0x7de   :  { %v2125_v0 = vpop.xlane.xlu1 %2124 }
 0x7df   :  { %v2131_v10 = vmul.f32 0.03125, %v2125_v0 }
 0x7e1   :  { %v2135_v14 = vadd.f32 1e-05, %v2131_v10 }
 0x7e2   :  { %v2128_v54 = vpop.xlane.xlu0 %2127 }
 0x7e3   :  { %5625 = vrsqrt.f32 %v2135_v14  ;;  %v2132_v49 = vmul.f32 0.03125, %v2128_v54 }
 0x7e5   :  { %v2136_v16 = vadd.f32 1e-05, %v2132_v49 }
 0x7e7   :  { %5627 = vrsqrt.f32 %v2136_v16 }
 0x7f0   :  { %v5626_v4 = vpop.eup %5625 }
 0x7f1   :  { %v2143_v23 = vmul.f32 %v5626_v4, %v2111_v55 }
 0x7f3   :  { %v2151_v15 = vmul.f32 %v4867_v38, %v2143_v23 }
 0x7f4   :  { %v5628_v11 = vpop.eup %5627 }
 0x7f5   :  { %v2159_v7 = vadd.f32 %v4868_v9, %v2151_v15  ;;  %v2144_v29 = vmul.f32 %v5628_v11, %v2112_v59 }
 0x7f7   :  { %5335 = vmatprep.mubr.msk.f32.mxu1 %vm223_vm4, %v2159_v7  ;;  %v2152_v31 = vmul.f32 %v4867_v38, %v2144_v29 }
 0x7f9   :  { %v2160_v18 = vadd.f32 %v4868_v9, %v2152_v31  ;;  %v4884_v9 = vld [vmem:[%s6853_s4 + $0x40] sm:$0xff] }
 0x7fa   :  { %5360 = vmatprep.subr.mxu1 %v4884_v9 }
 0x7fb   :  { %5336 = vmatmul.mubr.msk.f32.gmra.mxu1 %vm223_vm4, %v2160_v18 }
 0x7fc   :  { %5361 = vmatpush3.msra.mxu1 %v4884_v9 }
 0x7fd   :  { %5362 = vmatprep.subr.mxu1 %v4883_v43 }
 0x7fe   :  { %5363 = vmatpush3.msra.mxu1 %v4883_v43 }
 0x87c   :  { %v5334_v21 = vpop.f32.mrf.mxu1 }
 0x87d   :  { %v2254_v13 = vadd.f32 %v5334_v21, %v4869_v37 }
 0x87e   :  { %v2248_v35 = vpop.f32.mrf.mxu1 }
 0x87f   :  { %v2249_v26 = vadd.f32 %v4869_v37, %v2248_v35  ;;  %v2268_v48 = vmax.f32 %v2254_v13, 0.0 }
 0x881   :  { %v2267_v40 = vmax.f32 %v2249_v26, 0.0  ;;  %v4880_v26 = vld [vmem:[%s6850_s2 + $0xb8] ss:$0 sm:$0xff] }
 0x883   :  { %5354 = vmatprep.mubr.msk.f32.mxu0 %vm2284_vm8, %v2267_v40 }
 0x884   :  { %5355 = vmatmul.mubr.msk.f32.vlgmr.msra.gmra.mxu0 %vm2284_vm8, %v2268_v48 }
 0x8bb   :  { %v5337_v20 = vpop.f32.mrf.mxu1 }
 0x8bc   :  { %v2264_v58 = vadd.f32 %v5337_v20, %v4869_v37 }
 0x8bd   :  { %v2258_v24 = vpop.f32.mrf.mxu1 }
 0x8be   :  { %v2259_v25 = vadd.f32 %v4869_v37, %v2258_v24  ;;  %v2270_v32 = vmax.f32 %v2264_v58, 0.0  ;;  %v4879_v37 = vld [vmem:[%s6850_s2 + $0xb0] ss:$0 sm:$0xff] }
 0x8c0   :  { %v2269_v42 = vmax.f32 %v2259_v25, 0.0 }
 0x8c2   :  { %5357 = vmatprep.mubr.msk.f32.mxu0 %vm2284_vm8, %v2269_v42 }
 0x8c3   :  { %5358 = vmatmul.mubr.msk.f32.gmra.mxu0 %vm2284_vm8, %v2270_v32 }
 0x944   :  { %v5356_v45 = vpop.f32.mrf.mxu0 }
 0x945   :  { %v2369_v51 = vadd.f32 %v5356_v45, %v4874_v30 }
 0x946   :  { %v2363_v55 = vpop.f32.mrf.mxu0 }
 0x947   :  { %v2383_v56 = vadd.f32 %v2369_v51, %v2158_v3  ;;  %v2364_v62 = vadd.f32 %v4874_v30, %v2363_v55  ;;  %v4881_v3 = vld [vmem:[%s6853_s4 + $0x28] sm:$0xff] }
 0x949   :  { %v2391_v57 = vsel %vm223_vm4, %v2383_v56, 0.0  ;;  %v2382_v59 = vadd.f32 %v2364_v62, %v2157_v8  ;;  %v4882_v8 = vld [vmem:[%s6853_s4 + $0x30] sm:$0xff] }
 0x94a   :  { %2392 = vadd.xlane.f32.xlu0 %v2391_v57  ;;  %5364 = vmatprep.subr.mxu1 %v4882_v8 }
 0x94b   :  { %v2388_v46 = vsel %vm223_vm4, %v2382_v59, 0.0  ;;  %5365 = vmatpush3.msra.mxu1 %v4882_v8 }
 0x94c   :  { %2389 = vadd.xlane.f32.xlu1 %v2388_v46  ;;  %5366 = vmatprep.subr.mxu1 %v4881_v3 }
 0x94d   :  { %5367 = vmatpush3.msra.mxu1 %v4881_v3 }
 0x983   :  { %v5359_v6 = vpop.f32.mrf.mxu0 }
 0x984   :  { %v2379_v36 = vadd.f32 %v5359_v6, %v4874_v30  ;;  %v4885_v6 = vld [vmem:[%s6853_s4 + $0x48] sm:$0xff] }
 0x985   :  { %v2373_v34 = vpop.f32.mrf.mxu0 }
 0x986   :  { %v2385_v50 = vadd.f32 %v2379_v36, %v2160_v18  ;;  %v2374_v47 = vadd.f32 %v4874_v30, %v2373_v34  ;;  %v2465_v36 = vrot.slane %v4885_v6, %v221_v28 }
 0x988   :  { %v2397_v60 = vsel %vm223_vm4, %v2385_v50, 0.0  ;;  %v2384_v63 = vadd.f32 %v2374_v47, %v2159_v7 }
 0x989   :  { %2398 = vadd.xlane.f32.xlu0 %v2397_v60 }
 0x98a   :  { %v2394_v41 = vsel %vm223_vm4, %v2384_v63, 0.0 }
 0x98b   :  { %2395 = vadd.xlane.f32.xlu1 %v2394_v41 }
 0x9d3   :  { %v2393_v1 = vpop.xlane.xlu0 %2392 }
 0x9d4   :  { %v2401_v39 = vmul.f32 0.03125, %v2393_v1 }
 0x9d5   :  { %v2390_v2 = vpop.xlane.xlu1 %2389 }
 0x9d6   :  { %v2405_v44 = vsub.f32 %v2383_v56, %v2401_v39  ;;  %v2400_v17 = vmul.f32 0.03125, %v2390_v2 }
 0x9d8   :  { %v2404_v38 = vsub.f32 %v2382_v59, %v2400_v17  ;;  %v2409_v5 = vmul.f32 %v2405_v44, %v2405_v44 }
 0x9da   :  { %v2415_v52 = vsel %vm223_vm4, %v2409_v5, 0.0  ;;  %v2408_v61 = vmul.f32 %v2404_v38, %v2404_v38 }
 0x9db   :  { %2416 = vadd.xlane.f32.xlu0 %v2415_v52 }
 0x9dc   :  { %v2412_v53 = vsel %vm223_vm4, %v2408_v61, 0.0 }
 0x9dd   :  { %2413 = vadd.xlane.f32.xlu1 %v2412_v53 }
 0xa12   :  { %v2399_v0 = vpop.xlane.xlu0 %2398 }
 0xa13   :  { %v2403_v10 = vmul.f32 0.03125, %v2399_v0 }
 0xa14   :  { %v2396_v14 = vpop.xlane.xlu1 %2395 }
 0xa15   :  { %v2407_v54 = vsub.f32 %v2385_v50, %v2403_v10  ;;  %v2402_v49 = vmul.f32 0.03125, %v2396_v14 }
 0xa17   :  { %v2406_v16 = vsub.f32 %v2384_v63, %v2402_v49  ;;  %v2411_v4 = vmul.f32 %v2407_v54, %v2407_v54 }
 0xa19   :  { %v2421_v23 = vsel %vm223_vm4, %v2411_v4, 0.0  ;;  %v2410_v15 = vmul.f32 %v2406_v16, %v2406_v16 }
 0xa1a   :  { %2422 = vadd.xlane.f32.xlu0 %v2421_v23 }
 0xa1b   :  { %v2418_v11 = vsel %vm223_vm4, %v2410_v15, 0.0 }
 0xa1c   :  { %2419 = vadd.xlane.f32.xlu1 %v2418_v11 }
 0xa64   :  { %v2417_v7 = vpop.xlane.xlu0 %2416 }
 0xa65   :  { %v2425_v29 = vmul.f32 0.03125, %v2417_v7 }
 0xa66   :  { %v2414_v31 = vpop.xlane.xlu1 %2413 }
 0xa67   :  { %v2429_v18 = vadd.f32 1e-05, %v2425_v29  ;;  %v2424_v33 = vmul.f32 0.03125, %v2414_v31 }
 0xa69   :  { %5629 = vrsqrt.f32 %v2429_v18  ;;  %v2428_v12 = vadd.f32 1e-05, %v2424_v33 }
 0xa6b   :  { %5631 = vrsqrt.f32 %v2428_v12 }
 0xa76   :  { %v5630_v19 = vpop.eup %5629 }
 0xa77   :  { %v2437_v22 = vmul.f32 %v5630_v19, %v2405_v44 }
 0xa78   :  { %v5632_v21 = vpop.eup %5631 }
 0xa79   :  { %v2436_v13 = vmul.f32 %v5632_v21, %v2404_v38  ;;  %v2445_v35 = vmul.f32 %v4879_v37, %v2437_v22 }
 0xa7b   :  { %v2444_v40 = vmul.f32 %v4879_v37, %v2436_v13  ;;  %v6326_v20 = vadd.f32 %v4880_v26, %v2445_v35 }
 0xa7d   :  { %v6324_v48 = vadd.f32 %v4880_v26, %v2444_v40 }
 0xa7f   :  { %5368 = vmatprep.mubr.msk.f32.mxu1 %vm223_vm4, %v6324_v48 }
 0xa80   :  { %5369 = vmatmul.mubr.msk.f32.vlgmr.msra.gmra.mxu1 %vm223_vm4, %v6326_v20 }
 0xaa3   :  { %v2423_v58 = vpop.xlane.xlu0 %2422 }
 0xaa4   :  { %v2427_v24 = vmul.f32 0.03125, %v2423_v58 }
 0xaa5   :  { %v2420_v25 = vpop.xlane.xlu1 %2419 }
 0xaa6   :  { %v2431_v42 = vadd.f32 1e-05, %v2427_v24  ;;  %v2426_v32 = vmul.f32 0.03125, %v2420_v25 }
 0xaa8   :  { %5633 = vrsqrt.f32 %v2431_v42  ;;  %v2430_v30 = vadd.f32 1e-05, %v2426_v32 }
 0xaaa   :  { %5635 = vrsqrt.f32 %v2430_v30 }
 0xab5   :  { %v5634_v45 = vpop.eup %5633 }
 0xab6   :  { %v2439_v51 = vmul.f32 %v5634_v45, %v2407_v54 }
 0xab7   :  { %v5636_v55 = vpop.eup %5635 }
 0xab8   :  { %v2438_v56 = vmul.f32 %v5636_v55, %v2406_v16  ;;  %v2447_v62 = vmul.f32 %v4879_v37, %v2439_v51 }
 0xaba   :  { %v2446_v57 = vmul.f32 %v4879_v37, %v2438_v56  ;;  %v6334_v46 = vadd.f32 %v4880_v26, %v2447_v62 }
 0xabc   :  { %v6332_v59 = vadd.f32 %v4880_v26, %v2446_v57 }
 0xabe   :  { %5371 = vmatprep.mubr.msk.f32.mxu1 %vm223_vm4, %v6332_v59 }
 0xabf   :  { %5372 = vmatmul.mubr.msk.f32.gmra.mxu1 %vm223_vm4, %v6334_v46 }
 0xb40   :  { %v5370_v34 = vpop.f32.mrf.mxu1 }
 0xb41   :  { %v2550_v50 = vadd.f32 %v5370_v34, %v2465_v36 }
 0xb42   :  { %v2544_v47 = vpop.f32.mrf.mxu1 }
 0xb43   :  { %v2545_v60 = vadd.f32 %v2544_v47, %v2465_v36  ;;  %2569 = vrot.lane.b32.xlu1 %v2550_v50, %s5718_s22 }
 0xb45   :  { %2567 = vrot.lane.b32.xlu0 %v2545_v60, %s5718_s22  ;;  %5378 = vmatprep.mubr.msk.f32.mxu1 %vm353_vm5, %v2545_v60 }
 0xb47   :  { %2577 = vrot.lane.b32.xlu1 %v2550_v50, %s5717_s21 }
 0xb49   :  { %2575 = vrot.lane.b32.xlu0 %v2545_v60, %s5717_s21 }
 0xb4b   :  { %2585 = vrot.lane.b32.xlu1 %v2550_v50, %s5719_s23 }
 0xb4f   :  { %2583 = vrot.lane.b32.xlu1 %v2545_v60, %s5719_s23 }
 0xb7f   :  { %v5373_v27 = vpop.f32.mrf.mxu1 }
 0xb80   :  { %v6352_v28 = vadd.f32 %v5373_v27, %v2465_v36 }
 0xb81   :  { %v2554_v63 = vpop.f32.mrf.mxu1 }
 0xb82   :  { %v6354_v41 = vadd.f32 %v2554_v63, %v2465_v36  ;;  %2573 = vrot.lane.b32.xlu0 %v6352_v28, %s5718_s22 }
 0xb84   :  { %2571 = vrot.lane.b32.xlu1 %v6354_v41, %s5718_s22 }
 0xb86   :  { %2581 = vrot.lane.b32.xlu0 %v6352_v28, %s5717_s21 }
 0xb88   :  { %2589 = vrot.lane.b32.xlu1 %v6352_v28, %s5719_s23 }
 0xb8a   :  { %2579 = vrot.lane.b32.xlu0 %v6354_v41, %s5717_s21 }
 0xb8c   :  { %2587 = vrot.lane.b32.xlu1 %v6354_v41, %s5719_s23 }
 0xb8e   :  { %2593 = vrot.lane.b32.xlu0 %v2550_v50, %s5720_s24 }
 0xb92   :  { %2591 = vrot.lane.b32.xlu0 %v2545_v60, %s5720_s24 }
 0xbb5   :  { %v2570_v1 = vpop.permute.xlu1 %2569 }
 0xbb6   :  { %2680 = vrot.lane.b32.xlu1 %v2570_v1, %s5720_s24 }
 0xbb7   :  { %v2568_v39 = vpop.permute.xlu0 %2567 }
 0xbb8   :  { %5385 = vmatprep.mubr.msk.f32.mxu0 %vm353_vm5, %v2568_v39 }
 0xbb9   :  { %v2578_v2 = vpop.permute.xlu1 %2577 }
 0xbba   :  { %2678 = vrot.lane.b32.xlu1 %v2568_v39, %s5720_s24  ;;  %2767 = vrot.lane.b32.xlu0 %v2578_v2, %s5720_s24 }
 0xbbb   :  { %v2576_v44 = vpop.permute.xlu0 %2575 }
 0xbbd   :  { %v6374_v17 = vpop.permute.xlu1 %2585 }
 0xbbe   :  { %2765 = vrot.lane.b32.xlu0 %v2576_v44, %s5720_s24  ;;  %2854 = vrot.lane.b32.xlu1 %v6374_v17, %s5720_s24 }
 0xbc1   :  { %v2584_v38 = vpop.permute.xlu1 %2583 }
 0xbc2   :  { %2941 = vrot.lane.b32.xlu0 %v6352_v28, %s5720_s24  ;;  %2852 = vrot.lane.b32.xlu1 %v2584_v38, %s5720_s24 }
 0xbc6   :  { %2939 = vrot.lane.b32.xlu0 %v6354_v41, %s5720_s24 }
 0xbf4   :  { %v6384_v5 = vpop.permute.xlu0 %2573 }
 0xbf5   :  { %3028 = vrot.lane.b32.xlu1 %v6384_v5, %s5720_s24 }
 0xbf6   :  { %v6388_v52 = vpop.permute.xlu1 %2571 }
 0xbf8   :  { %v6390_v61 = vpop.permute.xlu0 %2581 }
 0xbf9   :  { %3115 = vrot.lane.b32.xlu0 %v6390_v61, %s5720_s24  ;;  %3026 = vrot.lane.b32.xlu1 %v6388_v52, %s5720_s24 }
 0xbfa   :  { %v6396_v53 = vpop.permute.xlu1 %2589 }
 0xbfc   :  { %v6398_v9 = vpop.permute.xlu0 %2579 }
 0xbfd   :  { %3113 = vrot.lane.b32.xlu0 %v6398_v9, %s5720_s24  ;;  %3202 = vrot.lane.b32.xlu1 %v6396_v53, %s5720_s24 }
 0xbfe   :  { %v6404_v8 = vpop.permute.xlu1 %2587 }
 0xc00   :  { %v2594_v43 = vpop.permute.xlu0 %2593 }
 0xc01   :  { %5374 = vmatprep.subr.msk.mxu1 %vm353_vm5, %v2594_v43  ;;  %3463 = vrot.lane.b32.xlu0 %v2545_v60, %s5721_s25 }
 0xc02   :  { %3200 = vrot.lane.b32.xlu1 %v6404_v8, %s5720_s24  ;;  %5375 = vmatpush3.xpose.msk.msra.mxu1 %vm353_vm5, %v2594_v43 }
 0xc04   :  { %v2592_v3 = vpop.permute.xlu0 %2591 }
 0xc05   :  { %5376 = vmatprep.subr.msk.mxu1 %vm353_vm5, %v2592_v3  ;;  %3639 = vrot.lane.b32.xlu0 %v2578_v2, %s5721_s25 }
 0xc06   :  { %3465 = vrot.lane.b32.xlu1 %v2550_v50, %s5721_s25  ;;  %5377 = vmatpush3.xpose.msk.msra.mxu1 %vm353_vm5, %v2592_v3 }
 0xc09   :  { %5379 = vmatmul.mubr.msk.f32.vlgmr.msra.gmra.mxu1 %vm353_vm5, %v2550_v50  ;;  %3637 = vrot.lane.b32.xlu0 %v2576_v44, %s5721_s25 }
 0xc0a   :  { %3552 = vrot.lane.b32.xlu1 %v2570_v1, %s5721_s25  ;;  %5392 = vmatprep.mubr.msk.f32.mxu1 %vm353_vm5, %v2576_v44 }
 0xc0d   :  { %3813 = vrot.lane.b32.xlu0 %v6352_v28, %s5721_s25 }
 0xc0e   :  { %3550 = vrot.lane.b32.xlu1 %v2568_v39, %s5721_s25 }
 0xc12   :  { %3726 = vrot.lane.b32.xlu1 %v6374_v17, %s5721_s25 }
 0xc16   :  { %3724 = vrot.lane.b32.xlu1 %v2584_v38, %s5721_s25 }
 0xc1a   :  { %3900 = vrot.lane.b32.xlu1 %v6384_v5, %s5721_s25 }
 0xc28   :  { %v2681_v0 = vpop.permute.xlu1 %2680 }
 0xc29   :  { %5381 = vmatprep.subr.msk.mxu0 %vm353_vm5, %v2681_v0 }
 0xc2a   :  { %5382 = vmatpush3.xpose.msk.msra.mxu0 %vm353_vm5, %v2681_v0 }
 0xc2c   :  { %v2768_v10 = vpop.permute.xlu0 %2767  ;;  %v2679_v14 = vpop.permute.xlu1 %2678 }
 0xc2d   :  { %5383 = vmatprep.subr.msk.mxu0 %vm353_vm5, %v2679_v14  ;;  %5388 = vmatprep.subr.msk.mxu1 %vm353_vm5, %v2768_v10 }
 0xc2e   :  { %5384 = vmatpush3.xpose.msk.msra.mxu0 %vm353_vm5, %v2679_v14  ;;  %5389 = vmatpush3.xpose.msk.msra.mxu1 %vm353_vm5, %v2768_v10 }
 0xc30   :  { %v2766_v54 = vpop.permute.xlu0 %2765  ;;  %v2855_v49 = vpop.permute.xlu1 %2854 }
 0xc31   :  { %5386 = vmatmul.mubr.msk.f32.vlgmr.msra.gmra.mxu0 %vm353_vm5, %v2570_v1  ;;  %5390 = vmatprep.subr.msk.mxu1 %vm353_vm5, %v2766_v54 }
 0xc32   :  { %5395 = vmatprep.subr.msk.mxu0 %vm353_vm5, %v2855_v49  ;;  %5391 = vmatpush3.xpose.msk.msra.mxu1 %vm353_vm5, %v2766_v54 }
 0xc33   :  { %5396 = vmatpush3.xpose.msk.msra.mxu0 %vm353_vm5, %v2855_v49  ;;  %5399 = vmatprep.mubr.msk.f32.mxu0 %vm353_vm5, %v2584_v38 }
 0xc34   :  { %v2942_v16 = vpop.permute.xlu0 %2941  ;;  %v2853_v4 = vpop.permute.xlu1 %2852 }
 0xc35   :  { %5393 = vmatmul.mubr.msk.f32.vlgmr.msra.gmra.mxu1 %vm353_vm5, %v2578_v2  ;;  %5397 = vmatprep.subr.msk.mxu0 %vm353_vm5, %v2853_v4 }
 0xc36   :  { %5402 = vmatprep.subr.msk.mxu1 %vm353_vm5, %v2942_v16  ;;  %5406 = vmatprep.mubr.msk.f32.mxu1 %vm353_vm5, %v6354_v41 }
 0xc37   :  { %5398 = vmatpush3.xpose.msk.msra.mxu0 %vm353_vm5, %v2853_v4  ;;  %5403 = vmatpush3.xpose.msk.msra.mxu1 %vm353_vm5, %v2942_v16 }
 0xc38   :  { %v2940_v23 = vpop.permute.xlu0 %2939 }
 0xc39   :  { %5404 = vmatprep.subr.msk.mxu1 %vm353_vm5, %v2940_v23 }
 0xc3a   :  { %5400 = vmatmul.mubr.msk.f32.vlgmr.msra.gmra.mxu0 %vm353_vm5, %v6374_v17 }
 0xc3b   :  { %5405 = vmatpush3.xpose.msk.msra.mxu1 %vm353_vm5, %v2940_v23  ;;  %5413 = vmatprep.mubr.msk.f32.mxu0 %vm353_vm5, %v6388_v52 }
 0xc3e   :  { %5407 = vmatmul.mubr.msk.f32.vlgmr.msra.gmra.mxu1 %vm353_vm5, %v6352_v28 }
 0xc3f   :  { %5420 = vmatprep.mubr.msk.f32.mxu1 %vm353_vm5, %v6398_v9 }
 0xc67   :  { %v3029_v15 = vpop.permute.xlu1 %3028 }
 0xc68   :  { %5409 = vmatprep.subr.msk.mxu0 %vm353_vm5, %v3029_v15 }
 0xc69   :  { %5410 = vmatpush3.xpose.msk.msra.mxu0 %vm353_vm5, %v3029_v15 }
 0xc6b   :  { %v3116_v11 = vpop.permute.xlu0 %3115  ;;  %v3027_v7 = vpop.permute.xlu1 %3026 }
 0xc6c   :  { %5411 = vmatprep.subr.msk.mxu0 %vm353_vm5, %v3027_v7  ;;  %5416 = vmatprep.subr.msk.mxu1 %vm353_vm5, %v3116_v11 }
 0xc6d   :  { %5412 = vmatpush3.xpose.msk.msra.mxu0 %vm353_vm5, %v3027_v7  ;;  %5417 = vmatpush3.xpose.msk.msra.mxu1 %vm353_vm5, %v3116_v11 }
 0xc6f   :  { %v3114_v29 = vpop.permute.xlu0 %3113  ;;  %v3203_v31 = vpop.permute.xlu1 %3202 }
 0xc70   :  { %5414 = vmatmul.mubr.msk.f32.vlgmr.msra.gmra.mxu0 %vm353_vm5, %v6384_v5  ;;  %5418 = vmatprep.subr.msk.mxu1 %vm353_vm5, %v3114_v29 }
 0xc71   :  { %5423 = vmatprep.subr.msk.mxu0 %vm353_vm5, %v3203_v31  ;;  %5419 = vmatpush3.xpose.msk.msra.mxu1 %vm353_vm5, %v3114_v29 }
 0xc72   :  { %5424 = vmatpush3.xpose.msk.msra.mxu0 %vm353_vm5, %v3203_v31  ;;  %5427 = vmatprep.mubr.msk.f32.mxu0 %vm353_vm5, %v6404_v8 }
 0xc73   :  { %v3464_v18 = vpop.permute.xlu0 %3463 }
 0xc74   :  { %v3201_v33 = vpop.permute.xlu1 %3200  ;;  %5421 = vmatmul.mubr.msk.f32.vlgmr.msra.gmra.mxu1 %vm353_vm5, %v6390_v61 }
 0xc75   :  { %5425 = vmatprep.subr.msk.mxu0 %vm353_vm5, %v3201_v33 }
 0xc76   :  { %5426 = vmatpush3.xpose.msk.msra.mxu0 %vm353_vm5, %v3201_v33 }
 0xc77   :  { %v3640_v12 = vpop.permute.xlu0 %3639 }
 0xc78   :  { %v3466_v19 = vpop.permute.xlu1 %3465  ;;  %5444 = vmatprep.subr.mxu0 %v3640_v12 }
 0xc79   :  { %5428 = vmatmul.mubr.msk.f32.vlgmr.msra.gmra.mxu0 %vm353_vm5, %v6396_v53  ;;  %5430 = vmatprep.subr.mxu1 %v3466_v19 }
 0xc7a   :  { %5431 = vmatpush3.msra.mxu1 %v3466_v19  ;;  %5445 = vmatpush3.msra.mxu0 %v3640_v12 }
 0xc7b   :  { %5432 = vmatprep.subr.mxu1 %v3464_v18  ;;  %v3638_v22 = vpop.permute.xlu0 %3637 }
 0xc7c   :  { %5433 = vmatpush3.msra.mxu1 %v3464_v18  ;;  %v6476_v37 = vpop.permute.xlu1 %3552  ;;  %5446 = vmatprep.subr.mxu0 %v3638_v22 }
 0xc7d   :  { %5437 = vmatprep.subr.mxu1 %v6476_v37  ;;  %5447 = vmatpush3.msra.mxu0 %v3638_v22 }
 0xc7f   :  { %v6479_v21 = vpop.permute.xlu0 %3813 }
 0xc80   :  { %5458 = vmatprep.subr.mxu0 %v6479_v21  ;;  %v6530_v38 = vpop.permute.xlu1 %3550 }
 0xc84   :  { %v6532_v5 = vpop.permute.xlu1 %3726 }
 0xc88   :  { %v6536_v43 = vpop.permute.xlu1 %3724 }
 0xc8c   :  { %v6540_v3 = vpop.permute.xlu1 %3900 }
 0xcc9   :  { %v5380_v13 = vpop.f32.mrf.mxu1 }
 0xcca   :  { %v3290_v35 = vsel %vm1046_vm6, %v5380_v13, -inf }
 0xccb   :  { %v6483_v26 = vpop.f32.mrf.mxu1  ;;  %3291 = vmax.xlane.f32.xlu1 %v3290_v35 }
 0xccc   :  { %v3287_v40 = vsel %vm1046_vm6, %v6483_v26, -inf }
 0xccd   :  { %3288 = vmax.xlane.f32.xlu0 %v3287_v40 }
 0xcf1   :  { %v5387_v58 = vpop.f32.mrf.mxu0 }
 0xcf2   :  { %v3296_v24 = vsel %vm1046_vm6, %v5387_v58, -inf }
 0xcf3   :  { %3297 = vmax.xlane.f32.xlu0 %v3296_v24  ;;  %v6489_v32 = vpop.f32.mrf.mxu0 }
 0xcf4   :  { %v3293_v55 = vsel %vm1046_vm6, %v6489_v32, -inf }
 0xcf5   :  { %v5394_v25 = vpop.f32.mrf.mxu1 }
 0xcf6   :  { %v3302_v42 = vsel %vm1046_vm6, %v5394_v25, -inf }
 0xcf7   :  { %v6491_v30 = vpop.f32.mrf.mxu1  ;;  %3303 = vmax.xlane.f32.xlu0 %v3302_v42 }
 0xcf8   :  { %v3299_v45 = vsel %vm1046_vm6, %v6491_v30, -inf }
 0xcf9   :  { %3300 = vmax.xlane.f32.xlu1 %v3299_v45 }
 0xcfa   :  { %v5401_v51 = vpop.f32.mrf.mxu0 }
 0xcfb   :  { %3294 = vmax.xlane.f32.xlu0 %v3293_v55  ;;  %v3308_v6 = vsel %vm1046_vm6, %v5401_v51, -inf }
 0xcfc   :  { %v6497_v56 = vpop.f32.mrf.mxu0 }
 0xcfd   :  { %v3305_v62 = vsel %vm1046_vm6, %v6497_v56, -inf }
 0xcfe   :  { %v6501_v57 = vpop.f32.mrf.mxu1  ;;  %3306 = vmax.xlane.f32.xlu1 %v3305_v62 }
 0xcff   :  { %3309 = vmax.xlane.f32.xlu0 %v3308_v6  ;;  %v3314_v50 = vsel %vm1046_vm6, %v6501_v57, -inf }
 0xd00   :  { %v6504_v36 = vpop.f32.mrf.mxu1 }
 0xd01   :  { %v3311_v34 = vsel %vm1046_vm6, %v6504_v36, -inf }
 0xd02   :  { %3312 = vmax.xlane.f32.xlu1 %v3311_v34 }
 0xd03   :  { %3315 = vmax.xlane.f32.xlu0 %v3314_v50 }
 0xd30   :  { %v6510_v47 = vpop.f32.mrf.mxu0 }
 0xd31   :  { %v3320_v60 = vsel %vm1046_vm6, %v6510_v47, -inf }
 0xd32   :  { %3321 = vmax.xlane.f32.xlu0 %v3320_v60  ;;  %v6514_v27 = vpop.f32.mrf.mxu0 }
 0xd33   :  { %v3317_v28 = vsel %vm1046_vm6, %v6514_v27, -inf }
 0xd34   :  { %v6518_v63 = vpop.f32.mrf.mxu1  ;;  %3318 = vmax.xlane.f32.xlu1 %v3317_v28 }
 0xd35   :  { %v3326_v1 = vsel %vm1046_vm6, %v6518_v63, -inf }
 0xd36   :  { %v6522_v39 = vpop.f32.mrf.mxu1  ;;  %3327 = vmax.xlane.f32.xlu0 %v3326_v1 }
 0xd37   :  { %v3323_v2 = vsel %vm1046_vm6, %v6522_v39, -inf }
 0xd38   :  { %3324 = vmax.xlane.f32.xlu1 %v3323_v2 }
 0xd39   :  { %v6526_v44 = vpop.f32.mrf.mxu0 }
 0xd3a   :  { %v3332_v17 = vsel %vm1046_vm6, %v6526_v44, -inf }
 0xd3b   :  { %3333 = vmax.xlane.f32.xlu0 %v3332_v17  ;;  %v6544_v54 = vpop.f32.mrf.mxu0 }
 0xd3c   :  { %v3329_v49 = vsel %vm1046_vm6, %v6544_v54, -inf }
 0xd49   :  { %3898 = vrot.lane.b32.xlu1 %v6388_v52, %s5721_s25 }
 0xd51   :  { %3811 = vrot.lane.b32.xlu0 %v6354_v41, %s5721_s25 }
 0xd54   :  { %v3292_v0 = vpop.xlane.xlu1 %3291 }
 0xd55   :  { %3987 = vrot.lane.b32.xlu0 %v6390_v61, %s5721_s25  ;;  %v3336_v10 = vsub.f32 %v5380_v13, %v3292_v0 }
 0xd56   :  { %v3289_v16 = vpop.xlane.xlu0 %3288 }
 0xd57   :  { %v3353_v14 = vmul.f32 1.442695, %v3336_v10  ;;  %v3335_v31 = vsub.f32 %v6483_v26, %v3289_v16 }
 0xd59   :  { %5637 = vpow2.f32 %v3353_v14  ;;  %v3351_v22 = vmul.f32 1.442695, %v3335_v31 }
 0xd66   :  { %v6548_v52 = vpop.eup %5637 }
 0xd67   :  { %v3386_v41 = vsel %vm1046_vm6, %v6548_v52, 0.0 }
 0xd6d   :  { %3330 = vmax.xlane.f32.xlu1 %v3329_v49 }
 0xd74   :  { %3387 = vadd.xlane.f32.xlu0 %v3386_v41 }
 0xd7c   :  { %v3298_v4 = vpop.xlane.xlu0 %3297 }
 0xd7d   :  { %v3338_v23 = vsub.f32 %v5387_v58, %v3298_v4 }
 0xd7e   :  { %4074 = vrot.lane.b32.xlu1 %v6396_v53, %s5721_s25 }
 0xd7f   :  { %v3357_v61 = vmul.f32 1.442695, %v3338_v23 }
 0xd80   :  { %v3304_v15 = vpop.xlane.xlu0 %3303 }
 0xd81   :  { %5639 = vpow2.f32 %v3357_v61  ;;  %v3340_v11 = vsub.f32 %v5394_v25, %v3304_v15 }
 0xd82   :  { %v3301_v33 = vpop.xlane.xlu1 %3300 }
 0xd83   :  { %v3361_v7 = vmul.f32 1.442695, %v3340_v11  ;;  %v3339_v26 = vsub.f32 %v6491_v30, %v3301_v33 }
 0xd84   :  { %v3295_v29 = vpop.xlane.xlu0 %3294 }
 0xd85   :  { %5641 = vpow2.f32 %v3361_v7  ;;  %v3337_v13 = vsub.f32 %v6489_v32, %v3295_v29 }
 0xd87   :  { %v3307_v58 = vpop.xlane.xlu1 %3306  ;;  %v3355_v42 = vmul.f32 1.442695, %v3337_v13 }
 0xd88   :  { %v3310_v18 = vpop.xlane.xlu0 %3309  ;;  %v3341_v55 = vsub.f32 %v6497_v56, %v3307_v58 }
 0xd89   :  { %v3342_v12 = vsub.f32 %v5401_v51, %v3310_v18  ;;  %v3359_v51 = vmul.f32 1.442695, %v3339_v26 }
 0xd8b   :  { %v3365_v19 = vmul.f32 1.442695, %v3342_v12  ;;  %v3313_v62 = vpop.xlane.xlu1 %3312 }
 0xd8c   :  { %v3316_v35 = vpop.xlane.xlu0 %3315  ;;  %v3343_v6 = vsub.f32 %v6504_v36, %v3313_v62 }
 0xd8d   :  { %5643 = vpow2.f32 %v3365_v19  ;;  %v3344_v53 = vsub.f32 %v6501_v57, %v3316_v35  ;;  %v3363_v57 = vmul.f32 1.442695, %v3341_v55 }
 0xd8e   :  { %v6557_v40 = vpop.eup %5639  ;;  %5645 = vpow2.f32 %v3351_v22  ;;  %v3367_v50 = vmul.f32 1.442695, %v3343_v6 }
 0xd8f   :  { %v3369_v24 = vmul.f32 1.442695, %v3344_v53  ;;  %v3392_v25 = vsel %vm1046_vm6, %v6557_v40, 0.0 }
 0xd90   :  { %3393 = vadd.xlane.f32.xlu0 %v3392_v25 }
 0xd91   :  { %5647 = vpow2.f32 %v3369_v24 }
 0xd92   :  { %v6562_v45 = vpop.eup %5641  ;;  %5649 = vpow2.f32 %v3355_v42 }
 0xd93   :  { %v3398_v32 = vsel %vm1046_vm6, %v6562_v45, 0.0  ;;  %5651 = vpow2.f32 %v3359_v51 }
 0xd94   :  { %3399 = vadd.xlane.f32.xlu0 %v3398_v32  ;;  %5653 = vpow2.f32 %v3363_v57 }
 0xd95   :  { %5655 = vpow2.f32 %v3367_v50 }
 0xd9a   :  { %v6568_v34 = vpop.eup %5643 }
 0xd9b   :  { %v3404_v30 = vsel %vm1046_vm6, %v6568_v34, 0.0  ;;  %v6572_v60 = vpop.eup %5645 }
 0xd9c   :  { %3405 = vadd.xlane.f32.xlu0 %v3404_v30  ;;  %v3383_v36 = vsel %vm1046_vm6, %v6572_v60, 0.0 }
 0xd9e   :  { %v6574_v28 = vpop.eup %5647 }
 0xd9f   :  { %v3410_v56 = vsel %vm1046_vm6, %v6574_v28, 0.0  ;;  %v6580_v1 = vpop.eup %5649 }
 0xda0   :  { %3411 = vadd.xlane.f32.xlu0 %v3410_v56  ;;  %v3389_v2 = vsel %vm1046_vm6, %v6580_v1, 0.0  ;;  %v6584_v17 = vpop.eup %5651 }
 0xda1   :  { %v3395_v0 = vsel %vm1046_vm6, %v6584_v17, 0.0  ;;  %v6588_v10 = vpop.eup %5653 }
 0xda2   :  { %3384 = vadd.xlane.f32.xlu1 %v3383_v36  ;;  %v3401_v14 = vsel %vm1046_vm6, %v6588_v10, 0.0  ;;  %v6592_v49 = vpop.eup %5655 }
 0xda3   :  { %v3407_v41 = vsel %vm1046_vm6, %v6592_v49, 0.0 }
 0xda6   :  { %3390 = vadd.xlane.f32.xlu1 %v3389_v2 }
 0xdaa   :  { %3396 = vadd.xlane.f32.xlu1 %v3395_v0 }
 0xdae   :  { %3402 = vadd.xlane.f32.xlu1 %v3401_v14 }
 0xdb2   :  { %3408 = vadd.xlane.f32.xlu1 %v3407_v41 }
 0xdbb   :  { %v3322_v16 = vpop.xlane.xlu0 %3321 }
 0xdbc   :  { %v3346_v4 = vsub.f32 %v6510_v47, %v3322_v16 }
 0xdbd   :  { %v3319_v23 = vpop.xlane.xlu1 %3318 }
 0xdbe   :  { %v3373_v61 = vmul.f32 1.442695, %v3346_v4  ;;  %v3345_v15 = vsub.f32 %v6514_v27, %v3319_v23 }
 0xdbf   :  { %v3328_v11 = vpop.xlane.xlu0 %3327 }
 0xdc0   :  { %5657 = vpow2.f32 %v3373_v61  ;;  %v3371_v7 = vmul.f32 1.442695, %v3345_v15  ;;  %v3348_v29 = vsub.f32 %v6518_v63, %v3328_v11 }
 0xdc1   :  { %v3325_v31 = vpop.xlane.xlu1 %3324 }
 0xdc2   :  { %5659 = vpow2.f32 %v3371_v7  ;;  %v3377_v18 = vmul.f32 1.442695, %v3348_v29  ;;  %v3347_v33 = vsub.f32 %v6522_v39, %v3325_v31 }
 0xdc4   :  { %5661 = vpow2.f32 %v3377_v18  ;;  %v3375_v12 = vmul.f32 1.442695, %v3347_v33  ;;  %v3334_v19 = vpop.xlane.xlu0 %3333 }
 0xdc5   :  { %v3350_v22 = vsub.f32 %v6526_v44, %v3334_v19  ;;  %v6623_v26 = vpop.permute.xlu1 %3898 }
 0xdc6   :  { %5663 = vpow2.f32 %v3375_v12 }
 0xdc7   :  { %v3381_v47 = vmul.f32 1.442695, %v3350_v22 }
 0xdc8   :  { %v3812_v57 = vpop.permute.xlu0 %3811 }
 0xdc9   :  { %5665 = vpow2.f32 %v3381_v47 }
 0xdcc   :  { %v6632_v6 = vpop.permute.xlu0 %3987 }
 0xdcd   :  { %v6601_v13 = vpop.eup %5657 }
 0xdce   :  { %v3416_v27 = vsel %vm1046_vm6, %v6601_v13, 0.0 }
 0xdcf   :  { %v6605_v35 = vpop.eup %5659  ;;  %3417 = vadd.xlane.f32.xlu0 %v3416_v27 }
 0xdd0   :  { %v3413_v63 = vsel %vm1046_vm6, %v6605_v35, 0.0 }
 0xdd1   :  { %v6609_v39 = vpop.eup %5661  ;;  %3414 = vadd.xlane.f32.xlu1 %v3413_v63 }
 0xdd2   :  { %v3422_v44 = vsel %vm1046_vm6, %v6609_v39, 0.0 }
 0xdd3   :  { %v6613_v53 = vpop.eup %5663  ;;  %3423 = vadd.xlane.f32.xlu0 %v3422_v44 }
 0xdd4   :  { %v3419_v58 = vsel %vm1046_vm6, %v6613_v53, 0.0 }
 0xdd5   :  { %3420 = vadd.xlane.f32.xlu1 %v3419_v58 }
 0xdd6   :  { %v6617_v24 = vpop.eup %5665 }
 0xdd7   :  { %v3428_v25 = vsel %vm1046_vm6, %v6617_v24, 0.0 }
 0xdd8   :  { %3429 = vadd.xlane.f32.xlu0 %v3428_v25 }
 0xdee   :  { %3985 = vrot.lane.b32.xlu0 %v6398_v9, %s5721_s25 }
 0xdf6   :  { %v3331_v42 = vpop.xlane.xlu1 %3330 }
 0xdf7   :  { %v3349_v32 = vsub.f32 %v6544_v54, %v3331_v42 }
 0xdf9   :  { %v3379_v51 = vmul.f32 1.442695, %v3349_v32 }
 0xdfa   :  { %v6634_v30 = vpop.permute.xlu1 %4074 }
 0xdfb   :  { %5667 = vpow2.f32 %v3379_v51 }
 0xdfd   :  { %v3388_v9 = vpop.xlane.xlu0 %3387 }
 0xdfe   :  { %5669 = vrcp.f32 %v3388_v9 }
 0xe08   :  { %v6626_v55 = vpop.eup %5667 }
 0xe09   :  { %v3425_v62 = vsel %vm1046_vm6, %v6626_v55, 0.0 }
 0xe0a   :  { %3426 = vadd.xlane.f32.xlu1 %v3425_v62 }
 0xe19   :  { %v3394_v50 = vpop.xlane.xlu0 %3393 }
 0xe1b   :  { %4072 = vrot.lane.b32.xlu1 %v6404_v8, %s5721_s25  ;;  %v5670_v8 = vpop.eup %5669 }
 0xe1c   :  { %v3434_v61 = vmul.f32 %v5670_v8, %v6548_v52 }
 0xe1d   :  { %v3400_v56 = vpop.xlane.xlu0 %3399 }
 0xe25   :  { %v3406_v2 = vpop.xlane.xlu0 %3405 }
 0xe29   :  { %v3412_v41 = vpop.xlane.xlu0 %3411 }
 0xe2b   :  { %v3385_v54 = vpop.xlane.xlu1 %3384 }
 0xe2c   :  { %5671 = vrcp.f32 %v3385_v54 }
 0xe2d   :  { %5673 = vrcp.f32 %v3394_v50 }
 0xe2f   :  { %v3391_v36 = vpop.xlane.xlu1 %3390 }
 0xe30   :  { %5675 = vrcp.f32 %v3391_v36 }
 0xe31   :  { %5677 = vrcp.f32 %v3400_v56 }
 0xe33   :  { %v3397_v0 = vpop.xlane.xlu1 %3396 }
 0xe34   :  { %5679 = vrcp.f32 %v3397_v0 }
 0xe35   :  { %5681 = vrcp.f32 %v3406_v2 }
 0xe37   :  { %v3403_v14 = vpop.xlane.xlu1 %3402 }
 0xe38   :  { %5683 = vrcp.f32 %v3403_v14 }
 0xe39   :  { %v5672_v16 = vpop.eup %5671  ;;  %5685 = vrcp.f32 %v3412_v41 }
 0xe3a   :  { %v3432_v4 = vmul.f32 %v5672_v16, %v6572_v60  ;;  %v5674_v15 = vpop.eup %5673 }
 0xe3b   :  { %v3409_v23 = vpop.xlane.xlu1 %3408  ;;  %v3438_v29 = vmul.f32 %v5674_v15, %v6557_v40 }
 0xe3c   :  { %5687 = vrcp.f32 %v3409_v23  ;;  %5434 = vmatprep.mubr.msk.f32.mxu1 %vm1046_vm6, %v3432_v4 }
 0xe3d   :  { %v5676_v11 = vpop.eup %5675  ;;  %5435 = vmatmul.mubr.msk.f32.vlgmr.msra.gmra.mxu1 %vm1046_vm6, %v3434_v61 }
 0xe3e   :  { %5438 = vmatpush3.msra.mxu1 %v6476_v37  ;;  %v3436_v7 = vmul.f32 %v5676_v11, %v6580_v1  ;;  %v5678_v60 = vpop.eup %5677 }
 0xe3f   :  { %5439 = vmatprep.subr.mxu1 %v6530_v38  ;;  %v3442_v1 = vmul.f32 %v5678_v60, %v6562_v45 }
 0xe40   :  { %5440 = vmatpush3.msra.mxu1 %v6530_v38  ;;  %5441 = vmatprep.mubr.msk.f32.mxu1 %vm1046_vm6, %v3436_v7 }
 0xe41   :  { %v5680_v52 = vpop.eup %5679  ;;  %5451 = vmatprep.subr.mxu1 %v6532_v5  ;;  %5442 = vmatmul.mubr.msk.f32.vlgmr.msra.gmra.mxu1 %vm1046_vm6, %v3438_v29 }
 0xe42   :  { %5452 = vmatpush3.msra.mxu1 %v6532_v5  ;;  %v3440_v37 = vmul.f32 %v5680_v52, %v6584_v17  ;;  %v5682_v31 = vpop.eup %5681 }
 0xe43   :  { %5453 = vmatprep.subr.mxu1 %v6536_v43  ;;  %v3446_v40 = vmul.f32 %v5682_v31, %v6568_v34 }
 0xe44   :  { %5454 = vmatpush3.msra.mxu1 %v6536_v43  ;;  %5448 = vmatprep.mubr.msk.f32.mxu0 %vm1046_vm6, %v3440_v37 }
 0xe45   :  { %v5684_v38 = vpop.eup %5683  ;;  %5465 = vmatprep.subr.mxu1 %v6540_v3  ;;  %5449 = vmatmul.mubr.msk.f32.vlgmr.msra.gmra.mxu0 %vm1046_vm6, %v3442_v1 }
 0xe46   :  { %5459 = vmatpush3.msra.mxu0 %v6479_v21  ;;  %v3444_v5 = vmul.f32 %v5684_v38, %v6588_v10  ;;  %v5686_v17 = vpop.eup %5685 }
 0xe47   :  { %5460 = vmatprep.subr.mxu0 %v3812_v57  ;;  %v3450_v21 = vmul.f32 %v5686_v17, %v6574_v28 }
 0xe48   :  { %5461 = vmatpush3.msra.mxu0 %v3812_v57  ;;  %5455 = vmatprep.mubr.msk.f32.mxu1 %vm1046_vm6, %v3444_v5 }
 0xe49   :  { %v5688_v45 = vpop.eup %5687  ;;  %5472 = vmatprep.subr.mxu0 %v6632_v6  ;;  %5456 = vmatmul.mubr.msk.f32.vlgmr.msra.gmra.mxu1 %vm1046_vm6, %v3446_v40 }
 0xe4a   :  { %5466 = vmatpush3.msra.mxu1 %v6540_v3  ;;  %v3448_v43 = vmul.f32 %v5688_v45, %v6592_v49 }
 0xe4b   :  { %5467 = vmatprep.subr.mxu1 %v6623_v26 }
 0xe4c   :  { %5468 = vmatpush3.msra.mxu1 %v6623_v26  ;;  %5462 = vmatprep.mubr.msk.f32.mxu0 %vm1046_vm6, %v3448_v43 }
 0xe4d   :  { %5479 = vmatprep.subr.mxu1 %v6634_v30  ;;  %5463 = vmatmul.mubr.msk.f32.vlgmr.msra.gmra.mxu0 %vm1046_vm6, %v3450_v21 }
 0xe4e   :  { %5473 = vmatpush3.msra.mxu0 %v6632_v6 }
 0xe58   :  { %v3418_v34 = vpop.xlane.xlu0 %3417 }
 0xe59   :  { %5689 = vrcp.f32 %v3418_v34 }
 0xe5a   :  { %v3415_v10 = vpop.xlane.xlu1 %3414 }
 0xe5b   :  { %5691 = vrcp.f32 %v3415_v10 }
 0xe5c   :  { %v3424_v3 = vpop.xlane.xlu0 %3423 }
 0xe5d   :  { %5693 = vrcp.f32 %v3424_v3 }
 0xe5e   :  { %v3421_v49 = vpop.xlane.xlu1 %3420 }
 0xe5f   :  { %5695 = vrcp.f32 %v3421_v49 }
 0xe61   :  { %v3430_v18 = vpop.xlane.xlu0 %3429 }
 0xe62   :  { %5697 = vrcp.f32 %v3430_v18  ;;  %v4938_v18 = vld [vmem:[%s6850_s2 + $0xe0] ss:$0 sm:$0xff] }
 0xe65   :  { %v3986_v28 = vpop.permute.xlu0 %3985 }
 0xe66   :  { %5474 = vmatprep.subr.mxu0 %v3986_v28  ;;  %v5690_v33 = vpop.eup %5689 }
 0xe67   :  { %5475 = vmatpush3.msra.mxu0 %v3986_v28  ;;  %v3454_v22 = vmul.f32 %v5690_v33, %v6601_v13 }
 0xe68   :  { %v5692_v12 = vpop.eup %5691 }
 0xe69   :  { %v3452_v19 = vmul.f32 %v5692_v12, %v6605_v35 }
 0xe6a   :  { %v5694_v47 = vpop.eup %5693 }
 0xe6b   :  { %5469 = vmatprep.mubr.msk.f32.mxu1 %vm1046_vm6, %v3452_v19  ;;  %v3458_v44 = vmul.f32 %v5694_v47, %v6609_v39  ;;  %v4222_v39 = vld [vmem:[%s6850_s2 + $0xd8] sm:$0xff] }
 0xe6c   :  { %v5696_v27 = vpop.eup %5695  ;;  %5470 = vmatmul.mubr.msk.f32.vlgmr.msra.gmra.mxu1 %vm1046_vm6, %v3454_v22  ;;  %5486 = vmatprep.subr.mxu0 %v4222_v39 }
 0xe6d   :  { %5480 = vmatpush3.msra.mxu1 %v6634_v30  ;;  %v3456_v63 = vmul.f32 %v5696_v27, %v6613_v53  ;;  %v4221_v53 = vld [vmem:[%s6850_s2 + $0xd0] sm:$0xff] }
 0xe6f   :  { %5476 = vmatprep.mubr.msk.f32.mxu0 %vm1046_vm6, %v3456_v63  ;;  %v5698_v58 = vpop.eup %5697 }
 0xe70   :  { %5477 = vmatmul.mubr.msk.f32.vlgmr.msra.gmra.mxu0 %vm1046_vm6, %v3458_v44  ;;  %v3462_v42 = vmul.f32 %v5698_v58, %v6617_v24  ;;  %v4220_v24 = vld [vmem:[%s6850_s2 + $0xc8] sm:$0xff] }
 0xe71   :  { %5487 = vmatpush3.msra.mxu0 %v4222_v39 }
 0xe72   :  { %5488 = vmatprep.subr.mxu0 %v4221_v53 }
 0xe73   :  { %5489 = vmatpush3.msra.mxu0 %v4221_v53 }
 0xe74   :  { %5490 = vmatprep.subr.mxu0 %v4220_v24 }
 0xe75   :  { %5491 = vmatpush3.msra.mxu0 %v4220_v24 }
 0xe93   :  { %v3427_v35 = vpop.xlane.xlu1 %3426 }
 0xe94   :  { %5699 = vrcp.f32 %v3427_v35 }
 0xe97   :  { %v4073_v13 = vpop.permute.xlu1 %4072 }
 0xe98   :  { %5481 = vmatprep.subr.mxu1 %v4073_v13 }
 0xe99   :  { %5482 = vmatpush3.msra.mxu1 %v4073_v13 }
 0xea1   :  { %v5700_v25 = vpop.eup %5699 }
 0xea2   :  { %v3460_v26 = vmul.f32 %v5700_v25, %v6626_v55  ;;  %v4219_v55 = vld [vmem:[%s6850_s2 + $0xc0] sm:$0xff] }
 0xea3   :  { %5492 = vmatprep.subr.mxu0 %v4219_v55 }
 0xea4   :  { %5483 = vmatprep.mubr.msk.f32.mxu1 %vm1046_vm6, %v3460_v26  ;;  %5493 = vmatpush3.msra.mxu0 %v4219_v55 }
 0xea5   :  { %5484 = vmatmul.mubr.msk.f32.vlgmr.msra.gmra.mxu1 %vm1046_vm6, %v3462_v42 }
 0xefd   :  { %v5436_v32 = vpop.f32.mrf.mxu1 }
 0xeff   :  { %v3541_v51 = vpop.f32.mrf.mxu1 }
 0xf01   :  { %v5443_v62 = vpop.f32.mrf.mxu1 }
 0xf02   :  { %4165 = vrot.lane.b32.xlu1 %v5443_v62, %s5722_s8 }
 0xf03   :  { %v3628_v57 = vpop.f32.mrf.mxu1 }
 0xf04   :  { %4163 = vrot.lane.b32.xlu0 %v3628_v57, %s5722_s8 }
 0xf05   :  { %v5450_v6 = vpop.f32.mrf.mxu0 }
 0xf06   :  { %4181 = vrot.lane.b32.xlu1 %v5450_v6, %s5723_s1  ;;  %v4401_v6 = vld [vmem:[%s6854_s3 + $0x38] sm:$0xff] }
 0xf07   :  { %v3715_v9 = vpop.f32.mrf.mxu0 }
 0xf08   :  { %4179 = vrot.lane.b32.xlu0 %v3715_v9, %s5723_s1  ;;  %v4400_v9 = vld [vmem:[%s6854_s3 + $0x30] sm:$0xff] }
 0xf09   :  { %v5457_v30 = vpop.f32.mrf.mxu1 }
 0xf0a   :  { %4197 = vrot.lane.b32.xlu1 %v5457_v30, %s5724_s9  ;;  %v4399_v30 = vld [vmem:[%s6854_s3 + $0x28] sm:$0xff] }
 0xf0b   :  { %v3802_v50 = vpop.f32.mrf.mxu1 }
 0xf0c   :  { %4195 = vrot.lane.b32.xlu0 %v3802_v50, %s5724_s9 }
 0xf0d   :  { %v5464_v54 = vpop.f32.mrf.mxu0 }
 0xf0f   :  { %v3889_v36 = vpop.f32.mrf.mxu0 }
 0xf2c   :  { %v5471_v56 = vpop.f32.mrf.mxu1 }
 0xf2d   :  { %4169 = vrot.lane.b32.xlu1 %v5471_v56, %s5722_s8 }
 0xf2e   :  { %v3976_v2 = vpop.f32.mrf.mxu1 }
 0xf2f   :  { %4167 = vrot.lane.b32.xlu0 %v3976_v2, %s5722_s8 }
 0xf30   :  { %v5478_v0 = vpop.f32.mrf.mxu0 }
 0xf31   :  { %4185 = vrot.lane.b32.xlu1 %v5478_v0, %s5723_s1 }
 0xf32   :  { %v4063_v14 = vpop.f32.mrf.mxu0 }
 0xf33   :  { %4183 = vrot.lane.b32.xlu0 %v4063_v14, %s5723_s1 }
 0xf65   :  { %v5485_v8 = vpop.f32.mrf.mxu1 }
 0xf66   :  { %4201 = vrot.lane.b32.xlu1 %v5485_v8, %s5724_s9 }
 0xf67   :  { %v4150_v41 = vpop.f32.mrf.mxu1 }
 0xf68   :  { %4199 = vrot.lane.b32.xlu0 %v4150_v41, %s5724_s9 }
 0xf74   :  { %v4166_v16 = vpop.permute.xlu1 %4165 }
 0xf75   :  { %v4208_v7 = vsel %vm353_vm5, %v5436_v32, %v4166_v16 }
 0xf76   :  { %v4164_v4 = vpop.permute.xlu0 %4163 }
 0xf77   :  { %v4207_v15 = vsel %vm353_vm5, %v3541_v51, %v4164_v4  ;;  %v4516_v4 = vld [vmem:[%s6850_s2 + $0x130] sm:$0xff] }
 0xf78   :  { %v4182_v23 = vpop.permute.xlu1 %4181  ;;  %5514 = vmatprep.subr.mxu0 %v4516_v4 }
 0xf79   :  { %v4212_v52 = vsel %vm1046_vm6, %v4208_v7, %v4182_v23  ;;  %v4515_v23 = vld [vmem:[%s6850_s2 + $0x128] sm:$0xff] }
 0xf7a   :  { %v4180_v61 = vpop.permute.xlu0 %4179 }
 0xf7b   :  { %v4211_v29 = vsel %vm1046_vm6, %v4207_v15, %v4180_v61  ;;  %v4514_v61 = vld [vmem:[%s6850_s2 + $0x120] sm:$0xff]  ;;  %v4513_v15 = vld [vmem:[%s6850_s2 + $0x118] sm:$0xff] }
 0xf7c   :  { %v4198_v11 = vpop.permute.xlu1 %4197 }
 0xf7d   :  { %v4216_v1 = vsel %vm1975_vm7, %v4212_v52, %v4198_v11 }
 0xf7e   :  { %v4196_v60 = vpop.permute.xlu0 %4195 }
 0xf7f   :  { %v4215_v37 = vsel %vm1975_vm7, %v4211_v29, %v4196_v60 }
 0xf80   :  { %5494 = vmatprep.mubr.msk.f32.mxu0 %vm223_vm4, %v4215_v37 }
 0xf81   :  { %5495 = vmatmul.mubr.msk.f32.vlgmr.msra.gmra.mxu0 %vm223_vm4, %v4216_v1 }
 0xf82   :  { %5515 = vmatpush3.msra.mxu0 %v4516_v4 }
 0xf83   :  { %5516 = vmatprep.subr.mxu0 %v4515_v23 }
 0xf84   :  { %5517 = vmatpush3.msra.mxu0 %v4515_v23 }
 0xf85   :  { %5518 = vmatprep.subr.mxu0 %v4514_v61 }
 0xf86   :  { %5519 = vmatpush3.msra.mxu0 %v4514_v61 }
 0xf87   :  { %5520 = vmatprep.subr.mxu0 %v4513_v15 }
 0xf88   :  { %5521 = vmatpush3.msra.mxu0 %v4513_v15 }
 0xf9f   :  { %v4170_v31 = vpop.permute.xlu1 %4169 }
 0xfa0   :  { %v4210_v43 = vsel %vm353_vm5, %v5464_v54, %v4170_v31 }
 0xfa1   :  { %v4168_v38 = vpop.permute.xlu0 %4167 }
 0xfa2   :  { %v4209_v17 = vsel %vm353_vm5, %v3889_v36, %v4168_v38  ;;  %v4943_v38 = vld [vmem:[%s6850_s2 + $0xe8] ss:$0 sm:$0xff] }
 0xfa3   :  { %v4186_v5 = vpop.permute.xlu1 %4185 }
 0xfa4   :  { %v4214_v10 = vsel %vm1046_vm6, %v4210_v43, %v4186_v5 }
 0xfa5   :  { %v4184_v40 = vpop.permute.xlu0 %4183 }
 0xfa6   :  { %v4213_v21 = vsel %vm1046_vm6, %v4209_v17, %v4184_v40 }
 0xfd8   :  { %v4202_v45 = vpop.permute.xlu1 %4201 }
 0xfd9   :  { %v4218_v49 = vsel %vm1975_vm7, %v4214_v10, %v4202_v45  ;;  %v4944_v45 = vld [vmem:[%s6850_s2 + $0xf0] ss:$0 sm:$0xff] }
 0xfda   :  { %v4200_v34 = vpop.permute.xlu0 %4199  ;;  %v4512_v10 = vld [vmem:[%s6850_s2 + $0x110] sm:$0xff] }
 0xfdb   :  { %v4217_v3 = vsel %vm1975_vm7, %v4213_v21, %v4200_v34  ;;  %5522 = vmatprep.subr.mxu0 %v4512_v10 }
 0xfdc   :  { %5497 = vmatprep.mubr.msk.f32.mxu0 %vm223_vm4, %v4217_v3  ;;  %5523 = vmatpush3.msra.mxu0 %v4512_v10 }
 0xfdd   :  { %5498 = vmatmul.mubr.msk.f32.gmra.mxu0 %vm223_vm4, %v4218_v49  ;;  %v4511_v49 = vld [vmem:[%s6850_s2 + $0x108] sm:$0xff] }
 0xfde   :  { %5524 = vmatprep.subr.mxu0 %v4511_v49 }
 0xfdf   :  { %5525 = vmatpush3.msra.mxu0 %v4511_v49 }
0x1041   :  { %v5496_v28 = vpop.f32.mrf.mxu0 }
0x1042   :  { %v4312_v33 = vadd.f32 %v5496_v28, %v4938_v18  ;;  %v4510_v28 = vld [vmem:[%s6850_s2 + $0x100] sm:$0xff] }
0x1043   :  { %v4306_v12 = vpop.f32.mrf.mxu0  ;;  %5526 = vmatprep.subr.mxu0 %v4510_v28 }
0x1044   :  { %v4326_v19 = vadd.f32 %v4312_v33, %v6326_v20  ;;  %v4307_v22 = vadd.f32 %v4938_v18, %v4306_v12  ;;  %v4509_v12 = vld [vmem:[%s6850_s2 + $0xf8] sm:$0xff]  ;;  %5527 = vmatpush3.msra.mxu0 %v4510_v28 }
0x1045   :  { %5528 = vmatprep.subr.mxu0 %v4509_v12 }
0x1046   :  { %v4325_v47 = vadd.f32 %v4307_v22, %v6324_v48  ;;  %v4334_v27 = vsel %vm223_vm4, %v4326_v19, 0.0  ;;  %5529 = vmatpush3.msra.mxu0 %v4509_v12 }
0x1047   :  { %4335 = vadd.xlane.f32.xlu1 %v4334_v27 }
0x1048   :  { %v4331_v63 = vsel %vm223_vm4, %v4325_v47, 0.0 }
0x1049   :  { %4332 = vadd.xlane.f32.xlu0 %v4331_v63 }
0x109d   :  { %v5499_v44 = vpop.f32.mrf.mxu0 }
0x109e   :  { %v4322_v13 = vadd.f32 %v5499_v44, %v4938_v18 }
0x109f   :  { %v4316_v35 = vpop.f32.mrf.mxu0 }
0x10a0   :  { %v4317_v58 = vadd.f32 %v4938_v18, %v4316_v35  ;;  %v4328_v26 = vadd.f32 %v4322_v13, %v6334_v46  ;;  %v4402_v46 = vld [vmem:[%s6854_s3 + $0x40] sm:$0xff] }
0x10a1   :  { %5500 = vmatprep.subr.mxu1 %v4402_v46 }
0x10a2   :  { %v4327_v25 = vadd.f32 %v4317_v58, %v6332_v59  ;;  %v4340_v20 = vsel %vm223_vm4, %v4328_v26, 0.0  ;;  %5501 = vmatpush3.msra.mxu1 %v4402_v46 }
0x10a3   :  { %5502 = vmatprep.subr.mxu1 %v4401_v6 }
0x10a4   :  { %v4337_v42 = vsel %vm223_vm4, %v4327_v25, 0.0  ;;  %5503 = vmatpush3.msra.mxu1 %v4401_v6  ;;  %v4950_v6 = vld [vmem:[%s6850_s2 + $0x138] ss:$0 sm:$0xff] }
0x10a5   :  { %4338 = vadd.xlane.f32.xlu0 %v4337_v42  ;;  %5504 = vmatprep.subr.mxu1 %v4400_v9  ;;  %v4945_v42 = vld [vmem:[%s6854_s3 + $0x48] ss:$0 sm:$0xff] }
0x10a6   :  { %5505 = vmatpush3.msra.mxu1 %v4400_v9 }
0x10a7   :  { %5506 = vmatprep.subr.mxu1 %v4399_v30 }
0x10a8   :  { %5507 = vmatpush3.msra.mxu1 %v4399_v30 }
0x10a9   :  { %4341 = vadd.xlane.f32.xlu0 %v4340_v20 }
0x10d0   :  { %v4336_v48 = vpop.xlane.xlu1 %4335 }
0x10d1   :  { %v4344_v39 = vmul.f32 0.03125, %v4336_v48 }
0x10d2   :  { %v4333_v53 = vpop.xlane.xlu0 %4332 }
0x10d3   :  { %v4348_v32 = vsub.f32 %v4326_v19, %v4344_v39  ;;  %v4343_v24 = vmul.f32 0.03125, %v4333_v53 }
0x10d5   :  { %v4347_v51 = vsub.f32 %v4325_v47, %v4343_v24  ;;  %v4352_v55 = vmul.f32 %v4348_v32, %v4348_v32 }
0x10d7   :  { %v4358_v62 = vsel %vm223_vm4, %v4352_v55, 0.0  ;;  %v4351_v57 = vmul.f32 %v4347_v51, %v4347_v51 }
0x10d8   :  { %4359 = vadd.xlane.f32.xlu0 %v4358_v62 }
0x10d9   :  { %v4355_v59 = vsel %vm223_vm4, %v4351_v57, 0.0 }
0x10da   :  { %4356 = vadd.xlane.f32.xlu1 %v4355_v59 }
0x112e   :  { %v4339_v50 = vpop.xlane.xlu0 %4338 }
0x112f   :  { %v4345_v54 = vmul.f32 0.03125, %v4339_v50 }
0x1131   :  { %v6749_v56 = vsub.f32 %v4327_v25, %v4345_v54 }
0x1132   :  { %v4342_v36 = vpop.xlane.xlu0 %4341 }
0x1133   :  { %v4346_v2 = vmul.f32 0.03125, %v4342_v36  ;;  %v4353_v0 = vmul.f32 %v6749_v56, %v6749_v56 }
0x1135   :  { %v6753_v14 = vsub.f32 %v4328_v26, %v4346_v2  ;;  %v4361_v8 = vsel %vm223_vm4, %v4353_v0, 0.0 }
0x1136   :  { %4362 = vadd.xlane.f32.xlu1 %v4361_v8 }
0x1137   :  { %v4354_v41 = vmul.f32 %v6753_v14, %v6753_v14 }
0x1139   :  { %v4364_v16 = vsel %vm223_vm4, %v4354_v41, 0.0 }
0x113a   :  { %4365 = vadd.xlane.f32.xlu0 %v4364_v16 }
0x1161   :  { %v4360_v11 = vpop.xlane.xlu0 %4359 }
0x1162   :  { %v4368_v7 = vmul.f32 0.03125, %v4360_v11 }
0x1163   :  { %v4357_v29 = vpop.xlane.xlu1 %4356 }
0x1164   :  { %v4372_v60 = vadd.f32 1e-05, %v4368_v7  ;;  %v4367_v52 = vmul.f32 0.03125, %v4357_v29 }
0x1166   :  { %5701 = vrsqrt.f32 %v4372_v60  ;;  %v4371_v37 = vadd.f32 1e-05, %v4367_v52 }
0x1168   :  { %5703 = vrsqrt.f32 %v4371_v37 }
0x1173   :  { %v5702_v1 = vpop.eup %5701 }
0x1174   :  { %v4380_v31 = vmul.f32 %v5702_v1, %v4348_v32 }
0x1175   :  { %v5704_v5 = vpop.eup %5703 }
0x1176   :  { %v4379_v40 = vmul.f32 %v5704_v5, %v4347_v51  ;;  %v4388_v17 = vmul.f32 %v4943_v38, %v4380_v31 }
0x1178   :  { %v4387_v43 = vmul.f32 %v4943_v38, %v4379_v40  ;;  %v4396_v34 = vadd.f32 %v4944_v45, %v4388_v17 }
0x117a   :  { %v4395_v21 = vadd.f32 %v4944_v45, %v4387_v43  ;;  %v4955_v43 = vld [vmem:[%s6850_s2 + $0x140] ss:$0 sm:$0xff] }
0x117c   :  { %5508 = vmatprep.mubr.msk.f32.mxu1 %vm223_vm4, %v4395_v21 }
0x117d   :  { %5509 = vmatmul.mubr.msk.f32.vlgmr.msra.gmra.mxu1 %vm223_vm4, %v4396_v34 }
0x11bf   :  { %v4363_v3 = vpop.xlane.xlu1 %4362 }
0x11c0   :  { %v4369_v18 = vmul.f32 0.03125, %v4363_v3  ;;  %v4956_v3 = vld [vmem:[%s6850_s2 + $0x148] ss:$0 sm:$0xff] }
0x11c2   :  { %v4373_v33 = vadd.f32 1e-05, %v4369_v18 }
0x11c3   :  { %v4366_v19 = vpop.xlane.xlu0 %4365 }
0x11c4   :  { %5705 = vrsqrt.f32 %v4373_v33  ;;  %v4370_v22 = vmul.f32 0.03125, %v4366_v19 }
0x11c6   :  { %v4374_v47 = vadd.f32 1e-05, %v4370_v22 }
0x11c8   :  { %5707 = vrsqrt.f32 %v4374_v47 }
0x11d1   :  { %v5706_v27 = vpop.eup %5705 }
0x11d2   :  { %v4381_v63 = vmul.f32 %v5706_v27, %v6749_v56 }
0x11d4   :  { %v4389_v44 = vmul.f32 %v4943_v38, %v4381_v63 }
0x11d5   :  { %v5708_v35 = vpop.eup %5707 }
0x11d6   :  { %v4397_v13 = vadd.f32 %v4944_v45, %v4389_v44  ;;  %v4382_v58 = vmul.f32 %v5708_v35, %v6753_v14 }
0x11d8   :  { %5511 = vmatprep.mubr.msk.f32.mxu1 %vm223_vm4, %v4397_v13  ;;  %v4390_v25 = vmul.f32 %v4943_v38, %v4382_v58 }
0x11da   :  { %v4398_v26 = vadd.f32 %v4944_v45, %v4390_v25  ;;  %v4957_v25 = vld [vmem:[%s6850_s2 + $0x150] ss:$0 sm:$0xff] }
0x11dc   :  { %5512 = vmatmul.mubr.msk.f32.gmra.mxu1 %vm223_vm4, %v4398_v26 }
0x123d   :  { %v5510_v20 = vpop.f32.mrf.mxu1 }
0x123e   :  { %v4492_v48 = vadd.f32 %v5510_v20, %v4945_v42 }
0x123f   :  { %v4486_v39 = vpop.f32.mrf.mxu1 }
0x1240   :  { %v4487_v53 = vadd.f32 %v4945_v42, %v4486_v39  ;;  %v4506_v24 = vmax.f32 %v4492_v48, 0.0 }
0x1242   :  { %v4505_v32 = vmax.f32 %v4487_v53, 0.0 }
0x1244   :  { %5530 = vmatprep.mubr.msk.f32.mxu0 %vm2284_vm8, %v4505_v32 }
0x1245   :  { %5531 = vmatmul.mubr.msk.f32.vlgmr.msra.gmra.mxu0 %vm2284_vm8, %v4506_v24 }
0x129c   :  { %v5513_v51 = vpop.f32.mrf.mxu1 }
0x129d   :  { %v4502_v55 = vadd.f32 %v5513_v51, %v4945_v42 }
0x129e   :  { %v4496_v62 = vpop.f32.mrf.mxu1 }
0x129f   :  { %v4497_v57 = vadd.f32 %v4945_v42, %v4496_v62  ;;  %v4508_v46 = vmax.f32 %v4502_v55, 0.0  ;;  %v4958_v42 = vld [vmem:[%s6850_s2 + $0x158] ss:$0 sm:$0xff]  ;;  %v5725_v62 = vmov 0.0  }
0x12a0   :  { %5536 = vmatprep.subr.mxu1 %v5725_v62  ;;  %5544 = vmatprep.mubr.msk.f32.mxu1 %vm5726_vm10, %v5725_v62 }
0x12a1   :  { %v4507_v59 = vmax.f32 %v4497_v57, 0.0  ;;  %v4717_v57 = vld [vmem:[%s6850_s2 + $0x188] sm:$0xff] }
0x12a2   :  { %5537 = vmatpush3.msra.mxu1 %v4717_v57 }
0x12a3   :  { %5533 = vmatprep.mubr.msk.f32.mxu0 %vm2284_vm8, %v4507_v59  ;;  %5538 = vmatprep.subr.mxu1 %v5725_v62  ;;  %v4716_v59 = vld [vmem:[%s6850_s2 + $0x180] sm:$0xff] }
0x12a4   :  { %5534 = vmatmul.mubr.msk.f32.gmra.mxu0 %vm2284_vm8, %v4508_v46  ;;  %5539 = vmatpush3.msra.mxu1 %v4716_v59  ;;  %v4715_v46 = vld [vmem:[%s6850_s2 + $0x178] sm:$0xff] }
0x12a5   :  { %5540 = vmatprep.subr.mxu1 %v5725_v62 }
0x12a6   :  { %5541 = vmatpush3.msra.mxu1 %v4715_v46 }
0x12a7   :  { %5542 = vmatprep.subr.mxu1 %v5725_v62 }
0x1305   :  { %v5532_v9 = vpop.f32.mrf.mxu0 }
0x1306   :  { %v4605_v30 = vadd.f32 %v5532_v9, %v4950_v6 }
0x1307   :  { %v4600_v50 = vpop.f32.mrf.mxu0 }
0x1308   :  { %v4617_v54 = vadd.f32 %v4605_v30, %v4396_v34 }
0x130a   :  { %v4621_v56 = vsel %vm223_vm4, %v4617_v54, 0.0 }
0x130b   :  { %4622 = vadd.xlane.f32.xlu0 %v4621_v56  ;;  %v4959_v56 = vld [vmem:[%s6850_s2 + $0x160] ss:$0 sm:$0xff] }
0x1364   :  { %v5535_v36 = vpop.f32.mrf.mxu0 }
0x1365   :  { %v4614_v2 = vadd.f32 %v5535_v36, %v4950_v6  ;;  %v4714_v6 = vld [vmem:[%s6850_s2 + $0x170] sm:$0xff] }
0x1366   :  { %v4609_v0 = vpop.f32.mrf.mxu0  ;;  %5543 = vmatpush3.msra.mxu1 %v4714_v6 }
0x1367   :  { %v4618_v14 = vadd.f32 %v4614_v2, %v4398_v26  ;;  %v4960_v2 = vld [vmem:[%s6850_s2 + $0x168] ss:$0 sm:$0xff] }
0x1369   :  { %v4624_v8 = vsel %vm223_vm4, %v4618_v14, 0.0 }
0x136a   :  { %4625 = vadd.xlane.f32.xlu1 %v4624_v8  ;;  %v4961_v8 = vld [vmem:[%s6850_s2 + $0x190] ss:$0 sm:$0xff] }
0x1394   :  { %v4623_v41 = vpop.xlane.xlu0 %4622 }
0x1395   :  { %v4627_v16 = vmul.f32 0.03125, %v4623_v41 }
0x1397   :  { %v4629_v4 = vsub.f32 %v4617_v54, %v4627_v16 }
0x1399   :  { %v4631_v23 = vmul.f32 %v4629_v4, %v4629_v4 }
0x139b   :  { %v4633_v61 = vsel %vm223_vm4, %v4631_v23, 0.0 }
0x139c   :  { %4634 = vadd.xlane.f32.xlu0 %v4633_v61 }
0x13f3   :  { %v4626_v15 = vpop.xlane.xlu1 %4625 }
0x13f4   :  { %v4628_v11 = vmul.f32 0.03125, %v4626_v15 }
0x13f6   :  { %v4630_v7 = vsub.f32 %v4618_v14, %v4628_v11 }
0x13f8   :  { %v4632_v29 = vmul.f32 %v4630_v7, %v4630_v7 }
0x13fa   :  { %v4636_v60 = vsel %vm223_vm4, %v4632_v29, 0.0 }
0x13fb   :  { %4637 = vadd.xlane.f32.xlu1 %v4636_v60 }
0x1425   :  { %v4635_v52 = vpop.xlane.xlu0 %4634 }
0x1426   :  { %v4639_v37 = vmul.f32 0.03125, %v4635_v52 }
0x1428   :  { %v4641_v1 = vadd.f32 1e-05, %v4639_v37 }
0x142a   :  { %5709 = vrsqrt.f32 %v4641_v1 }
0x1437   :  { %v5710_v40 = vpop.eup %5709 }
0x1438   :  { %v4645_v17 = vmul.f32 %v5710_v40, %v4629_v4 }
0x143a   :  { %v4651_v34 = vmul.f32 %v4955_v43, %v4645_v17 }
0x143c   :  { %v4657_v18 = vadd.f32 %v4956_v3, %v4651_v34 }
0x1484   :  { %v4638_v31 = vpop.xlane.xlu1 %4637 }
0x1485   :  { %v4640_v38 = vmul.f32 0.03125, %v4638_v31 }
0x1487   :  { %v4642_v5 = vadd.f32 1e-05, %v4640_v38 }
0x1489   :  { %5711 = vrsqrt.f32 %v4642_v5 }
0x1496   :  { %v5712_v45 = vpop.eup %5711 }
0x1497   :  { %v4646_v21 = vmul.f32 %v5712_v45, %v4630_v7 }
0x1499   :  { %v4652_v10 = vmul.f32 %v4955_v43, %v4646_v21 }
0x149b   :  { %v4658_v49 = vadd.f32 %v4956_v3, %v4652_v10 }
0x149d   :  { %v4660_v28 = vrot.slane %v4658_v49, 4 }
0x149f   :  { %v4663_v33 = vsel %vm4662_vm9, %v4657_v18, %v4660_v28 }
0x14a0   :  { %v4666_v12 = vsel %vm223_vm4, %v4663_v33, 0.0 }
0x14a1   :  { %4667 = vadd.xlane.f32.xlu1 %v4666_v12 }
0x152a   :  { %v4668_v19 = vpop.xlane.xlu1 %4667 }
0x152b   :  { %v4669_v22 = vmul.f32 0.03125, %v4668_v19 }
0x152d   :  { %v4670_v47 = vsub.f32 %v4663_v33, %v4669_v22 }
0x152f   :  { %v4671_v27 = vmul.f32 %v4670_v47, %v4670_v47 }
0x1531   :  { %v4672_v63 = vsel %vm223_vm4, %v4671_v27, 0.0 }
0x1532   :  { %4673 = vadd.xlane.f32.xlu0 %v4672_v63 }
0x15bb   :  { %v4674_v44 = vpop.xlane.xlu0 %4673 }
0x15bc   :  { %v4675_v35 = vmul.f32 0.03125, %v4674_v44 }
0x15be   :  { %v4676_v13 = vadd.f32 1e-05, %v4675_v35 }
0x15c0   :  { %5713 = vrsqrt.f32 %v4676_v13 }
0x15cd   :  { %v5714_v58 = vpop.eup %5713 }
0x15ce   :  { %v4678_v26 = vmul.f32 %v5714_v58, %v4670_v47 }
0x15d0   :  { %v4683_v20 = vmul.f32 %v4957_v25, %v4678_v26 }
0x15d2   :  { %v4688_v48 = vadd.f32 %v4958_v42, %v4683_v20 }
0x15d4   :  { %v4691_v39 = vsel %vm223_vm4, %v4688_v48, 0.0 }
0x15d5   :  { %4692 = vadd.xlane.f32.xlu1 %v4691_v39 }
0x165e   :  { %v4693_v53 = vpop.xlane.xlu1 %4692 }
0x165f   :  { %v4694_v32 = vmul.f32 0.03125, %v4693_v53 }
0x1661   :  { %v4695_v24 = vsub.f32 %v4688_v48, %v4694_v32 }
0x1663   :  { %v4696_v51 = vmul.f32 %v4695_v24, %v4695_v24 }
0x1665   :  { %v4697_v55 = vsel %vm223_vm4, %v4696_v51, 0.0 }
0x1666   :  { %4698 = vadd.xlane.f32.xlu0 %v4697_v55 }
0x16ef   :  { %v4699_v9 = vpop.xlane.xlu0 %4698 }
0x16f0   :  { %v4700_v30 = vmul.f32 0.03125, %v4699_v9 }
0x16f2   :  { %v4701_v50 = vadd.f32 1e-05, %v4700_v30 }
0x16f4   :  { %5715 = vrsqrt.f32 %v4701_v50 }
0x1701   :  { %v5716_v54 = vpop.eup %5715 }
0x1702   :  { %v4703_v36 = vmul.f32 %v5716_v54, %v4695_v24 }
0x1704   :  { %v4708_v0 = vmul.f32 %v4959_v56, %v4703_v36 }
0x1706   :  { %v4713_v14 = vadd.f32 %v4960_v2, %v4708_v0 }
0x1708   :  { %5545 = vmatmul.mubr.msk.f32.vlgmr.msra.gmra.mxu1 %vm223_vm4, %v4713_v14 }
0x17c8   :  { %v4792_v41 = vpop.f32.mrf.mxu1 }
0x17c9   :  { %v4793_v16 = vadd.f32 %v4961_v8, %v4792_v41 }
0x17ca   :  { %v5546_v4 = vpop.f32.mrf.mxu1 }
0x17cb   :  { %4797 = vst.msk [vmem:[%s6855_s5] sm:$0xff] %vm4796_vm11, %v4793_v16 }

</bundles_post_ra>
